<compile_context>
chip_gen: v7x
topology: tpu7x:2x2x1
jax: 0.10.0
libtpu: 0.0.40
codegen_flags: <defaults>
</compile_context>

<pallas_src>
import jax
import jax.numpy as jnp
from jax.experimental import pallas as pl
from jax.experimental.pallas import tpu as pltpu


def _block_kernel(x_ref, w1_ref, b1_ref, w2_ref, b2_ref, w3_ref, b3_ref,
                  w4_ref, b4_ref, wf_ref, bf_ref, out_ref):
    Bt, T = x_ref.shape
    k, c = w1_ref.shape
    p = (k - 1) // 2

    # Hoisted shift masks, shared across all conv layers / channels.
    t_idx = jax.lax.broadcasted_iota(jnp.int32, (1, T), 1)
    masks = {}
    for off in range(-p, p + 1):
        if off != 0:
            masks[off] = jnp.logical_and(t_idx + off >= 0, t_idx + off < T)

    def shift(h, off):
        # out[..., t] = h[..., t + off], zero-padded outside [0, T)
        if off == 0:
            return h
        return jnp.where(masks[off], jnp.roll(h, -off, axis=-1), 0.0)

    x = x_ref[...]                                            # (Bt, T)

    # ---- conv1d_1 (in_channels = 1) + ReLU : VPU broadcast-MAC --------------
    x_sh = [shift(x, j - p) for j in range(k)]
    accs = [jnp.zeros((Bt, T), jnp.float32) for _ in range(c)]
    for j in range(k):
        for co in range(c):
            accs[co] = accs[co] + w1_ref[j:j + 1, co:co + 1] * x_sh[j]
    hs = [jnp.maximum(accs[co] + b1_ref[0:1, co:co + 1], 0.0)
          for co in range(c)]

    # ---- conv1d_{2,3,4} + residual + ReLU : VPU broadcast-MAC ---------------
    def conv_residual_relu(hs, w_ref, b_ref):
        accs = [jnp.zeros((Bt, T), jnp.float32) for _ in range(c)]
        for j in range(k):
            w_j = w_ref[j]                                    # (c_out, c_in)
            for ci in range(c):
                s = shift(hs[ci], j - p)
                for co in range(c):
                    accs[co] = accs[co] + w_j[co:co + 1, ci:ci + 1] * s
        return [jnp.maximum(accs[co] + b_ref[0:1, co:co + 1] + hs[co], 0.0)
                for co in range(c)]

    hs = conv_residual_relu(hs, w2_ref, b2_ref)
    hs = conv_residual_relu(hs, w3_ref, b3_ref)
    hs = conv_residual_relu(hs, w4_ref, b4_ref)

    # ---- fused FC heads: (B_tile, c*T) @ (c*T, 2T), accumulated over ci -----
    fc = jnp.dot(hs[0], wf_ref[0], preferred_element_type=jnp.float32)
    for ci in range(1, c):
        fc = fc + jnp.dot(hs[ci], wf_ref[ci],
                          preferred_element_type=jnp.float32)
    out_ref[...] = (fc + bf_ref[...]).astype(out_ref.dtype)


def init_params(key, c, k, T):
    ks = jax.random.split(key, 12)
    s = 0.1
    w1 = s * jax.random.normal(ks[0], (c, 1, k), jnp.float32)
    b1 = s * jax.random.normal(ks[1], (c,), jnp.float32)
    w2 = s * jax.random.normal(ks[2], (c, c, k), jnp.float32)
    b2 = s * jax.random.normal(ks[3], (c,), jnp.float32)
    w3 = s * jax.random.normal(ks[4], (c, c, k), jnp.float32)
    b3 = s * jax.random.normal(ks[5], (c,), jnp.float32)
    w4 = s * jax.random.normal(ks[6], (c, c, k), jnp.float32)
    b4 = s * jax.random.normal(ks[7], (c,), jnp.float32)
    wf1 = s * jax.random.normal(ks[8], (T, c * T), jnp.float32)   # PyTorch Linear: (out, in)
    bf1 = s * jax.random.normal(ks[9], (T,), jnp.float32)
    wf2 = s * jax.random.normal(ks[10], (T, c * T), jnp.float32)
    bf2 = s * jax.random.normal(ks[11], (T,), jnp.float32)
    return (w1, b1, w2, b2, w3, b3, w4, b4, wf1, bf1, wf2, bf2)


def block_forward(x, params, b_tile=None):
    # x: (B, 1, T) float32 (same NCW convention as the PyTorch module)
    B, _, T = x.shape
    w1, b1, w2, b2, w3, b3, w4, b4, wf1, bf1, wf2, bf2 = params
    c, _, k = w1.shape

    # --- batch tiling --------------------------------------------------------
    if b_tile is None:
        b_tile = B if B <= 128 else 128
    b_tile = max(1, min(b_tile, B))
    n_steps = -(-B // b_tile)
    if n_steps > 1 and b_tile % 8 != 0:        # keep sublane alignment
        b_tile = ((b_tile + 7) // 8) * 8
        n_steps = -(-B // b_tile)
    b_pad = n_steps * b_tile

    x2 = x[:, 0, :]                            # (B, T)
    if b_pad != B:
        x2 = jnp.pad(x2, ((0, b_pad - B), (0, 0)))

    # --- parameter re-layout (plain-JAX glue) --------------------------------
    w1k = jnp.transpose(w1[:, 0, :], (1, 0))   # (k, c)
    w2k = jnp.transpose(w2, (2, 0, 1))         # (k, c_out, c_in)
    w3k = jnp.transpose(w3, (2, 0, 1))
    w4k = jnp.transpose(w4, (2, 0, 1))
    b1r = b1.reshape(1, c)
    b2r = b2.reshape(1, c)
    b3r = b3.reshape(1, c)
    b4r = b4.reshape(1, c)
    # fused FC heads: (c*T, T) per head, concatenated along the output dim
    wfk = jnp.concatenate([wf1.T.reshape(c, T, T), wf2.T.reshape(c, T, T)],
                          axis=-1)             # (c, T, 2T)
    bfr = jnp.concatenate([bf1, bf2]).reshape(1, 2 * T)

    def const_spec(shape):
        n = len(shape)
        return pl.BlockSpec(shape, lambda b, _n=n: (0,) * _n)

    grid_spec = pltpu.PrefetchScalarGridSpec(
        num_scalar_prefetch=0,
        grid=(n_steps,),
        in_specs=[
            pl.BlockSpec((b_tile, T), lambda b: (b, 0)),        # x
            const_spec((k, c)), const_spec((1, c)),             # conv1
            const_spec((k, c, c)), const_spec((1, c)),          # conv2
            const_spec((k, c, c)), const_spec((1, c)),          # conv3
            const_spec((k, c, c)), const_spec((1, c)),          # conv4
            const_spec((c, T, 2 * T)), const_spec((1, 2 * T)),  # fused FC
        ],
        out_specs=pl.BlockSpec((b_tile, 2 * T), lambda b: (b, 0)),
    )

    out = pl.pallas_call(
        _block_kernel,
        out_shape=jax.ShapeDtypeStruct((b_pad, 2 * T), jnp.float32),
        grid_spec=grid_spec,
        compiler_params=pltpu.CompilerParams(
            dimension_semantics=("parallel",),
            vmem_limit_bytes=64 * 1024 * 1024),
    )(x2, w1k, b1r, w2k, b2r, w3k, b3r, w4k, b4r, wfk, bfr)

    # .unsqueeze(1) in the PyTorch forward; split the two heads back apart.
    signal = out[:B, None, :T]
    noise = out[:B, None, T:]
    return signal, noise


def ref_forward(x, params):
    # pure-JAX reference mirroring the PyTorch module (cross-correlation Conv1d)
    w1, b1, w2, b2, w3, b3, w4, b4, wf1, bf1, wf2, bf2 = params
    c, _, k = w1.shape
    p = (k - 1) // 2
    B, _, T = x.shape

    def conv(h, w, b):
        y = jax.lax.conv_general_dilated(
            h, w, window_strides=(1,), padding=[(p, p)],
            dimension_numbers=("NCH", "OIH", "NCH"))
        return y + b[None, :, None]

    h = jax.nn.relu(conv(x, w1, b1))
    h = jax.nn.relu(conv(h, w2, b2) + h)
    h = jax.nn.relu(conv(h, w3, b3) + h)
    h = jax.nn.relu(conv(h, w4, b4) + h)
    flat = h.reshape(B, c * T)
    sig = flat @ wf1.T + bf1
    noi = flat @ wf2.T + bf2
    return sig[:, None, :], noi[:, None, :]


if __name__ == "__main__":
    B, c, k, T = 12, 4, 3, 16
    key = jax.random.PRNGKey(0)
    kx, kp = jax.random.split(key)
    x = jax.random.normal(kx, (B, 1, T), jnp.float32)
    params = init_params(kp, c, k, T)

    # b_tile=8 -> 2 grid steps + batch padding path gets exercised.
    sig, noi = block_forward(x, params, b_tile=8)
    jax.block_until_ready((sig, noi))

    sig_ref, noi_ref = ref_forward(x, params)
    assert sig.shape == (B, 1, T) and noi.shape == (B, 1, T)
    assert jnp.allclose(sig, sig_ref, atol=1e-4, rtol=1e-4)
    assert jnp.allclose(noi, noi_ref, atol=1e-4, rtol=1e-4)

    print("KERNEL_OK")
</pallas_src>

<mosaic_0001>
module attributes {stable_mosaic.version = 11 : i64} {
  func.func @_block_kernel(%arg0: i32, %arg1: memref<8x16xf32, #tpu.memory_space<vmem>>, %arg2: memref<3x4xf32, #tpu.memory_space<vmem>>, %arg3: memref<1x4xf32, #tpu.memory_space<vmem>>, %arg4: memref<3x4x4xf32, #tpu.memory_space<vmem>>, %arg5: memref<1x4xf32, #tpu.memory_space<vmem>>, %arg6: memref<3x4x4xf32, #tpu.memory_space<vmem>>, %arg7: memref<1x4xf32, #tpu.memory_space<vmem>>, %arg8: memref<3x4x4xf32, #tpu.memory_space<vmem>>, %arg9: memref<1x4xf32, #tpu.memory_space<vmem>>, %arg10: memref<4x16x32xf32, #tpu.memory_space<vmem>>, %arg11: memref<1x32xf32, #tpu.memory_space<vmem>>, %arg12: memref<8x32xf32, #tpu.memory_space<vmem>>) attributes {dimension_semantics = [#tpu.dimension_semantics<parallel>], iteration_bounds = array<i64: 2>, scalar_prefetch = 0 : i64, scratch_operands = 0 : i64, tpu.core_type = #tpu.core_type<tc>, window_params = [{transform_indices = @transform_0, window_bounds = array<i64: 8, 16>}, {pipeline_mode = #tpu.pipeline_mode<synchronous>, transform_indices = @transform_1, window_bounds = array<i64: 3, 4>}, {pipeline_mode = #tpu.pipeline_mode<synchronous>, transform_indices = @transform_2, window_bounds = array<i64: 1, 4>}, {pipeline_mode = #tpu.pipeline_mode<synchronous>, transform_indices = @transform_3, window_bounds = array<i64: 3, 4, 4>}, {pipeline_mode = #tpu.pipeline_mode<synchronous>, transform_indices = @transform_4, window_bounds = array<i64: 1, 4>}, {pipeline_mode = #tpu.pipeline_mode<synchronous>, transform_indices = @transform_5, window_bounds = array<i64: 3, 4, 4>}, {pipeline_mode = #tpu.pipeline_mode<synchronous>, transform_indices = @transform_6, window_bounds = array<i64: 1, 4>}, {pipeline_mode = #tpu.pipeline_mode<synchronous>, transform_indices = @transform_7, window_bounds = array<i64: 3, 4, 4>}, {pipeline_mode = #tpu.pipeline_mode<synchronous>, transform_indices = @transform_8, window_bounds = array<i64: 1, 4>}, {pipeline_mode = #tpu.pipeline_mode<synchronous>, transform_indices = @transform_9, window_bounds = array<i64: 4, 16, 32>}, {pipeline_mode = #tpu.pipeline_mode<synchronous>, transform_indices = @transform_10, window_bounds = array<i64: 1, 32>}, {transform_indices = @transform_11, window_bounds = array<i64: 8, 32>}]} {
    %0 = tpu.iota {dimensions = array<i32: 1>} : vector<1x16xi32>
    %c-1_i32 = arith.constant -1 : i32
    %1 = vector.broadcast %c-1_i32 : i32 to vector<1x16xi32>
    %2 = arith.addi %0, %1 : vector<1x16xi32>
    %c0_i32 = arith.constant 0 : i32
    %3 = vector.broadcast %c0_i32 : i32 to vector<1x16xi32>
    %4 = arith.cmpi sge, %2, %3 : vector<1x16xi32>
    %c-1_i32_0 = arith.constant -1 : i32
    %5 = vector.broadcast %c-1_i32_0 : i32 to vector<1x16xi32>
    %6 = arith.addi %0, %5 : vector<1x16xi32>
    %c16_i32 = arith.constant 16 : i32
    %7 = vector.broadcast %c16_i32 : i32 to vector<1x16xi32>
    %8 = arith.cmpi slt, %6, %7 : vector<1x16xi32>
    %9 = arith.andi %4, %8 : vector<1x16xi1>
    %c1_i32 = arith.constant 1 : i32
    %10 = vector.broadcast %c1_i32 : i32 to vector<1x16xi32>
    %11 = arith.addi %0, %10 : vector<1x16xi32>
    %c0_i32_1 = arith.constant 0 : i32
    %12 = vector.broadcast %c0_i32_1 : i32 to vector<1x16xi32>
    %13 = arith.cmpi sge, %11, %12 : vector<1x16xi32>
    %c1_i32_2 = arith.constant 1 : i32
    %14 = vector.broadcast %c1_i32_2 : i32 to vector<1x16xi32>
    %15 = arith.addi %0, %14 : vector<1x16xi32>
    %c16_i32_3 = arith.constant 16 : i32
    %16 = vector.broadcast %c16_i32_3 : i32 to vector<1x16xi32>
    %17 = arith.cmpi slt, %15, %16 : vector<1x16xi32>
    %18 = arith.andi %13, %17 : vector<1x16xi1>
    %c0 = arith.constant 0 : index
    %c0_4 = arith.constant 0 : index
    %19 = vector.load %arg1[%c0, %c0_4] : memref<8x16xf32, #tpu.memory_space<vmem>>, vector<8x16xf32>
    %20 = vector.extract_strided_slice %19 {offsets = [0, 15], sizes = [8, 1], strides = [1, 1]} : vector<8x16xf32> to vector<8x1xf32>
    %21 = vector.extract_strided_slice %19 {offsets = [0, 0], sizes = [8, 15], strides = [1, 1]} : vector<8x16xf32> to vector<8x15xf32>
    %22 = tpu.concatenate %20, %21 in 1 : vector<8x1xf32>, vector<8x15xf32> -> vector<8x16xf32>
    %cst = arith.constant 0.000000e+00 : f32
    %23 = vector.shape_cast %9 : vector<1x16xi1> to vector<1x16xi1>
    %24 = vector.broadcast %23 : vector<1x16xi1> to vector<8x16xi1>
    %25 = vector.broadcast %cst : f32 to vector<8x16xf32>
    %26 = arith.select %24, %22, %25 : vector<8x16xi1>, vector<8x16xf32>
    %27 = vector.extract_strided_slice %19 {offsets = [0, 1], sizes = [8, 15], strides = [1, 1]} : vector<8x16xf32> to vector<8x15xf32>
    %28 = vector.extract_strided_slice %19 {offsets = [0, 0], sizes = [8, 1], strides = [1, 1]} : vector<8x16xf32> to vector<8x1xf32>
    %29 = tpu.concatenate %27, %28 in 1 : vector<8x15xf32>, vector<8x1xf32> -> vector<8x16xf32>
    %cst_5 = arith.constant 0.000000e+00 : f32
    %30 = vector.shape_cast %18 : vector<1x16xi1> to vector<1x16xi1>
    %31 = vector.broadcast %30 : vector<1x16xi1> to vector<8x16xi1>
    %32 = vector.broadcast %cst_5 : f32 to vector<8x16xf32>
    %33 = arith.select %31, %29, %32 : vector<8x16xi1>, vector<8x16xf32>
    %cst_6 = arith.constant 0.000000e+00 : f32
    %34 = vector.broadcast %cst_6 : f32 to vector<8x16xf32>
    %cst_7 = arith.constant 0.000000e+00 : f32
    %35 = vector.broadcast %cst_7 : f32 to vector<8x16xf32>
    %cst_8 = arith.constant 0.000000e+00 : f32
    %36 = vector.broadcast %cst_8 : f32 to vector<8x16xf32>
    %cst_9 = arith.constant 0.000000e+00 : f32
    %37 = vector.broadcast %cst_9 : f32 to vector<8x16xf32>
    %c0_10 = arith.constant 0 : index
    %c0_11 = arith.constant 0 : index
    %38 = vector.load %arg2[%c0_10, %c0_11] : memref<3x4xf32, #tpu.memory_space<vmem>>, vector<1x1xf32>
    %39 = vector.broadcast %38 : vector<1x1xf32> to vector<8x16xf32>
    %40 = arith.mulf %39, %26 : vector<8x16xf32>
    %41 = arith.addf %34, %40 : vector<8x16xf32>
    %c0_12 = arith.constant 0 : index
    %c1 = arith.constant 1 : index
    %42 = vector.load %arg2[%c0_12, %c1] : memref<3x4xf32, #tpu.memory_space<vmem>>, vector<1x1xf32>
    %43 = vector.broadcast %42 : vector<1x1xf32> to vector<8x16xf32>
    %44 = arith.mulf %43, %26 : vector<8x16xf32>
    %45 = arith.addf %35, %44 : vector<8x16xf32>
    %c0_13 = arith.constant 0 : index
    %c2 = arith.constant 2 : index
    %46 = vector.load %arg2[%c0_13, %c2] : memref<3x4xf32, #tpu.memory_space<vmem>>, vector<1x1xf32>
    %47 = vector.broadcast %46 : vector<1x1xf32> to vector<8x16xf32>
    %48 = arith.mulf %47, %26 : vector<8x16xf32>
    %49 = arith.addf %36, %48 : vector<8x16xf32>
    %c0_14 = arith.constant 0 : index
    %c3 = arith.constant 3 : index
    %50 = vector.load %arg2[%c0_14, %c3] : memref<3x4xf32, #tpu.memory_space<vmem>>, vector<1x1xf32>
    %51 = vector.broadcast %50 : vector<1x1xf32> to vector<8x16xf32>
    %52 = arith.mulf %51, %26 : vector<8x16xf32>
    %53 = arith.addf %37, %52 : vector<8x16xf32>
    %c1_15 = arith.constant 1 : index
    %c0_16 = arith.constant 0 : index
    %54 = vector.load %arg2[%c1_15, %c0_16] : memref<3x4xf32, #tpu.memory_space<vmem>>, vector<1x1xf32>
    %55 = vector.broadcast %54 : vector<1x1xf32> to vector<8x16xf32>
    %56 = arith.mulf %55, %19 : vector<8x16xf32>
    %57 = arith.addf %41, %56 : vector<8x16xf32>
    %c1_17 = arith.constant 1 : index
    %c1_18 = arith.constant 1 : index
    %58 = vector.load %arg2[%c1_17, %c1_18] : memref<3x4xf32, #tpu.memory_space<vmem>>, vector<1x1xf32>
    %59 = vector.broadcast %58 : vector<1x1xf32> to vector<8x16xf32>
    %60 = arith.mulf %59, %19 : vector<8x16xf32>
    %61 = arith.addf %45, %60 : vector<8x16xf32>
    %c1_19 = arith.constant 1 : index
    %c2_20 = arith.constant 2 : index
    %62 = vector.load %arg2[%c1_19, %c2_20] : memref<3x4xf32, #tpu.memory_space<vmem>>, vector<1x1xf32>
    %63 = vector.broadcast %62 : vector<1x1xf32> to vector<8x16xf32>
    %64 = arith.mulf %63, %19 : vector<8x16xf32>
    %65 = arith.addf %49, %64 : vector<8x16xf32>
    %c1_21 = arith.constant 1 : index
    %c3_22 = arith.constant 3 : index
    %66 = vector.load %arg2[%c1_21, %c3_22] : memref<3x4xf32, #tpu.memory_space<vmem>>, vector<1x1xf32>
    %67 = vector.broadcast %66 : vector<1x1xf32> to vector<8x16xf32>
    %68 = arith.mulf %67, %19 : vector<8x16xf32>
    %69 = arith.addf %53, %68 : vector<8x16xf32>
    %c2_23 = arith.constant 2 : index
    %c0_24 = arith.constant 0 : index
    %70 = vector.load %arg2[%c2_23, %c0_24] : memref<3x4xf32, #tpu.memory_space<vmem>>, vector<1x1xf32>
    %71 = vector.broadcast %70 : vector<1x1xf32> to vector<8x16xf32>
    %72 = arith.mulf %71, %33 : vector<8x16xf32>
    %73 = arith.addf %57, %72 : vector<8x16xf32>
    %c2_25 = arith.constant 2 : index
    %c1_26 = arith.constant 1 : index
    %74 = vector.load %arg2[%c2_25, %c1_26] : memref<3x4xf32, #tpu.memory_space<vmem>>, vector<1x1xf32>
    %75 = vector.broadcast %74 : vector<1x1xf32> to vector<8x16xf32>
    %76 = arith.mulf %75, %33 : vector<8x16xf32>
    %77 = arith.addf %61, %76 : vector<8x16xf32>
    %c2_27 = arith.constant 2 : index
    %c2_28 = arith.constant 2 : index
    %78 = vector.load %arg2[%c2_27, %c2_28] : memref<3x4xf32, #tpu.memory_space<vmem>>, vector<1x1xf32>
    %79 = vector.broadcast %78 : vector<1x1xf32> to vector<8x16xf32>
    %80 = arith.mulf %79, %33 : vector<8x16xf32>
    %81 = arith.addf %65, %80 : vector<8x16xf32>
    %c2_29 = arith.constant 2 : index
    %c3_30 = arith.constant 3 : index
    %82 = vector.load %arg2[%c2_29, %c3_30] : memref<3x4xf32, #tpu.memory_space<vmem>>, vector<1x1xf32>
    %83 = vector.broadcast %82 : vector<1x1xf32> to vector<8x16xf32>
    %84 = arith.mulf %83, %33 : vector<8x16xf32>
    %85 = arith.addf %69, %84 : vector<8x16xf32>
    %c0_31 = arith.constant 0 : index
    %c0_32 = arith.constant 0 : index
    %86 = vector.load %arg3[%c0_31, %c0_32] : memref<1x4xf32, #tpu.memory_space<vmem>>, vector<1x1xf32>
    %87 = vector.broadcast %86 : vector<1x1xf32> to vector<8x16xf32>
    %88 = arith.addf %73, %87 : vector<8x16xf32>
    %cst_33 = arith.constant 0.000000e+00 : f32
    %89 = vector.broadcast %cst_33 : f32 to vector<8x16xf32>
    %90 = arith.maximumf %88, %89 : vector<8x16xf32>
    %c0_34 = arith.constant 0 : index
    %c1_35 = arith.constant 1 : index
    %91 = vector.load %arg3[%c0_34, %c1_35] : memref<1x4xf32, #tpu.memory_space<vmem>>, vector<1x1xf32>
    %92 = vector.broadcast %91 : vector<1x1xf32> to vector<8x16xf32>
    %93 = arith.addf %77, %92 : vector<8x16xf32>
    %cst_36 = arith.constant 0.000000e+00 : f32
    %94 = vector.broadcast %cst_36 : f32 to vector<8x16xf32>
    %95 = arith.maximumf %93, %94 : vector<8x16xf32>
    %c0_37 = arith.constant 0 : index
    %c2_38 = arith.constant 2 : index
    %96 = vector.load %arg3[%c0_37, %c2_38] : memref<1x4xf32, #tpu.memory_space<vmem>>, vector<1x1xf32>
    %97 = vector.broadcast %96 : vector<1x1xf32> to vector<8x16xf32>
    %98 = arith.addf %81, %97 : vector<8x16xf32>
    %cst_39 = arith.constant 0.000000e+00 : f32
    %99 = vector.broadcast %cst_39 : f32 to vector<8x16xf32>
    %100 = arith.maximumf %98, %99 : vector<8x16xf32>
    %c0_40 = arith.constant 0 : index
    %c3_41 = arith.constant 3 : index
    %101 = vector.load %arg3[%c0_40, %c3_41] : memref<1x4xf32, #tpu.memory_space<vmem>>, vector<1x1xf32>
    %102 = vector.broadcast %101 : vector<1x1xf32> to vector<8x16xf32>
    %103 = arith.addf %85, %102 : vector<8x16xf32>
    %cst_42 = arith.constant 0.000000e+00 : f32
    %104 = vector.broadcast %cst_42 : f32 to vector<8x16xf32>
    %105 = arith.maximumf %103, %104 : vector<8x16xf32>
    %cst_43 = arith.constant 0.000000e+00 : f32
    %106 = vector.broadcast %cst_43 : f32 to vector<8x16xf32>
    %cst_44 = arith.constant 0.000000e+00 : f32
    %107 = vector.broadcast %cst_44 : f32 to vector<8x16xf32>
    %cst_45 = arith.constant 0.000000e+00 : f32
    %108 = vector.broadcast %cst_45 : f32 to vector<8x16xf32>
    %cst_46 = arith.constant 0.000000e+00 : f32
    %109 = vector.broadcast %cst_46 : f32 to vector<8x16xf32>
    %c0_47 = arith.constant 0 : index
    %c0_48 = arith.constant 0 : index
    %c0_49 = arith.constant 0 : index
    %110 = vector.load %arg4[%c0_47, %c0_48, %c0_49] : memref<3x4x4xf32, #tpu.memory_space<vmem>>, vector<1x4x4xf32>
    %111 = vector.shape_cast %110 : vector<1x4x4xf32> to vector<4x4xf32>
    %112 = vector.extract_strided_slice %90 {offsets = [0, 15], sizes = [8, 1], strides = [1, 1]} : vector<8x16xf32> to vector<8x1xf32>
    %113 = vector.extract_strided_slice %90 {offsets = [0, 0], sizes = [8, 15], strides = [1, 1]} : vector<8x16xf32> to vector<8x15xf32>
    %114 = tpu.concatenate %112, %113 in 1 : vector<8x1xf32>, vector<8x15xf32> -> vector<8x16xf32>
    %cst_50 = arith.constant 0.000000e+00 : f32
    %115 = vector.shape_cast %9 : vector<1x16xi1> to vector<1x16xi1>
    %116 = vector.broadcast %115 : vector<1x16xi1> to vector<8x16xi1>
    %117 = vector.broadcast %cst_50 : f32 to vector<8x16xf32>
    %118 = arith.select %116, %114, %117 : vector<8x16xi1>, vector<8x16xf32>
    %119 = vector.extract_strided_slice %111 {offsets = [0, 0], sizes = [1, 1], strides = [1, 1]} : vector<4x4xf32> to vector<1x1xf32>
    %120 = vector.broadcast %119 : vector<1x1xf32> to vector<8x16xf32>
    %121 = arith.mulf %120, %118 : vector<8x16xf32>
    %122 = arith.addf %106, %121 : vector<8x16xf32>
    %123 = vector.extract_strided_slice %111 {offsets = [1, 0], sizes = [1, 1], strides = [1, 1]} : vector<4x4xf32> to vector<1x1xf32>
    %124 = vector.broadcast %123 : vector<1x1xf32> to vector<8x16xf32>
    %125 = arith.mulf %124, %118 : vector<8x16xf32>
    %126 = arith.addf %107, %125 : vector<8x16xf32>
    %127 = vector.extract_strided_slice %111 {offsets = [2, 0], sizes = [1, 1], strides = [1, 1]} : vector<4x4xf32> to vector<1x1xf32>
    %128 = vector.broadcast %127 : vector<1x1xf32> to vector<8x16xf32>
    %129 = arith.mulf %128, %118 : vector<8x16xf32>
    %130 = arith.addf %108, %129 : vector<8x16xf32>
    %131 = vector.extract_strided_slice %111 {offsets = [3, 0], sizes = [1, 1], strides = [1, 1]} : vector<4x4xf32> to vector<1x1xf32>
    %132 = vector.broadcast %131 : vector<1x1xf32> to vector<8x16xf32>
    %133 = arith.mulf %132, %118 : vector<8x16xf32>
    %134 = arith.addf %109, %133 : vector<8x16xf32>
    %135 = vector.extract_strided_slice %95 {offsets = [0, 15], sizes = [8, 1], strides = [1, 1]} : vector<8x16xf32> to vector<8x1xf32>
    %136 = vector.extract_strided_slice %95 {offsets = [0, 0], sizes = [8, 15], strides = [1, 1]} : vector<8x16xf32> to vector<8x15xf32>
    %137 = tpu.concatenate %135, %136 in 1 : vector<8x1xf32>, vector<8x15xf32> -> vector<8x16xf32>
    %cst_51 = arith.constant 0.000000e+00 : f32
    %138 = vector.shape_cast %9 : vector<1x16xi1> to vector<1x16xi1>
    %139 = vector.broadcast %138 : vector<1x16xi1> to vector<8x16xi1>
    %140 = vector.broadcast %cst_51 : f32 to vector<8x16xf32>
    %141 = arith.select %139, %137, %140 : vector<8x16xi1>, vector<8x16xf32>
    %142 = vector.extract_strided_slice %111 {offsets = [0, 1], sizes = [1, 1], strides = [1, 1]} : vector<4x4xf32> to vector<1x1xf32>
    %143 = vector.broadcast %142 : vector<1x1xf32> to vector<8x16xf32>
    %144 = arith.mulf %143, %141 : vector<8x16xf32>
    %145 = arith.addf %122, %144 : vector<8x16xf32>
    %146 = vector.extract_strided_slice %111 {offsets = [1, 1], sizes = [1, 1], strides = [1, 1]} : vector<4x4xf32> to vector<1x1xf32>
    %147 = vector.broadcast %146 : vector<1x1xf32> to vector<8x16xf32>
    %148 = arith.mulf %147, %141 : vector<8x16xf32>
    %149 = arith.addf %126, %148 : vector<8x16xf32>
    %150 = vector.extract_strided_slice %111 {offsets = [2, 1], sizes = [1, 1], strides = [1, 1]} : vector<4x4xf32> to vector<1x1xf32>
    %151 = vector.broadcast %150 : vector<1x1xf32> to vector<8x16xf32>
    %152 = arith.mulf %151, %141 : vector<8x16xf32>
    %153 = arith.addf %130, %152 : vector<8x16xf32>
    %154 = vector.extract_strided_slice %111 {offsets = [3, 1], sizes = [1, 1], strides = [1, 1]} : vector<4x4xf32> to vector<1x1xf32>
    %155 = vector.broadcast %154 : vector<1x1xf32> to vector<8x16xf32>
    %156 = arith.mulf %155, %141 : vector<8x16xf32>
    %157 = arith.addf %134, %156 : vector<8x16xf32>
    %158 = vector.extract_strided_slice %100 {offsets = [0, 15], sizes = [8, 1], strides = [1, 1]} : vector<8x16xf32> to vector<8x1xf32>
    %159 = vector.extract_strided_slice %100 {offsets = [0, 0], sizes = [8, 15], strides = [1, 1]} : vector<8x16xf32> to vector<8x15xf32>
    %160 = tpu.concatenate %158, %159 in 1 : vector<8x1xf32>, vector<8x15xf32> -> vector<8x16xf32>
    %cst_52 = arith.constant 0.000000e+00 : f32
    %161 = vector.shape_cast %9 : vector<1x16xi1> to vector<1x16xi1>
    %162 = vector.broadcast %161 : vector<1x16xi1> to vector<8x16xi1>
    %163 = vector.broadcast %cst_52 : f32 to vector<8x16xf32>
    %164 = arith.select %162, %160, %163 : vector<8x16xi1>, vector<8x16xf32>
    %165 = vector.extract_strided_slice %111 {offsets = [0, 2], sizes = [1, 1], strides = [1, 1]} : vector<4x4xf32> to vector<1x1xf32>
    %166 = vector.broadcast %165 : vector<1x1xf32> to vector<8x16xf32>
    %167 = arith.mulf %166, %164 : vector<8x16xf32>
    %168 = arith.addf %145, %167 : vector<8x16xf32>
    %169 = vector.extract_strided_slice %111 {offsets = [1, 2], sizes = [1, 1], strides = [1, 1]} : vector<4x4xf32> to vector<1x1xf32>
    %170 = vector.broadcast %169 : vector<1x1xf32> to vector<8x16xf32>
    %171 = arith.mulf %170, %164 : vector<8x16xf32>
    %172 = arith.addf %149, %171 : vector<8x16xf32>
    %173 = vector.extract_strided_slice %111 {offsets = [2, 2], sizes = [1, 1], strides = [1, 1]} : vector<4x4xf32> to vector<1x1xf32>
    %174 = vector.broadcast %173 : vector<1x1xf32> to vector<8x16xf32>
    %175 = arith.mulf %174, %164 : vector<8x16xf32>
    %176 = arith.addf %153, %175 : vector<8x16xf32>
    %177 = vector.extract_strided_slice %111 {offsets = [3, 2], sizes = [1, 1], strides = [1, 1]} : vector<4x4xf32> to vector<1x1xf32>
    %178 = vector.broadcast %177 : vector<1x1xf32> to vector<8x16xf32>
    %179 = arith.mulf %178, %164 : vector<8x16xf32>
    %180 = arith.addf %157, %179 : vector<8x16xf32>
    %181 = vector.extract_strided_slice %105 {offsets = [0, 15], sizes = [8, 1], strides = [1, 1]} : vector<8x16xf32> to vector<8x1xf32>
    %182 = vector.extract_strided_slice %105 {offsets = [0, 0], sizes = [8, 15], strides = [1, 1]} : vector<8x16xf32> to vector<8x15xf32>
    %183 = tpu.concatenate %181, %182 in 1 : vector<8x1xf32>, vector<8x15xf32> -> vector<8x16xf32>
    %cst_53 = arith.constant 0.000000e+00 : f32
    %184 = vector.shape_cast %9 : vector<1x16xi1> to vector<1x16xi1>
    %185 = vector.broadcast %184 : vector<1x16xi1> to vector<8x16xi1>
    %186 = vector.broadcast %cst_53 : f32 to vector<8x16xf32>
    %187 = arith.select %185, %183, %186 : vector<8x16xi1>, vector<8x16xf32>
    %188 = vector.extract_strided_slice %111 {offsets = [0, 3], sizes = [1, 1], strides = [1, 1]} : vector<4x4xf32> to vector<1x1xf32>
    %189 = vector.broadcast %188 : vector<1x1xf32> to vector<8x16xf32>
    %190 = arith.mulf %189, %187 : vector<8x16xf32>
    %191 = arith.addf %168, %190 : vector<8x16xf32>
    %192 = vector.extract_strided_slice %111 {offsets = [1, 3], sizes = [1, 1], strides = [1, 1]} : vector<4x4xf32> to vector<1x1xf32>
    %193 = vector.broadcast %192 : vector<1x1xf32> to vector<8x16xf32>
    %194 = arith.mulf %193, %187 : vector<8x16xf32>
    %195 = arith.addf %172, %194 : vector<8x16xf32>
    %196 = vector.extract_strided_slice %111 {offsets = [2, 3], sizes = [1, 1], strides = [1, 1]} : vector<4x4xf32> to vector<1x1xf32>
    %197 = vector.broadcast %196 : vector<1x1xf32> to vector<8x16xf32>
    %198 = arith.mulf %197, %187 : vector<8x16xf32>
    %199 = arith.addf %176, %198 : vector<8x16xf32>
    %200 = vector.extract_strided_slice %111 {offsets = [3, 3], sizes = [1, 1], strides = [1, 1]} : vector<4x4xf32> to vector<1x1xf32>
    %201 = vector.broadcast %200 : vector<1x1xf32> to vector<8x16xf32>
    %202 = arith.mulf %201, %187 : vector<8x16xf32>
    %203 = arith.addf %180, %202 : vector<8x16xf32>
    %c1_54 = arith.constant 1 : index
    %c0_55 = arith.constant 0 : index
    %c0_56 = arith.constant 0 : index
    %204 = vector.load %arg4[%c1_54, %c0_55, %c0_56] : memref<3x4x4xf32, #tpu.memory_space<vmem>>, vector<1x4x4xf32>
    %205 = vector.shape_cast %204 : vector<1x4x4xf32> to vector<4x4xf32>
    %206 = vector.extract_strided_slice %205 {offsets = [0, 0], sizes = [1, 1], strides = [1, 1]} : vector<4x4xf32> to vector<1x1xf32>
    %207 = vector.broadcast %206 : vector<1x1xf32> to vector<8x16xf32>
    %208 = arith.mulf %207, %90 : vector<8x16xf32>
    %209 = arith.addf %191, %208 : vector<8x16xf32>
    %210 = vector.extract_strided_slice %205 {offsets = [1, 0], sizes = [1, 1], strides = [1, 1]} : vector<4x4xf32> to vector<1x1xf32>
    %211 = vector.broadcast %210 : vector<1x1xf32> to vector<8x16xf32>
    %212 = arith.mulf %211, %90 : vector<8x16xf32>
    %213 = arith.addf %195, %212 : vector<8x16xf32>
    %214 = vector.extract_strided_slice %205 {offsets = [2, 0], sizes = [1, 1], strides = [1, 1]} : vector<4x4xf32> to vector<1x1xf32>
    %215 = vector.broadcast %214 : vector<1x1xf32> to vector<8x16xf32>
    %216 = arith.mulf %215, %90 : vector<8x16xf32>
    %217 = arith.addf %199, %216 : vector<8x16xf32>
    %218 = vector.extract_strided_slice %205 {offsets = [3, 0], sizes = [1, 1], strides = [1, 1]} : vector<4x4xf32> to vector<1x1xf32>
    %219 = vector.broadcast %218 : vector<1x1xf32> to vector<8x16xf32>
    %220 = arith.mulf %219, %90 : vector<8x16xf32>
    %221 = arith.addf %203, %220 : vector<8x16xf32>
    %222 = vector.extract_strided_slice %205 {offsets = [0, 1], sizes = [1, 1], strides = [1, 1]} : vector<4x4xf32> to vector<1x1xf32>
    %223 = vector.broadcast %222 : vector<1x1xf32> to vector<8x16xf32>
    %224 = arith.mulf %223, %95 : vector<8x16xf32>
    %225 = arith.addf %209, %224 : vector<8x16xf32>
    %226 = vector.extract_strided_slice %205 {offsets = [1, 1], sizes = [1, 1], strides = [1, 1]} : vector<4x4xf32> to vector<1x1xf32>
    %227 = vector.broadcast %226 : vector<1x1xf32> to vector<8x16xf32>
    %228 = arith.mulf %227, %95 : vector<8x16xf32>
    %229 = arith.addf %213, %228 : vector<8x16xf32>
    %230 = vector.extract_strided_slice %205 {offsets = [2, 1], sizes = [1, 1], strides = [1, 1]} : vector<4x4xf32> to vector<1x1xf32>
    %231 = vector.broadcast %230 : vector<1x1xf32> to vector<8x16xf32>
    %232 = arith.mulf %231, %95 : vector<8x16xf32>
    %233 = arith.addf %217, %232 : vector<8x16xf32>
    %234 = vector.extract_strided_slice %205 {offsets = [3, 1], sizes = [1, 1], strides = [1, 1]} : vector<4x4xf32> to vector<1x1xf32>
    %235 = vector.broadcast %234 : vector<1x1xf32> to vector<8x16xf32>
    %236 = arith.mulf %235, %95 : vector<8x16xf32>
    %237 = arith.addf %221, %236 : vector<8x16xf32>
    %238 = vector.extract_strided_slice %205 {offsets = [0, 2], sizes = [1, 1], strides = [1, 1]} : vector<4x4xf32> to vector<1x1xf32>
    %239 = vector.broadcast %238 : vector<1x1xf32> to vector<8x16xf32>
    %240 = arith.mulf %239, %100 : vector<8x16xf32>
    %241 = arith.addf %225, %240 : vector<8x16xf32>
    %242 = vector.extract_strided_slice %205 {offsets = [1, 2], sizes = [1, 1], strides = [1, 1]} : vector<4x4xf32> to vector<1x1xf32>
    %243 = vector.broadcast %242 : vector<1x1xf32> to vector<8x16xf32>
    %244 = arith.mulf %243, %100 : vector<8x16xf32>
    %245 = arith.addf %229, %244 : vector<8x16xf32>
    %246 = vector.extract_strided_slice %205 {offsets = [2, 2], sizes = [1, 1], strides = [1, 1]} : vector<4x4xf32> to vector<1x1xf32>
    %247 = vector.broadcast %246 : vector<1x1xf32> to vector<8x16xf32>
    %248 = arith.mulf %247, %100 : vector<8x16xf32>
    %249 = arith.addf %233, %248 : vector<8x16xf32>
    %250 = vector.extract_strided_slice %205 {offsets = [3, 2], sizes = [1, 1], strides = [1, 1]} : vector<4x4xf32> to vector<1x1xf32>
    %251 = vector.broadcast %250 : vector<1x1xf32> to vector<8x16xf32>
    %252 = arith.mulf %251, %100 : vector<8x16xf32>
    %253 = arith.addf %237, %252 : vector<8x16xf32>
    %254 = vector.extract_strided_slice %205 {offsets = [0, 3], sizes = [1, 1], strides = [1, 1]} : vector<4x4xf32> to vector<1x1xf32>
    %255 = vector.broadcast %254 : vector<1x1xf32> to vector<8x16xf32>
    %256 = arith.mulf %255, %105 : vector<8x16xf32>
    %257 = arith.addf %241, %256 : vector<8x16xf32>
    %258 = vector.extract_strided_slice %205 {offsets = [1, 3], sizes = [1, 1], strides = [1, 1]} : vector<4x4xf32> to vector<1x1xf32>
    %259 = vector.broadcast %258 : vector<1x1xf32> to vector<8x16xf32>
    %260 = arith.mulf %259, %105 : vector<8x16xf32>
    %261 = arith.addf %245, %260 : vector<8x16xf32>
    %262 = vector.extract_strided_slice %205 {offsets = [2, 3], sizes = [1, 1], strides = [1, 1]} : vector<4x4xf32> to vector<1x1xf32>
    %263 = vector.broadcast %262 : vector<1x1xf32> to vector<8x16xf32>
    %264 = arith.mulf %263, %105 : vector<8x16xf32>
    %265 = arith.addf %249, %264 : vector<8x16xf32>
    %266 = vector.extract_strided_slice %205 {offsets = [3, 3], sizes = [1, 1], strides = [1, 1]} : vector<4x4xf32> to vector<1x1xf32>
    %267 = vector.broadcast %266 : vector<1x1xf32> to vector<8x16xf32>
    %268 = arith.mulf %267, %105 : vector<8x16xf32>
    %269 = arith.addf %253, %268 : vector<8x16xf32>
    %c2_57 = arith.constant 2 : index
    %c0_58 = arith.constant 0 : index
    %c0_59 = arith.constant 0 : index
    %270 = vector.load %arg4[%c2_57, %c0_58, %c0_59] : memref<3x4x4xf32, #tpu.memory_space<vmem>>, vector<1x4x4xf32>
    %271 = vector.shape_cast %270 : vector<1x4x4xf32> to vector<4x4xf32>
    %272 = vector.extract_strided_slice %90 {offsets = [0, 1], sizes = [8, 15], strides = [1, 1]} : vector<8x16xf32> to vector<8x15xf32>
    %273 = vector.extract_strided_slice %90 {offsets = [0, 0], sizes = [8, 1], strides = [1, 1]} : vector<8x16xf32> to vector<8x1xf32>
    %274 = tpu.concatenate %272, %273 in 1 : vector<8x15xf32>, vector<8x1xf32> -> vector<8x16xf32>
    %cst_60 = arith.constant 0.000000e+00 : f32
    %275 = vector.shape_cast %18 : vector<1x16xi1> to vector<1x16xi1>
    %276 = vector.broadcast %275 : vector<1x16xi1> to vector<8x16xi1>
    %277 = vector.broadcast %cst_60 : f32 to vector<8x16xf32>
    %278 = arith.select %276, %274, %277 : vector<8x16xi1>, vector<8x16xf32>
    %279 = vector.extract_strided_slice %271 {offsets = [0, 0], sizes = [1, 1], strides = [1, 1]} : vector<4x4xf32> to vector<1x1xf32>
    %280 = vector.broadcast %279 : vector<1x1xf32> to vector<8x16xf32>
    %281 = arith.mulf %280, %278 : vector<8x16xf32>
    %282 = arith.addf %257, %281 : vector<8x16xf32>
    %283 = vector.extract_strided_slice %271 {offsets = [1, 0], sizes = [1, 1], strides = [1, 1]} : vector<4x4xf32> to vector<1x1xf32>
    %284 = vector.broadcast %283 : vector<1x1xf32> to vector<8x16xf32>
    %285 = arith.mulf %284, %278 : vector<8x16xf32>
    %286 = arith.addf %261, %285 : vector<8x16xf32>
    %287 = vector.extract_strided_slice %271 {offsets = [2, 0], sizes = [1, 1], strides = [1, 1]} : vector<4x4xf32> to vector<1x1xf32>
    %288 = vector.broadcast %287 : vector<1x1xf32> to vector<8x16xf32>
    %289 = arith.mulf %288, %278 : vector<8x16xf32>
    %290 = arith.addf %265, %289 : vector<8x16xf32>
    %291 = vector.extract_strided_slice %271 {offsets = [3, 0], sizes = [1, 1], strides = [1, 1]} : vector<4x4xf32> to vector<1x1xf32>
    %292 = vector.broadcast %291 : vector<1x1xf32> to vector<8x16xf32>
    %293 = arith.mulf %292, %278 : vector<8x16xf32>
    %294 = arith.addf %269, %293 : vector<8x16xf32>
    %295 = vector.extract_strided_slice %95 {offsets = [0, 1], sizes = [8, 15], strides = [1, 1]} : vector<8x16xf32> to vector<8x15xf32>
    %296 = vector.extract_strided_slice %95 {offsets = [0, 0], sizes = [8, 1], strides = [1, 1]} : vector<8x16xf32> to vector<8x1xf32>
    %297 = tpu.concatenate %295, %296 in 1 : vector<8x15xf32>, vector<8x1xf32> -> vector<8x16xf32>
    %cst_61 = arith.constant 0.000000e+00 : f32
    %298 = vector.shape_cast %18 : vector<1x16xi1> to vector<1x16xi1>
    %299 = vector.broadcast %298 : vector<1x16xi1> to vector<8x16xi1>
    %300 = vector.broadcast %cst_61 : f32 to vector<8x16xf32>
    %301 = arith.select %299, %297, %300 : vector<8x16xi1>, vector<8x16xf32>
    %302 = vector.extract_strided_slice %271 {offsets = [0, 1], sizes = [1, 1], strides = [1, 1]} : vector<4x4xf32> to vector<1x1xf32>
    %303 = vector.broadcast %302 : vector<1x1xf32> to vector<8x16xf32>
    %304 = arith.mulf %303, %301 : vector<8x16xf32>
    %305 = arith.addf %282, %304 : vector<8x16xf32>
    %306 = vector.extract_strided_slice %271 {offsets = [1, 1], sizes = [1, 1], strides = [1, 1]} : vector<4x4xf32> to vector<1x1xf32>
    %307 = vector.broadcast %306 : vector<1x1xf32> to vector<8x16xf32>
    %308 = arith.mulf %307, %301 : vector<8x16xf32>
    %309 = arith.addf %286, %308 : vector<8x16xf32>
    %310 = vector.extract_strided_slice %271 {offsets = [2, 1], sizes = [1, 1], strides = [1, 1]} : vector<4x4xf32> to vector<1x1xf32>
    %311 = vector.broadcast %310 : vector<1x1xf32> to vector<8x16xf32>
    %312 = arith.mulf %311, %301 : vector<8x16xf32>
    %313 = arith.addf %290, %312 : vector<8x16xf32>
    %314 = vector.extract_strided_slice %271 {offsets = [3, 1], sizes = [1, 1], strides = [1, 1]} : vector<4x4xf32> to vector<1x1xf32>
    %315 = vector.broadcast %314 : vector<1x1xf32> to vector<8x16xf32>
    %316 = arith.mulf %315, %301 : vector<8x16xf32>
    %317 = arith.addf %294, %316 : vector<8x16xf32>
    %318 = vector.extract_strided_slice %100 {offsets = [0, 1], sizes = [8, 15], strides = [1, 1]} : vector<8x16xf32> to vector<8x15xf32>
    %319 = vector.extract_strided_slice %100 {offsets = [0, 0], sizes = [8, 1], strides = [1, 1]} : vector<8x16xf32> to vector<8x1xf32>
    %320 = tpu.concatenate %318, %319 in 1 : vector<8x15xf32>, vector<8x1xf32> -> vector<8x16xf32>
    %cst_62 = arith.constant 0.000000e+00 : f32
    %321 = vector.shape_cast %18 : vector<1x16xi1> to vector<1x16xi1>
    %322 = vector.broadcast %321 : vector<1x16xi1> to vector<8x16xi1>
    %323 = vector.broadcast %cst_62 : f32 to vector<8x16xf32>
    %324 = arith.select %322, %320, %323 : vector<8x16xi1>, vector<8x16xf32>
    %325 = vector.extract_strided_slice %271 {offsets = [0, 2], sizes = [1, 1], strides = [1, 1]} : vector<4x4xf32> to vector<1x1xf32>
    %326 = vector.broadcast %325 : vector<1x1xf32> to vector<8x16xf32>
    %327 = arith.mulf %326, %324 : vector<8x16xf32>
    %328 = arith.addf %305, %327 : vector<8x16xf32>
    %329 = vector.extract_strided_slice %271 {offsets = [1, 2], sizes = [1, 1], strides = [1, 1]} : vector<4x4xf32> to vector<1x1xf32>
    %330 = vector.broadcast %329 : vector<1x1xf32> to vector<8x16xf32>
    %331 = arith.mulf %330, %324 : vector<8x16xf32>
    %332 = arith.addf %309, %331 : vector<8x16xf32>
    %333 = vector.extract_strided_slice %271 {offsets = [2, 2], sizes = [1, 1], strides = [1, 1]} : vector<4x4xf32> to vector<1x1xf32>
    %334 = vector.broadcast %333 : vector<1x1xf32> to vector<8x16xf32>
    %335 = arith.mulf %334, %324 : vector<8x16xf32>
    %336 = arith.addf %313, %335 : vector<8x16xf32>
    %337 = vector.extract_strided_slice %271 {offsets = [3, 2], sizes = [1, 1], strides = [1, 1]} : vector<4x4xf32> to vector<1x1xf32>
    %338 = vector.broadcast %337 : vector<1x1xf32> to vector<8x16xf32>
    %339 = arith.mulf %338, %324 : vector<8x16xf32>
    %340 = arith.addf %317, %339 : vector<8x16xf32>
    %341 = vector.extract_strided_slice %105 {offsets = [0, 1], sizes = [8, 15], strides = [1, 1]} : vector<8x16xf32> to vector<8x15xf32>
    %342 = vector.extract_strided_slice %105 {offsets = [0, 0], sizes = [8, 1], strides = [1, 1]} : vector<8x16xf32> to vector<8x1xf32>
    %343 = tpu.concatenate %341, %342 in 1 : vector<8x15xf32>, vector<8x1xf32> -> vector<8x16xf32>
    %cst_63 = arith.constant 0.000000e+00 : f32
    %344 = vector.shape_cast %18 : vector<1x16xi1> to vector<1x16xi1>
    %345 = vector.broadcast %344 : vector<1x16xi1> to vector<8x16xi1>
    %346 = vector.broadcast %cst_63 : f32 to vector<8x16xf32>
    %347 = arith.select %345, %343, %346 : vector<8x16xi1>, vector<8x16xf32>
    %348 = vector.extract_strided_slice %271 {offsets = [0, 3], sizes = [1, 1], strides = [1, 1]} : vector<4x4xf32> to vector<1x1xf32>
    %349 = vector.broadcast %348 : vector<1x1xf32> to vector<8x16xf32>
    %350 = arith.mulf %349, %347 : vector<8x16xf32>
    %351 = arith.addf %328, %350 : vector<8x16xf32>
    %352 = vector.extract_strided_slice %271 {offsets = [1, 3], sizes = [1, 1], strides = [1, 1]} : vector<4x4xf32> to vector<1x1xf32>
    %353 = vector.broadcast %352 : vector<1x1xf32> to vector<8x16xf32>
    %354 = arith.mulf %353, %347 : vector<8x16xf32>
    %355 = arith.addf %332, %354 : vector<8x16xf32>
    %356 = vector.extract_strided_slice %271 {offsets = [2, 3], sizes = [1, 1], strides = [1, 1]} : vector<4x4xf32> to vector<1x1xf32>
    %357 = vector.broadcast %356 : vector<1x1xf32> to vector<8x16xf32>
    %358 = arith.mulf %357, %347 : vector<8x16xf32>
    %359 = arith.addf %336, %358 : vector<8x16xf32>
    %360 = vector.extract_strided_slice %271 {offsets = [3, 3], sizes = [1, 1], strides = [1, 1]} : vector<4x4xf32> to vector<1x1xf32>
    %361 = vector.broadcast %360 : vector<1x1xf32> to vector<8x16xf32>
    %362 = arith.mulf %361, %347 : vector<8x16xf32>
    %363 = arith.addf %340, %362 : vector<8x16xf32>
    %c0_64 = arith.constant 0 : index
    %c0_65 = arith.constant 0 : index
    %364 = vector.load %arg5[%c0_64, %c0_65] : memref<1x4xf32, #tpu.memory_space<vmem>>, vector<1x1xf32>
    %365 = vector.broadcast %364 : vector<1x1xf32> to vector<8x16xf32>
    %366 = arith.addf %351, %365 : vector<8x16xf32>
    %367 = arith.addf %366, %90 : vector<8x16xf32>
    %cst_66 = arith.constant 0.000000e+00 : f32
    %368 = vector.broadcast %cst_66 : f32 to vector<8x16xf32>
    %369 = arith.maximumf %367, %368 : vector<8x16xf32>
    %c0_67 = arith.constant 0 : index
    %c1_68 = arith.constant 1 : index
    %370 = vector.load %arg5[%c0_67, %c1_68] : memref<1x4xf32, #tpu.memory_space<vmem>>, vector<1x1xf32>
    %371 = vector.broadcast %370 : vector<1x1xf32> to vector<8x16xf32>
    %372 = arith.addf %355, %371 : vector<8x16xf32>
    %373 = arith.addf %372, %95 : vector<8x16xf32>
    %cst_69 = arith.constant 0.000000e+00 : f32
    %374 = vector.broadcast %cst_69 : f32 to vector<8x16xf32>
    %375 = arith.maximumf %373, %374 : vector<8x16xf32>
    %c0_70 = arith.constant 0 : index
    %c2_71 = arith.constant 2 : index
    %376 = vector.load %arg5[%c0_70, %c2_71] : memref<1x4xf32, #tpu.memory_space<vmem>>, vector<1x1xf32>
    %377 = vector.broadcast %376 : vector<1x1xf32> to vector<8x16xf32>
    %378 = arith.addf %359, %377 : vector<8x16xf32>
    %379 = arith.addf %378, %100 : vector<8x16xf32>
    %cst_72 = arith.constant 0.000000e+00 : f32
    %380 = vector.broadcast %cst_72 : f32 to vector<8x16xf32>
    %381 = arith.maximumf %379, %380 : vector<8x16xf32>
    %c0_73 = arith.constant 0 : index
    %c3_74 = arith.constant 3 : index
    %382 = vector.load %arg5[%c0_73, %c3_74] : memref<1x4xf32, #tpu.memory_space<vmem>>, vector<1x1xf32>
    %383 = vector.broadcast %382 : vector<1x1xf32> to vector<8x16xf32>
    %384 = arith.addf %363, %383 : vector<8x16xf32>
    %385 = arith.addf %384, %105 : vector<8x16xf32>
    %cst_75 = arith.constant 0.000000e+00 : f32
    %386 = vector.broadcast %cst_75 : f32 to vector<8x16xf32>
    %387 = arith.maximumf %385, %386 : vector<8x16xf32>
    %cst_76 = arith.constant 0.000000e+00 : f32
    %388 = vector.broadcast %cst_76 : f32 to vector<8x16xf32>
    %cst_77 = arith.constant 0.000000e+00 : f32
    %389 = vector.broadcast %cst_77 : f32 to vector<8x16xf32>
    %cst_78 = arith.constant 0.000000e+00 : f32
    %390 = vector.broadcast %cst_78 : f32 to vector<8x16xf32>
    %cst_79 = arith.constant 0.000000e+00 : f32
    %391 = vector.broadcast %cst_79 : f32 to vector<8x16xf32>
    %c0_80 = arith.constant 0 : index
    %c0_81 = arith.constant 0 : index
    %c0_82 = arith.constant 0 : index
    %392 = vector.load %arg6[%c0_80, %c0_81, %c0_82] : memref<3x4x4xf32, #tpu.memory_space<vmem>>, vector<1x4x4xf32>
    %393 = vector.shape_cast %392 : vector<1x4x4xf32> to vector<4x4xf32>
    %394 = vector.extract_strided_slice %369 {offsets = [0, 15], sizes = [8, 1], strides = [1, 1]} : vector<8x16xf32> to vector<8x1xf32>
    %395 = vector.extract_strided_slice %369 {offsets = [0, 0], sizes = [8, 15], strides = [1, 1]} : vector<8x16xf32> to vector<8x15xf32>
    %396 = tpu.concatenate %394, %395 in 1 : vector<8x1xf32>, vector<8x15xf32> -> vector<8x16xf32>
    %cst_83 = arith.constant 0.000000e+00 : f32
    %397 = vector.shape_cast %9 : vector<1x16xi1> to vector<1x16xi1>
    %398 = vector.broadcast %397 : vector<1x16xi1> to vector<8x16xi1>
    %399 = vector.broadcast %cst_83 : f32 to vector<8x16xf32>
    %400 = arith.select %398, %396, %399 : vector<8x16xi1>, vector<8x16xf32>
    %401 = vector.extract_strided_slice %393 {offsets = [0, 0], sizes = [1, 1], strides = [1, 1]} : vector<4x4xf32> to vector<1x1xf32>
    %402 = vector.broadcast %401 : vector<1x1xf32> to vector<8x16xf32>
    %403 = arith.mulf %402, %400 : vector<8x16xf32>
    %404 = arith.addf %388, %403 : vector<8x16xf32>
    %405 = vector.extract_strided_slice %393 {offsets = [1, 0], sizes = [1, 1], strides = [1, 1]} : vector<4x4xf32> to vector<1x1xf32>
    %406 = vector.broadcast %405 : vector<1x1xf32> to vector<8x16xf32>
    %407 = arith.mulf %406, %400 : vector<8x16xf32>
    %408 = arith.addf %389, %407 : vector<8x16xf32>
    %409 = vector.extract_strided_slice %393 {offsets = [2, 0], sizes = [1, 1], strides = [1, 1]} : vector<4x4xf32> to vector<1x1xf32>
    %410 = vector.broadcast %409 : vector<1x1xf32> to vector<8x16xf32>
    %411 = arith.mulf %410, %400 : vector<8x16xf32>
    %412 = arith.addf %390, %411 : vector<8x16xf32>
    %413 = vector.extract_strided_slice %393 {offsets = [3, 0], sizes = [1, 1], strides = [1, 1]} : vector<4x4xf32> to vector<1x1xf32>
    %414 = vector.broadcast %413 : vector<1x1xf32> to vector<8x16xf32>
    %415 = arith.mulf %414, %400 : vector<8x16xf32>
    %416 = arith.addf %391, %415 : vector<8x16xf32>
    %417 = vector.extract_strided_slice %375 {offsets = [0, 15], sizes = [8, 1], strides = [1, 1]} : vector<8x16xf32> to vector<8x1xf32>
    %418 = vector.extract_strided_slice %375 {offsets = [0, 0], sizes = [8, 15], strides = [1, 1]} : vector<8x16xf32> to vector<8x15xf32>
    %419 = tpu.concatenate %417, %418 in 1 : vector<8x1xf32>, vector<8x15xf32> -> vector<8x16xf32>
    %cst_84 = arith.constant 0.000000e+00 : f32
    %420 = vector.shape_cast %9 : vector<1x16xi1> to vector<1x16xi1>
    %421 = vector.broadcast %420 : vector<1x16xi1> to vector<8x16xi1>
    %422 = vector.broadcast %cst_84 : f32 to vector<8x16xf32>
    %423 = arith.select %421, %419, %422 : vector<8x16xi1>, vector<8x16xf32>
    %424 = vector.extract_strided_slice %393 {offsets = [0, 1], sizes = [1, 1], strides = [1, 1]} : vector<4x4xf32> to vector<1x1xf32>
    %425 = vector.broadcast %424 : vector<1x1xf32> to vector<8x16xf32>
    %426 = arith.mulf %425, %423 : vector<8x16xf32>
    %427 = arith.addf %404, %426 : vector<8x16xf32>
    %428 = vector.extract_strided_slice %393 {offsets = [1, 1], sizes = [1, 1], strides = [1, 1]} : vector<4x4xf32> to vector<1x1xf32>
    %429 = vector.broadcast %428 : vector<1x1xf32> to vector<8x16xf32>
    %430 = arith.mulf %429, %423 : vector<8x16xf32>
    %431 = arith.addf %408, %430 : vector<8x16xf32>
    %432 = vector.extract_strided_slice %393 {offsets = [2, 1], sizes = [1, 1], strides = [1, 1]} : vector<4x4xf32> to vector<1x1xf32>
    %433 = vector.broadcast %432 : vector<1x1xf32> to vector<8x16xf32>
    %434 = arith.mulf %433, %423 : vector<8x16xf32>
    %435 = arith.addf %412, %434 : vector<8x16xf32>
    %436 = vector.extract_strided_slice %393 {offsets = [3, 1], sizes = [1, 1], strides = [1, 1]} : vector<4x4xf32> to vector<1x1xf32>
    %437 = vector.broadcast %436 : vector<1x1xf32> to vector<8x16xf32>
    %438 = arith.mulf %437, %423 : vector<8x16xf32>
    %439 = arith.addf %416, %438 : vector<8x16xf32>
    %440 = vector.extract_strided_slice %381 {offsets = [0, 15], sizes = [8, 1], strides = [1, 1]} : vector<8x16xf32> to vector<8x1xf32>
    %441 = vector.extract_strided_slice %381 {offsets = [0, 0], sizes = [8, 15], strides = [1, 1]} : vector<8x16xf32> to vector<8x15xf32>
    %442 = tpu.concatenate %440, %441 in 1 : vector<8x1xf32>, vector<8x15xf32> -> vector<8x16xf32>
    %cst_85 = arith.constant 0.000000e+00 : f32
    %443 = vector.shape_cast %9 : vector<1x16xi1> to vector<1x16xi1>
    %444 = vector.broadcast %443 : vector<1x16xi1> to vector<8x16xi1>
    %445 = vector.broadcast %cst_85 : f32 to vector<8x16xf32>
    %446 = arith.select %444, %442, %445 : vector<8x16xi1>, vector<8x16xf32>
    %447 = vector.extract_strided_slice %393 {offsets = [0, 2], sizes = [1, 1], strides = [1, 1]} : vector<4x4xf32> to vector<1x1xf32>
    %448 = vector.broadcast %447 : vector<1x1xf32> to vector<8x16xf32>
    %449 = arith.mulf %448, %446 : vector<8x16xf32>
    %450 = arith.addf %427, %449 : vector<8x16xf32>
    %451 = vector.extract_strided_slice %393 {offsets = [1, 2], sizes = [1, 1], strides = [1, 1]} : vector<4x4xf32> to vector<1x1xf32>
    %452 = vector.broadcast %451 : vector<1x1xf32> to vector<8x16xf32>
    %453 = arith.mulf %452, %446 : vector<8x16xf32>
    %454 = arith.addf %431, %453 : vector<8x16xf32>
    %455 = vector.extract_strided_slice %393 {offsets = [2, 2], sizes = [1, 1], strides = [1, 1]} : vector<4x4xf32> to vector<1x1xf32>
    %456 = vector.broadcast %455 : vector<1x1xf32> to vector<8x16xf32>
    %457 = arith.mulf %456, %446 : vector<8x16xf32>
    %458 = arith.addf %435, %457 : vector<8x16xf32>
    %459 = vector.extract_strided_slice %393 {offsets = [3, 2], sizes = [1, 1], strides = [1, 1]} : vector<4x4xf32> to vector<1x1xf32>
    %460 = vector.broadcast %459 : vector<1x1xf32> to vector<8x16xf32>
    %461 = arith.mulf %460, %446 : vector<8x16xf32>
    %462 = arith.addf %439, %461 : vector<8x16xf32>
    %463 = vector.extract_strided_slice %387 {offsets = [0, 15], sizes = [8, 1], strides = [1, 1]} : vector<8x16xf32> to vector<8x1xf32>
    %464 = vector.extract_strided_slice %387 {offsets = [0, 0], sizes = [8, 15], strides = [1, 1]} : vector<8x16xf32> to vector<8x15xf32>
    %465 = tpu.concatenate %463, %464 in 1 : vector<8x1xf32>, vector<8x15xf32> -> vector<8x16xf32>
    %cst_86 = arith.constant 0.000000e+00 : f32
    %466 = vector.shape_cast %9 : vector<1x16xi1> to vector<1x16xi1>
    %467 = vector.broadcast %466 : vector<1x16xi1> to vector<8x16xi1>
    %468 = vector.broadcast %cst_86 : f32 to vector<8x16xf32>
    %469 = arith.select %467, %465, %468 : vector<8x16xi1>, vector<8x16xf32>
    %470 = vector.extract_strided_slice %393 {offsets = [0, 3], sizes = [1, 1], strides = [1, 1]} : vector<4x4xf32> to vector<1x1xf32>
    %471 = vector.broadcast %470 : vector<1x1xf32> to vector<8x16xf32>
    %472 = arith.mulf %471, %469 : vector<8x16xf32>
    %473 = arith.addf %450, %472 : vector<8x16xf32>
    %474 = vector.extract_strided_slice %393 {offsets = [1, 3], sizes = [1, 1], strides = [1, 1]} : vector<4x4xf32> to vector<1x1xf32>
    %475 = vector.broadcast %474 : vector<1x1xf32> to vector<8x16xf32>
    %476 = arith.mulf %475, %469 : vector<8x16xf32>
    %477 = arith.addf %454, %476 : vector<8x16xf32>
    %478 = vector.extract_strided_slice %393 {offsets = [2, 3], sizes = [1, 1], strides = [1, 1]} : vector<4x4xf32> to vector<1x1xf32>
    %479 = vector.broadcast %478 : vector<1x1xf32> to vector<8x16xf32>
    %480 = arith.mulf %479, %469 : vector<8x16xf32>
    %481 = arith.addf %458, %480 : vector<8x16xf32>
    %482 = vector.extract_strided_slice %393 {offsets = [3, 3], sizes = [1, 1], strides = [1, 1]} : vector<4x4xf32> to vector<1x1xf32>
    %483 = vector.broadcast %482 : vector<1x1xf32> to vector<8x16xf32>
    %484 = arith.mulf %483, %469 : vector<8x16xf32>
    %485 = arith.addf %462, %484 : vector<8x16xf32>
    %c1_87 = arith.constant 1 : index
    %c0_88 = arith.constant 0 : index
    %c0_89 = arith.constant 0 : index
    %486 = vector.load %arg6[%c1_87, %c0_88, %c0_89] : memref<3x4x4xf32, #tpu.memory_space<vmem>>, vector<1x4x4xf32>
    %487 = vector.shape_cast %486 : vector<1x4x4xf32> to vector<4x4xf32>
    %488 = vector.extract_strided_slice %487 {offsets = [0, 0], sizes = [1, 1], strides = [1, 1]} : vector<4x4xf32> to vector<1x1xf32>
    %489 = vector.broadcast %488 : vector<1x1xf32> to vector<8x16xf32>
    %490 = arith.mulf %489, %369 : vector<8x16xf32>
    %491 = arith.addf %473, %490 : vector<8x16xf32>
    %492 = vector.extract_strided_slice %487 {offsets = [1, 0], sizes = [1, 1], strides = [1, 1]} : vector<4x4xf32> to vector<1x1xf32>
    %493 = vector.broadcast %492 : vector<1x1xf32> to vector<8x16xf32>
    %494 = arith.mulf %493, %369 : vector<8x16xf32>
    %495 = arith.addf %477, %494 : vector<8x16xf32>
    %496 = vector.extract_strided_slice %487 {offsets = [2, 0], sizes = [1, 1], strides = [1, 1]} : vector<4x4xf32> to vector<1x1xf32>
    %497 = vector.broadcast %496 : vector<1x1xf32> to vector<8x16xf32>
    %498 = arith.mulf %497, %369 : vector<8x16xf32>
    %499 = arith.addf %481, %498 : vector<8x16xf32>
    %500 = vector.extract_strided_slice %487 {offsets = [3, 0], sizes = [1, 1], strides = [1, 1]} : vector<4x4xf32> to vector<1x1xf32>
    %501 = vector.broadcast %500 : vector<1x1xf32> to vector<8x16xf32>
    %502 = arith.mulf %501, %369 : vector<8x16xf32>
    %503 = arith.addf %485, %502 : vector<8x16xf32>
    %504 = vector.extract_strided_slice %487 {offsets = [0, 1], sizes = [1, 1], strides = [1, 1]} : vector<4x4xf32> to vector<1x1xf32>
    %505 = vector.broadcast %504 : vector<1x1xf32> to vector<8x16xf32>
    %506 = arith.mulf %505, %375 : vector<8x16xf32>
    %507 = arith.addf %491, %506 : vector<8x16xf32>
    %508 = vector.extract_strided_slice %487 {offsets = [1, 1], sizes = [1, 1], strides = [1, 1]} : vector<4x4xf32> to vector<1x1xf32>
    %509 = vector.broadcast %508 : vector<1x1xf32> to vector<8x16xf32>
    %510 = arith.mulf %509, %375 : vector<8x16xf32>
    %511 = arith.addf %495, %510 : vector<8x16xf32>
    %512 = vector.extract_strided_slice %487 {offsets = [2, 1], sizes = [1, 1], strides = [1, 1]} : vector<4x4xf32> to vector<1x1xf32>
    %513 = vector.broadcast %512 : vector<1x1xf32> to vector<8x16xf32>
    %514 = arith.mulf %513, %375 : vector<8x16xf32>
    %515 = arith.addf %499, %514 : vector<8x16xf32>
    %516 = vector.extract_strided_slice %487 {offsets = [3, 1], sizes = [1, 1], strides = [1, 1]} : vector<4x4xf32> to vector<1x1xf32>
    %517 = vector.broadcast %516 : vector<1x1xf32> to vector<8x16xf32>
    %518 = arith.mulf %517, %375 : vector<8x16xf32>
    %519 = arith.addf %503, %518 : vector<8x16xf32>
    %520 = vector.extract_strided_slice %487 {offsets = [0, 2], sizes = [1, 1], strides = [1, 1]} : vector<4x4xf32> to vector<1x1xf32>
    %521 = vector.broadcast %520 : vector<1x1xf32> to vector<8x16xf32>
    %522 = arith.mulf %521, %381 : vector<8x16xf32>
    %523 = arith.addf %507, %522 : vector<8x16xf32>
    %524 = vector.extract_strided_slice %487 {offsets = [1, 2], sizes = [1, 1], strides = [1, 1]} : vector<4x4xf32> to vector<1x1xf32>
    %525 = vector.broadcast %524 : vector<1x1xf32> to vector<8x16xf32>
    %526 = arith.mulf %525, %381 : vector<8x16xf32>
    %527 = arith.addf %511, %526 : vector<8x16xf32>
    %528 = vector.extract_strided_slice %487 {offsets = [2, 2], sizes = [1, 1], strides = [1, 1]} : vector<4x4xf32> to vector<1x1xf32>
    %529 = vector.broadcast %528 : vector<1x1xf32> to vector<8x16xf32>
    %530 = arith.mulf %529, %381 : vector<8x16xf32>
    %531 = arith.addf %515, %530 : vector<8x16xf32>
    %532 = vector.extract_strided_slice %487 {offsets = [3, 2], sizes = [1, 1], strides = [1, 1]} : vector<4x4xf32> to vector<1x1xf32>
    %533 = vector.broadcast %532 : vector<1x1xf32> to vector<8x16xf32>
    %534 = arith.mulf %533, %381 : vector<8x16xf32>
    %535 = arith.addf %519, %534 : vector<8x16xf32>
    %536 = vector.extract_strided_slice %487 {offsets = [0, 3], sizes = [1, 1], strides = [1, 1]} : vector<4x4xf32> to vector<1x1xf32>
    %537 = vector.broadcast %536 : vector<1x1xf32> to vector<8x16xf32>
    %538 = arith.mulf %537, %387 : vector<8x16xf32>
    %539 = arith.addf %523, %538 : vector<8x16xf32>
    %540 = vector.extract_strided_slice %487 {offsets = [1, 3], sizes = [1, 1], strides = [1, 1]} : vector<4x4xf32> to vector<1x1xf32>
    %541 = vector.broadcast %540 : vector<1x1xf32> to vector<8x16xf32>
    %542 = arith.mulf %541, %387 : vector<8x16xf32>
    %543 = arith.addf %527, %542 : vector<8x16xf32>
    %544 = vector.extract_strided_slice %487 {offsets = [2, 3], sizes = [1, 1], strides = [1, 1]} : vector<4x4xf32> to vector<1x1xf32>
    %545 = vector.broadcast %544 : vector<1x1xf32> to vector<8x16xf32>
    %546 = arith.mulf %545, %387 : vector<8x16xf32>
    %547 = arith.addf %531, %546 : vector<8x16xf32>
    %548 = vector.extract_strided_slice %487 {offsets = [3, 3], sizes = [1, 1], strides = [1, 1]} : vector<4x4xf32> to vector<1x1xf32>
    %549 = vector.broadcast %548 : vector<1x1xf32> to vector<8x16xf32>
    %550 = arith.mulf %549, %387 : vector<8x16xf32>
    %551 = arith.addf %535, %550 : vector<8x16xf32>
    %c2_90 = arith.constant 2 : index
    %c0_91 = arith.constant 0 : index
    %c0_92 = arith.constant 0 : index
    %552 = vector.load %arg6[%c2_90, %c0_91, %c0_92] : memref<3x4x4xf32, #tpu.memory_space<vmem>>, vector<1x4x4xf32>
    %553 = vector.shape_cast %552 : vector<1x4x4xf32> to vector<4x4xf32>
    %554 = vector.extract_strided_slice %369 {offsets = [0, 1], sizes = [8, 15], strides = [1, 1]} : vector<8x16xf32> to vector<8x15xf32>
    %555 = vector.extract_strided_slice %369 {offsets = [0, 0], sizes = [8, 1], strides = [1, 1]} : vector<8x16xf32> to vector<8x1xf32>
    %556 = tpu.concatenate %554, %555 in 1 : vector<8x15xf32>, vector<8x1xf32> -> vector<8x16xf32>
    %cst_93 = arith.constant 0.000000e+00 : f32
    %557 = vector.shape_cast %18 : vector<1x16xi1> to vector<1x16xi1>
    %558 = vector.broadcast %557 : vector<1x16xi1> to vector<8x16xi1>
    %559 = vector.broadcast %cst_93 : f32 to vector<8x16xf32>
    %560 = arith.select %558, %556, %559 : vector<8x16xi1>, vector<8x16xf32>
    %561 = vector.extract_strided_slice %553 {offsets = [0, 0], sizes = [1, 1], strides = [1, 1]} : vector<4x4xf32> to vector<1x1xf32>
    %562 = vector.broadcast %561 : vector<1x1xf32> to vector<8x16xf32>
    %563 = arith.mulf %562, %560 : vector<8x16xf32>
    %564 = arith.addf %539, %563 : vector<8x16xf32>
    %565 = vector.extract_strided_slice %553 {offsets = [1, 0], sizes = [1, 1], strides = [1, 1]} : vector<4x4xf32> to vector<1x1xf32>
    %566 = vector.broadcast %565 : vector<1x1xf32> to vector<8x16xf32>
    %567 = arith.mulf %566, %560 : vector<8x16xf32>
    %568 = arith.addf %543, %567 : vector<8x16xf32>
    %569 = vector.extract_strided_slice %553 {offsets = [2, 0], sizes = [1, 1], strides = [1, 1]} : vector<4x4xf32> to vector<1x1xf32>
    %570 = vector.broadcast %569 : vector<1x1xf32> to vector<8x16xf32>
    %571 = arith.mulf %570, %560 : vector<8x16xf32>
    %572 = arith.addf %547, %571 : vector<8x16xf32>
    %573 = vector.extract_strided_slice %553 {offsets = [3, 0], sizes = [1, 1], strides = [1, 1]} : vector<4x4xf32> to vector<1x1xf32>
    %574 = vector.broadcast %573 : vector<1x1xf32> to vector<8x16xf32>
    %575 = arith.mulf %574, %560 : vector<8x16xf32>
    %576 = arith.addf %551, %575 : vector<8x16xf32>
    %577 = vector.extract_strided_slice %375 {offsets = [0, 1], sizes = [8, 15], strides = [1, 1]} : vector<8x16xf32> to vector<8x15xf32>
    %578 = vector.extract_strided_slice %375 {offsets = [0, 0], sizes = [8, 1], strides = [1, 1]} : vector<8x16xf32> to vector<8x1xf32>
    %579 = tpu.concatenate %577, %578 in 1 : vector<8x15xf32>, vector<8x1xf32> -> vector<8x16xf32>
    %cst_94 = arith.constant 0.000000e+00 : f32
    %580 = vector.shape_cast %18 : vector<1x16xi1> to vector<1x16xi1>
    %581 = vector.broadcast %580 : vector<1x16xi1> to vector<8x16xi1>
    %582 = vector.broadcast %cst_94 : f32 to vector<8x16xf32>
    %583 = arith.select %581, %579, %582 : vector<8x16xi1>, vector<8x16xf32>
    %584 = vector.extract_strided_slice %553 {offsets = [0, 1], sizes = [1, 1], strides = [1, 1]} : vector<4x4xf32> to vector<1x1xf32>
    %585 = vector.broadcast %584 : vector<1x1xf32> to vector<8x16xf32>
    %586 = arith.mulf %585, %583 : vector<8x16xf32>
    %587 = arith.addf %564, %586 : vector<8x16xf32>
    %588 = vector.extract_strided_slice %553 {offsets = [1, 1], sizes = [1, 1], strides = [1, 1]} : vector<4x4xf32> to vector<1x1xf32>
    %589 = vector.broadcast %588 : vector<1x1xf32> to vector<8x16xf32>
    %590 = arith.mulf %589, %583 : vector<8x16xf32>
    %591 = arith.addf %568, %590 : vector<8x16xf32>
    %592 = vector.extract_strided_slice %553 {offsets = [2, 1], sizes = [1, 1], strides = [1, 1]} : vector<4x4xf32> to vector<1x1xf32>
    %593 = vector.broadcast %592 : vector<1x1xf32> to vector<8x16xf32>
    %594 = arith.mulf %593, %583 : vector<8x16xf32>
    %595 = arith.addf %572, %594 : vector<8x16xf32>
    %596 = vector.extract_strided_slice %553 {offsets = [3, 1], sizes = [1, 1], strides = [1, 1]} : vector<4x4xf32> to vector<1x1xf32>
    %597 = vector.broadcast %596 : vector<1x1xf32> to vector<8x16xf32>
    %598 = arith.mulf %597, %583 : vector<8x16xf32>
    %599 = arith.addf %576, %598 : vector<8x16xf32>
    %600 = vector.extract_strided_slice %381 {offsets = [0, 1], sizes = [8, 15], strides = [1, 1]} : vector<8x16xf32> to vector<8x15xf32>
    %601 = vector.extract_strided_slice %381 {offsets = [0, 0], sizes = [8, 1], strides = [1, 1]} : vector<8x16xf32> to vector<8x1xf32>
    %602 = tpu.concatenate %600, %601 in 1 : vector<8x15xf32>, vector<8x1xf32> -> vector<8x16xf32>
    %cst_95 = arith.constant 0.000000e+00 : f32
    %603 = vector.shape_cast %18 : vector<1x16xi1> to vector<1x16xi1>
    %604 = vector.broadcast %603 : vector<1x16xi1> to vector<8x16xi1>
    %605 = vector.broadcast %cst_95 : f32 to vector<8x16xf32>
    %606 = arith.select %604, %602, %605 : vector<8x16xi1>, vector<8x16xf32>
    %607 = vector.extract_strided_slice %553 {offsets = [0, 2], sizes = [1, 1], strides = [1, 1]} : vector<4x4xf32> to vector<1x1xf32>
    %608 = vector.broadcast %607 : vector<1x1xf32> to vector<8x16xf32>
    %609 = arith.mulf %608, %606 : vector<8x16xf32>
    %610 = arith.addf %587, %609 : vector<8x16xf32>
    %611 = vector.extract_strided_slice %553 {offsets = [1, 2], sizes = [1, 1], strides = [1, 1]} : vector<4x4xf32> to vector<1x1xf32>
    %612 = vector.broadcast %611 : vector<1x1xf32> to vector<8x16xf32>
    %613 = arith.mulf %612, %606 : vector<8x16xf32>
    %614 = arith.addf %591, %613 : vector<8x16xf32>
    %615 = vector.extract_strided_slice %553 {offsets = [2, 2], sizes = [1, 1], strides = [1, 1]} : vector<4x4xf32> to vector<1x1xf32>
    %616 = vector.broadcast %615 : vector<1x1xf32> to vector<8x16xf32>
    %617 = arith.mulf %616, %606 : vector<8x16xf32>
    %618 = arith.addf %595, %617 : vector<8x16xf32>
    %619 = vector.extract_strided_slice %553 {offsets = [3, 2], sizes = [1, 1], strides = [1, 1]} : vector<4x4xf32> to vector<1x1xf32>
    %620 = vector.broadcast %619 : vector<1x1xf32> to vector<8x16xf32>
    %621 = arith.mulf %620, %606 : vector<8x16xf32>
    %622 = arith.addf %599, %621 : vector<8x16xf32>
    %623 = vector.extract_strided_slice %387 {offsets = [0, 1], sizes = [8, 15], strides = [1, 1]} : vector<8x16xf32> to vector<8x15xf32>
    %624 = vector.extract_strided_slice %387 {offsets = [0, 0], sizes = [8, 1], strides = [1, 1]} : vector<8x16xf32> to vector<8x1xf32>
    %625 = tpu.concatenate %623, %624 in 1 : vector<8x15xf32>, vector<8x1xf32> -> vector<8x16xf32>
    %cst_96 = arith.constant 0.000000e+00 : f32
    %626 = vector.shape_cast %18 : vector<1x16xi1> to vector<1x16xi1>
    %627 = vector.broadcast %626 : vector<1x16xi1> to vector<8x16xi1>
    %628 = vector.broadcast %cst_96 : f32 to vector<8x16xf32>
    %629 = arith.select %627, %625, %628 : vector<8x16xi1>, vector<8x16xf32>
    %630 = vector.extract_strided_slice %553 {offsets = [0, 3], sizes = [1, 1], strides = [1, 1]} : vector<4x4xf32> to vector<1x1xf32>
    %631 = vector.broadcast %630 : vector<1x1xf32> to vector<8x16xf32>
    %632 = arith.mulf %631, %629 : vector<8x16xf32>
    %633 = arith.addf %610, %632 : vector<8x16xf32>
    %634 = vector.extract_strided_slice %553 {offsets = [1, 3], sizes = [1, 1], strides = [1, 1]} : vector<4x4xf32> to vector<1x1xf32>
    %635 = vector.broadcast %634 : vector<1x1xf32> to vector<8x16xf32>
    %636 = arith.mulf %635, %629 : vector<8x16xf32>
    %637 = arith.addf %614, %636 : vector<8x16xf32>
    %638 = vector.extract_strided_slice %553 {offsets = [2, 3], sizes = [1, 1], strides = [1, 1]} : vector<4x4xf32> to vector<1x1xf32>
    %639 = vector.broadcast %638 : vector<1x1xf32> to vector<8x16xf32>
    %640 = arith.mulf %639, %629 : vector<8x16xf32>
    %641 = arith.addf %618, %640 : vector<8x16xf32>
    %642 = vector.extract_strided_slice %553 {offsets = [3, 3], sizes = [1, 1], strides = [1, 1]} : vector<4x4xf32> to vector<1x1xf32>
    %643 = vector.broadcast %642 : vector<1x1xf32> to vector<8x16xf32>
    %644 = arith.mulf %643, %629 : vector<8x16xf32>
    %645 = arith.addf %622, %644 : vector<8x16xf32>
    %c0_97 = arith.constant 0 : index
    %c0_98 = arith.constant 0 : index
    %646 = vector.load %arg7[%c0_97, %c0_98] : memref<1x4xf32, #tpu.memory_space<vmem>>, vector<1x1xf32>
    %647 = vector.broadcast %646 : vector<1x1xf32> to vector<8x16xf32>
    %648 = arith.addf %633, %647 : vector<8x16xf32>
    %649 = arith.addf %648, %369 : vector<8x16xf32>
    %cst_99 = arith.constant 0.000000e+00 : f32
    %650 = vector.broadcast %cst_99 : f32 to vector<8x16xf32>
    %651 = arith.maximumf %649, %650 : vector<8x16xf32>
    %c0_100 = arith.constant 0 : index
    %c1_101 = arith.constant 1 : index
    %652 = vector.load %arg7[%c0_100, %c1_101] : memref<1x4xf32, #tpu.memory_space<vmem>>, vector<1x1xf32>
    %653 = vector.broadcast %652 : vector<1x1xf32> to vector<8x16xf32>
    %654 = arith.addf %637, %653 : vector<8x16xf32>
    %655 = arith.addf %654, %375 : vector<8x16xf32>
    %cst_102 = arith.constant 0.000000e+00 : f32
    %656 = vector.broadcast %cst_102 : f32 to vector<8x16xf32>
    %657 = arith.maximumf %655, %656 : vector<8x16xf32>
    %c0_103 = arith.constant 0 : index
    %c2_104 = arith.constant 2 : index
    %658 = vector.load %arg7[%c0_103, %c2_104] : memref<1x4xf32, #tpu.memory_space<vmem>>, vector<1x1xf32>
    %659 = vector.broadcast %658 : vector<1x1xf32> to vector<8x16xf32>
    %660 = arith.addf %641, %659 : vector<8x16xf32>
    %661 = arith.addf %660, %381 : vector<8x16xf32>
    %cst_105 = arith.constant 0.000000e+00 : f32
    %662 = vector.broadcast %cst_105 : f32 to vector<8x16xf32>
    %663 = arith.maximumf %661, %662 : vector<8x16xf32>
    %c0_106 = arith.constant 0 : index
    %c3_107 = arith.constant 3 : index
    %664 = vector.load %arg7[%c0_106, %c3_107] : memref<1x4xf32, #tpu.memory_space<vmem>>, vector<1x1xf32>
    %665 = vector.broadcast %664 : vector<1x1xf32> to vector<8x16xf32>
    %666 = arith.addf %645, %665 : vector<8x16xf32>
    %667 = arith.addf %666, %387 : vector<8x16xf32>
    %cst_108 = arith.constant 0.000000e+00 : f32
    %668 = vector.broadcast %cst_108 : f32 to vector<8x16xf32>
    %669 = arith.maximumf %667, %668 : vector<8x16xf32>
    %cst_109 = arith.constant 0.000000e+00 : f32
    %670 = vector.broadcast %cst_109 : f32 to vector<8x16xf32>
    %cst_110 = arith.constant 0.000000e+00 : f32
    %671 = vector.broadcast %cst_110 : f32 to vector<8x16xf32>
    %cst_111 = arith.constant 0.000000e+00 : f32
    %672 = vector.broadcast %cst_111 : f32 to vector<8x16xf32>
    %cst_112 = arith.constant 0.000000e+00 : f32
    %673 = vector.broadcast %cst_112 : f32 to vector<8x16xf32>
    %c0_113 = arith.constant 0 : index
    %c0_114 = arith.constant 0 : index
    %c0_115 = arith.constant 0 : index
    %674 = vector.load %arg8[%c0_113, %c0_114, %c0_115] : memref<3x4x4xf32, #tpu.memory_space<vmem>>, vector<1x4x4xf32>
    %675 = vector.shape_cast %674 : vector<1x4x4xf32> to vector<4x4xf32>
    %676 = vector.extract_strided_slice %651 {offsets = [0, 15], sizes = [8, 1], strides = [1, 1]} : vector<8x16xf32> to vector<8x1xf32>
    %677 = vector.extract_strided_slice %651 {offsets = [0, 0], sizes = [8, 15], strides = [1, 1]} : vector<8x16xf32> to vector<8x15xf32>
    %678 = tpu.concatenate %676, %677 in 1 : vector<8x1xf32>, vector<8x15xf32> -> vector<8x16xf32>
    %cst_116 = arith.constant 0.000000e+00 : f32
    %679 = vector.shape_cast %9 : vector<1x16xi1> to vector<1x16xi1>
    %680 = vector.broadcast %679 : vector<1x16xi1> to vector<8x16xi1>
    %681 = vector.broadcast %cst_116 : f32 to vector<8x16xf32>
    %682 = arith.select %680, %678, %681 : vector<8x16xi1>, vector<8x16xf32>
    %683 = vector.extract_strided_slice %675 {offsets = [0, 0], sizes = [1, 1], strides = [1, 1]} : vector<4x4xf32> to vector<1x1xf32>
    %684 = vector.broadcast %683 : vector<1x1xf32> to vector<8x16xf32>
    %685 = arith.mulf %684, %682 : vector<8x16xf32>
    %686 = arith.addf %670, %685 : vector<8x16xf32>
    %687 = vector.extract_strided_slice %675 {offsets = [1, 0], sizes = [1, 1], strides = [1, 1]} : vector<4x4xf32> to vector<1x1xf32>
    %688 = vector.broadcast %687 : vector<1x1xf32> to vector<8x16xf32>
    %689 = arith.mulf %688, %682 : vector<8x16xf32>
    %690 = arith.addf %671, %689 : vector<8x16xf32>
    %691 = vector.extract_strided_slice %675 {offsets = [2, 0], sizes = [1, 1], strides = [1, 1]} : vector<4x4xf32> to vector<1x1xf32>
    %692 = vector.broadcast %691 : vector<1x1xf32> to vector<8x16xf32>
    %693 = arith.mulf %692, %682 : vector<8x16xf32>
    %694 = arith.addf %672, %693 : vector<8x16xf32>
    %695 = vector.extract_strided_slice %675 {offsets = [3, 0], sizes = [1, 1], strides = [1, 1]} : vector<4x4xf32> to vector<1x1xf32>
    %696 = vector.broadcast %695 : vector<1x1xf32> to vector<8x16xf32>
    %697 = arith.mulf %696, %682 : vector<8x16xf32>
    %698 = arith.addf %673, %697 : vector<8x16xf32>
    %699 = vector.extract_strided_slice %657 {offsets = [0, 15], sizes = [8, 1], strides = [1, 1]} : vector<8x16xf32> to vector<8x1xf32>
    %700 = vector.extract_strided_slice %657 {offsets = [0, 0], sizes = [8, 15], strides = [1, 1]} : vector<8x16xf32> to vector<8x15xf32>
    %701 = tpu.concatenate %699, %700 in 1 : vector<8x1xf32>, vector<8x15xf32> -> vector<8x16xf32>
    %cst_117 = arith.constant 0.000000e+00 : f32
    %702 = vector.shape_cast %9 : vector<1x16xi1> to vector<1x16xi1>
    %703 = vector.broadcast %702 : vector<1x16xi1> to vector<8x16xi1>
    %704 = vector.broadcast %cst_117 : f32 to vector<8x16xf32>
    %705 = arith.select %703, %701, %704 : vector<8x16xi1>, vector<8x16xf32>
    %706 = vector.extract_strided_slice %675 {offsets = [0, 1], sizes = [1, 1], strides = [1, 1]} : vector<4x4xf32> to vector<1x1xf32>
    %707 = vector.broadcast %706 : vector<1x1xf32> to vector<8x16xf32>
    %708 = arith.mulf %707, %705 : vector<8x16xf32>
    %709 = arith.addf %686, %708 : vector<8x16xf32>
    %710 = vector.extract_strided_slice %675 {offsets = [1, 1], sizes = [1, 1], strides = [1, 1]} : vector<4x4xf32> to vector<1x1xf32>
    %711 = vector.broadcast %710 : vector<1x1xf32> to vector<8x16xf32>
    %712 = arith.mulf %711, %705 : vector<8x16xf32>
    %713 = arith.addf %690, %712 : vector<8x16xf32>
    %714 = vector.extract_strided_slice %675 {offsets = [2, 1], sizes = [1, 1], strides = [1, 1]} : vector<4x4xf32> to vector<1x1xf32>
    %715 = vector.broadcast %714 : vector<1x1xf32> to vector<8x16xf32>
    %716 = arith.mulf %715, %705 : vector<8x16xf32>
    %717 = arith.addf %694, %716 : vector<8x16xf32>
    %718 = vector.extract_strided_slice %675 {offsets = [3, 1], sizes = [1, 1], strides = [1, 1]} : vector<4x4xf32> to vector<1x1xf32>
    %719 = vector.broadcast %718 : vector<1x1xf32> to vector<8x16xf32>
    %720 = arith.mulf %719, %705 : vector<8x16xf32>
    %721 = arith.addf %698, %720 : vector<8x16xf32>
    %722 = vector.extract_strided_slice %663 {offsets = [0, 15], sizes = [8, 1], strides = [1, 1]} : vector<8x16xf32> to vector<8x1xf32>
    %723 = vector.extract_strided_slice %663 {offsets = [0, 0], sizes = [8, 15], strides = [1, 1]} : vector<8x16xf32> to vector<8x15xf32>
    %724 = tpu.concatenate %722, %723 in 1 : vector<8x1xf32>, vector<8x15xf32> -> vector<8x16xf32>
    %cst_118 = arith.constant 0.000000e+00 : f32
    %725 = vector.shape_cast %9 : vector<1x16xi1> to vector<1x16xi1>
    %726 = vector.broadcast %725 : vector<1x16xi1> to vector<8x16xi1>
    %727 = vector.broadcast %cst_118 : f32 to vector<8x16xf32>
    %728 = arith.select %726, %724, %727 : vector<8x16xi1>, vector<8x16xf32>
    %729 = vector.extract_strided_slice %675 {offsets = [0, 2], sizes = [1, 1], strides = [1, 1]} : vector<4x4xf32> to vector<1x1xf32>
    %730 = vector.broadcast %729 : vector<1x1xf32> to vector<8x16xf32>
    %731 = arith.mulf %730, %728 : vector<8x16xf32>
    %732 = arith.addf %709, %731 : vector<8x16xf32>
    %733 = vector.extract_strided_slice %675 {offsets = [1, 2], sizes = [1, 1], strides = [1, 1]} : vector<4x4xf32> to vector<1x1xf32>
    %734 = vector.broadcast %733 : vector<1x1xf32> to vector<8x16xf32>
    %735 = arith.mulf %734, %728 : vector<8x16xf32>
    %736 = arith.addf %713, %735 : vector<8x16xf32>
    %737 = vector.extract_strided_slice %675 {offsets = [2, 2], sizes = [1, 1], strides = [1, 1]} : vector<4x4xf32> to vector<1x1xf32>
    %738 = vector.broadcast %737 : vector<1x1xf32> to vector<8x16xf32>
    %739 = arith.mulf %738, %728 : vector<8x16xf32>
    %740 = arith.addf %717, %739 : vector<8x16xf32>
    %741 = vector.extract_strided_slice %675 {offsets = [3, 2], sizes = [1, 1], strides = [1, 1]} : vector<4x4xf32> to vector<1x1xf32>
    %742 = vector.broadcast %741 : vector<1x1xf32> to vector<8x16xf32>
    %743 = arith.mulf %742, %728 : vector<8x16xf32>
    %744 = arith.addf %721, %743 : vector<8x16xf32>
    %745 = vector.extract_strided_slice %669 {offsets = [0, 15], sizes = [8, 1], strides = [1, 1]} : vector<8x16xf32> to vector<8x1xf32>
    %746 = vector.extract_strided_slice %669 {offsets = [0, 0], sizes = [8, 15], strides = [1, 1]} : vector<8x16xf32> to vector<8x15xf32>
    %747 = tpu.concatenate %745, %746 in 1 : vector<8x1xf32>, vector<8x15xf32> -> vector<8x16xf32>
    %cst_119 = arith.constant 0.000000e+00 : f32
    %748 = vector.shape_cast %9 : vector<1x16xi1> to vector<1x16xi1>
    %749 = vector.broadcast %748 : vector<1x16xi1> to vector<8x16xi1>
    %750 = vector.broadcast %cst_119 : f32 to vector<8x16xf32>
    %751 = arith.select %749, %747, %750 : vector<8x16xi1>, vector<8x16xf32>
    %752 = vector.extract_strided_slice %675 {offsets = [0, 3], sizes = [1, 1], strides = [1, 1]} : vector<4x4xf32> to vector<1x1xf32>
    %753 = vector.broadcast %752 : vector<1x1xf32> to vector<8x16xf32>
    %754 = arith.mulf %753, %751 : vector<8x16xf32>
    %755 = arith.addf %732, %754 : vector<8x16xf32>
    %756 = vector.extract_strided_slice %675 {offsets = [1, 3], sizes = [1, 1], strides = [1, 1]} : vector<4x4xf32> to vector<1x1xf32>
    %757 = vector.broadcast %756 : vector<1x1xf32> to vector<8x16xf32>
    %758 = arith.mulf %757, %751 : vector<8x16xf32>
    %759 = arith.addf %736, %758 : vector<8x16xf32>
    %760 = vector.extract_strided_slice %675 {offsets = [2, 3], sizes = [1, 1], strides = [1, 1]} : vector<4x4xf32> to vector<1x1xf32>
    %761 = vector.broadcast %760 : vector<1x1xf32> to vector<8x16xf32>
    %762 = arith.mulf %761, %751 : vector<8x16xf32>
    %763 = arith.addf %740, %762 : vector<8x16xf32>
    %764 = vector.extract_strided_slice %675 {offsets = [3, 3], sizes = [1, 1], strides = [1, 1]} : vector<4x4xf32> to vector<1x1xf32>
    %765 = vector.broadcast %764 : vector<1x1xf32> to vector<8x16xf32>
    %766 = arith.mulf %765, %751 : vector<8x16xf32>
    %767 = arith.addf %744, %766 : vector<8x16xf32>
    %c1_120 = arith.constant 1 : index
    %c0_121 = arith.constant 0 : index
    %c0_122 = arith.constant 0 : index
    %768 = vector.load %arg8[%c1_120, %c0_121, %c0_122] : memref<3x4x4xf32, #tpu.memory_space<vmem>>, vector<1x4x4xf32>
    %769 = vector.shape_cast %768 : vector<1x4x4xf32> to vector<4x4xf32>
    %770 = vector.extract_strided_slice %769 {offsets = [0, 0], sizes = [1, 1], strides = [1, 1]} : vector<4x4xf32> to vector<1x1xf32>
    %771 = vector.broadcast %770 : vector<1x1xf32> to vector<8x16xf32>
    %772 = arith.mulf %771, %651 : vector<8x16xf32>
    %773 = arith.addf %755, %772 : vector<8x16xf32>
    %774 = vector.extract_strided_slice %769 {offsets = [1, 0], sizes = [1, 1], strides = [1, 1]} : vector<4x4xf32> to vector<1x1xf32>
    %775 = vector.broadcast %774 : vector<1x1xf32> to vector<8x16xf32>
    %776 = arith.mulf %775, %651 : vector<8x16xf32>
    %777 = arith.addf %759, %776 : vector<8x16xf32>
    %778 = vector.extract_strided_slice %769 {offsets = [2, 0], sizes = [1, 1], strides = [1, 1]} : vector<4x4xf32> to vector<1x1xf32>
    %779 = vector.broadcast %778 : vector<1x1xf32> to vector<8x16xf32>
    %780 = arith.mulf %779, %651 : vector<8x16xf32>
    %781 = arith.addf %763, %780 : vector<8x16xf32>
    %782 = vector.extract_strided_slice %769 {offsets = [3, 0], sizes = [1, 1], strides = [1, 1]} : vector<4x4xf32> to vector<1x1xf32>
    %783 = vector.broadcast %782 : vector<1x1xf32> to vector<8x16xf32>
    %784 = arith.mulf %783, %651 : vector<8x16xf32>
    %785 = arith.addf %767, %784 : vector<8x16xf32>
    %786 = vector.extract_strided_slice %769 {offsets = [0, 1], sizes = [1, 1], strides = [1, 1]} : vector<4x4xf32> to vector<1x1xf32>
    %787 = vector.broadcast %786 : vector<1x1xf32> to vector<8x16xf32>
    %788 = arith.mulf %787, %657 : vector<8x16xf32>
    %789 = arith.addf %773, %788 : vector<8x16xf32>
    %790 = vector.extract_strided_slice %769 {offsets = [1, 1], sizes = [1, 1], strides = [1, 1]} : vector<4x4xf32> to vector<1x1xf32>
    %791 = vector.broadcast %790 : vector<1x1xf32> to vector<8x16xf32>
    %792 = arith.mulf %791, %657 : vector<8x16xf32>
    %793 = arith.addf %777, %792 : vector<8x16xf32>
    %794 = vector.extract_strided_slice %769 {offsets = [2, 1], sizes = [1, 1], strides = [1, 1]} : vector<4x4xf32> to vector<1x1xf32>
    %795 = vector.broadcast %794 : vector<1x1xf32> to vector<8x16xf32>
    %796 = arith.mulf %795, %657 : vector<8x16xf32>
    %797 = arith.addf %781, %796 : vector<8x16xf32>
    %798 = vector.extract_strided_slice %769 {offsets = [3, 1], sizes = [1, 1], strides = [1, 1]} : vector<4x4xf32> to vector<1x1xf32>
    %799 = vector.broadcast %798 : vector<1x1xf32> to vector<8x16xf32>
    %800 = arith.mulf %799, %657 : vector<8x16xf32>
    %801 = arith.addf %785, %800 : vector<8x16xf32>
    %802 = vector.extract_strided_slice %769 {offsets = [0, 2], sizes = [1, 1], strides = [1, 1]} : vector<4x4xf32> to vector<1x1xf32>
    %803 = vector.broadcast %802 : vector<1x1xf32> to vector<8x16xf32>
    %804 = arith.mulf %803, %663 : vector<8x16xf32>
    %805 = arith.addf %789, %804 : vector<8x16xf32>
    %806 = vector.extract_strided_slice %769 {offsets = [1, 2], sizes = [1, 1], strides = [1, 1]} : vector<4x4xf32> to vector<1x1xf32>
    %807 = vector.broadcast %806 : vector<1x1xf32> to vector<8x16xf32>
    %808 = arith.mulf %807, %663 : vector<8x16xf32>
    %809 = arith.addf %793, %808 : vector<8x16xf32>
    %810 = vector.extract_strided_slice %769 {offsets = [2, 2], sizes = [1, 1], strides = [1, 1]} : vector<4x4xf32> to vector<1x1xf32>
    %811 = vector.broadcast %810 : vector<1x1xf32> to vector<8x16xf32>
    %812 = arith.mulf %811, %663 : vector<8x16xf32>
    %813 = arith.addf %797, %812 : vector<8x16xf32>
    %814 = vector.extract_strided_slice %769 {offsets = [3, 2], sizes = [1, 1], strides = [1, 1]} : vector<4x4xf32> to vector<1x1xf32>
    %815 = vector.broadcast %814 : vector<1x1xf32> to vector<8x16xf32>
    %816 = arith.mulf %815, %663 : vector<8x16xf32>
    %817 = arith.addf %801, %816 : vector<8x16xf32>
    %818 = vector.extract_strided_slice %769 {offsets = [0, 3], sizes = [1, 1], strides = [1, 1]} : vector<4x4xf32> to vector<1x1xf32>
    %819 = vector.broadcast %818 : vector<1x1xf32> to vector<8x16xf32>
    %820 = arith.mulf %819, %669 : vector<8x16xf32>
    %821 = arith.addf %805, %820 : vector<8x16xf32>
    %822 = vector.extract_strided_slice %769 {offsets = [1, 3], sizes = [1, 1], strides = [1, 1]} : vector<4x4xf32> to vector<1x1xf32>
    %823 = vector.broadcast %822 : vector<1x1xf32> to vector<8x16xf32>
    %824 = arith.mulf %823, %669 : vector<8x16xf32>
    %825 = arith.addf %809, %824 : vector<8x16xf32>
    %826 = vector.extract_strided_slice %769 {offsets = [2, 3], sizes = [1, 1], strides = [1, 1]} : vector<4x4xf32> to vector<1x1xf32>
    %827 = vector.broadcast %826 : vector<1x1xf32> to vector<8x16xf32>
    %828 = arith.mulf %827, %669 : vector<8x16xf32>
    %829 = arith.addf %813, %828 : vector<8x16xf32>
    %830 = vector.extract_strided_slice %769 {offsets = [3, 3], sizes = [1, 1], strides = [1, 1]} : vector<4x4xf32> to vector<1x1xf32>
    %831 = vector.broadcast %830 : vector<1x1xf32> to vector<8x16xf32>
    %832 = arith.mulf %831, %669 : vector<8x16xf32>
    %833 = arith.addf %817, %832 : vector<8x16xf32>
    %c2_123 = arith.constant 2 : index
    %c0_124 = arith.constant 0 : index
    %c0_125 = arith.constant 0 : index
    %834 = vector.load %arg8[%c2_123, %c0_124, %c0_125] : memref<3x4x4xf32, #tpu.memory_space<vmem>>, vector<1x4x4xf32>
    %835 = vector.shape_cast %834 : vector<1x4x4xf32> to vector<4x4xf32>
    %836 = vector.extract_strided_slice %651 {offsets = [0, 1], sizes = [8, 15], strides = [1, 1]} : vector<8x16xf32> to vector<8x15xf32>
    %837 = vector.extract_strided_slice %651 {offsets = [0, 0], sizes = [8, 1], strides = [1, 1]} : vector<8x16xf32> to vector<8x1xf32>
    %838 = tpu.concatenate %836, %837 in 1 : vector<8x15xf32>, vector<8x1xf32> -> vector<8x16xf32>
    %cst_126 = arith.constant 0.000000e+00 : f32
    %839 = vector.shape_cast %18 : vector<1x16xi1> to vector<1x16xi1>
    %840 = vector.broadcast %839 : vector<1x16xi1> to vector<8x16xi1>
    %841 = vector.broadcast %cst_126 : f32 to vector<8x16xf32>
    %842 = arith.select %840, %838, %841 : vector<8x16xi1>, vector<8x16xf32>
    %843 = vector.extract_strided_slice %835 {offsets = [0, 0], sizes = [1, 1], strides = [1, 1]} : vector<4x4xf32> to vector<1x1xf32>
    %844 = vector.broadcast %843 : vector<1x1xf32> to vector<8x16xf32>
    %845 = arith.mulf %844, %842 : vector<8x16xf32>
    %846 = arith.addf %821, %845 : vector<8x16xf32>
    %847 = vector.extract_strided_slice %835 {offsets = [1, 0], sizes = [1, 1], strides = [1, 1]} : vector<4x4xf32> to vector<1x1xf32>
    %848 = vector.broadcast %847 : vector<1x1xf32> to vector<8x16xf32>
    %849 = arith.mulf %848, %842 : vector<8x16xf32>
    %850 = arith.addf %825, %849 : vector<8x16xf32>
    %851 = vector.extract_strided_slice %835 {offsets = [2, 0], sizes = [1, 1], strides = [1, 1]} : vector<4x4xf32> to vector<1x1xf32>
    %852 = vector.broadcast %851 : vector<1x1xf32> to vector<8x16xf32>
    %853 = arith.mulf %852, %842 : vector<8x16xf32>
    %854 = arith.addf %829, %853 : vector<8x16xf32>
    %855 = vector.extract_strided_slice %835 {offsets = [3, 0], sizes = [1, 1], strides = [1, 1]} : vector<4x4xf32> to vector<1x1xf32>
    %856 = vector.broadcast %855 : vector<1x1xf32> to vector<8x16xf32>
    %857 = arith.mulf %856, %842 : vector<8x16xf32>
    %858 = arith.addf %833, %857 : vector<8x16xf32>
    %859 = vector.extract_strided_slice %657 {offsets = [0, 1], sizes = [8, 15], strides = [1, 1]} : vector<8x16xf32> to vector<8x15xf32>
    %860 = vector.extract_strided_slice %657 {offsets = [0, 0], sizes = [8, 1], strides = [1, 1]} : vector<8x16xf32> to vector<8x1xf32>
    %861 = tpu.concatenate %859, %860 in 1 : vector<8x15xf32>, vector<8x1xf32> -> vector<8x16xf32>
    %cst_127 = arith.constant 0.000000e+00 : f32
    %862 = vector.shape_cast %18 : vector<1x16xi1> to vector<1x16xi1>
    %863 = vector.broadcast %862 : vector<1x16xi1> to vector<8x16xi1>
    %864 = vector.broadcast %cst_127 : f32 to vector<8x16xf32>
    %865 = arith.select %863, %861, %864 : vector<8x16xi1>, vector<8x16xf32>
    %866 = vector.extract_strided_slice %835 {offsets = [0, 1], sizes = [1, 1], strides = [1, 1]} : vector<4x4xf32> to vector<1x1xf32>
    %867 = vector.broadcast %866 : vector<1x1xf32> to vector<8x16xf32>
    %868 = arith.mulf %867, %865 : vector<8x16xf32>
    %869 = arith.addf %846, %868 : vector<8x16xf32>
    %870 = vector.extract_strided_slice %835 {offsets = [1, 1], sizes = [1, 1], strides = [1, 1]} : vector<4x4xf32> to vector<1x1xf32>
    %871 = vector.broadcast %870 : vector<1x1xf32> to vector<8x16xf32>
    %872 = arith.mulf %871, %865 : vector<8x16xf32>
    %873 = arith.addf %850, %872 : vector<8x16xf32>
    %874 = vector.extract_strided_slice %835 {offsets = [2, 1], sizes = [1, 1], strides = [1, 1]} : vector<4x4xf32> to vector<1x1xf32>
    %875 = vector.broadcast %874 : vector<1x1xf32> to vector<8x16xf32>
    %876 = arith.mulf %875, %865 : vector<8x16xf32>
    %877 = arith.addf %854, %876 : vector<8x16xf32>
    %878 = vector.extract_strided_slice %835 {offsets = [3, 1], sizes = [1, 1], strides = [1, 1]} : vector<4x4xf32> to vector<1x1xf32>
    %879 = vector.broadcast %878 : vector<1x1xf32> to vector<8x16xf32>
    %880 = arith.mulf %879, %865 : vector<8x16xf32>
    %881 = arith.addf %858, %880 : vector<8x16xf32>
    %882 = vector.extract_strided_slice %663 {offsets = [0, 1], sizes = [8, 15], strides = [1, 1]} : vector<8x16xf32> to vector<8x15xf32>
    %883 = vector.extract_strided_slice %663 {offsets = [0, 0], sizes = [8, 1], strides = [1, 1]} : vector<8x16xf32> to vector<8x1xf32>
    %884 = tpu.concatenate %882, %883 in 1 : vector<8x15xf32>, vector<8x1xf32> -> vector<8x16xf32>
    %cst_128 = arith.constant 0.000000e+00 : f32
    %885 = vector.shape_cast %18 : vector<1x16xi1> to vector<1x16xi1>
    %886 = vector.broadcast %885 : vector<1x16xi1> to vector<8x16xi1>
    %887 = vector.broadcast %cst_128 : f32 to vector<8x16xf32>
    %888 = arith.select %886, %884, %887 : vector<8x16xi1>, vector<8x16xf32>
    %889 = vector.extract_strided_slice %835 {offsets = [0, 2], sizes = [1, 1], strides = [1, 1]} : vector<4x4xf32> to vector<1x1xf32>
    %890 = vector.broadcast %889 : vector<1x1xf32> to vector<8x16xf32>
    %891 = arith.mulf %890, %888 : vector<8x16xf32>
    %892 = arith.addf %869, %891 : vector<8x16xf32>
    %893 = vector.extract_strided_slice %835 {offsets = [1, 2], sizes = [1, 1], strides = [1, 1]} : vector<4x4xf32> to vector<1x1xf32>
    %894 = vector.broadcast %893 : vector<1x1xf32> to vector<8x16xf32>
    %895 = arith.mulf %894, %888 : vector<8x16xf32>
    %896 = arith.addf %873, %895 : vector<8x16xf32>
    %897 = vector.extract_strided_slice %835 {offsets = [2, 2], sizes = [1, 1], strides = [1, 1]} : vector<4x4xf32> to vector<1x1xf32>
    %898 = vector.broadcast %897 : vector<1x1xf32> to vector<8x16xf32>
    %899 = arith.mulf %898, %888 : vector<8x16xf32>
    %900 = arith.addf %877, %899 : vector<8x16xf32>
    %901 = vector.extract_strided_slice %835 {offsets = [3, 2], sizes = [1, 1], strides = [1, 1]} : vector<4x4xf32> to vector<1x1xf32>
    %902 = vector.broadcast %901 : vector<1x1xf32> to vector<8x16xf32>
    %903 = arith.mulf %902, %888 : vector<8x16xf32>
    %904 = arith.addf %881, %903 : vector<8x16xf32>
    %905 = vector.extract_strided_slice %669 {offsets = [0, 1], sizes = [8, 15], strides = [1, 1]} : vector<8x16xf32> to vector<8x15xf32>
    %906 = vector.extract_strided_slice %669 {offsets = [0, 0], sizes = [8, 1], strides = [1, 1]} : vector<8x16xf32> to vector<8x1xf32>
    %907 = tpu.concatenate %905, %906 in 1 : vector<8x15xf32>, vector<8x1xf32> -> vector<8x16xf32>
    %cst_129 = arith.constant 0.000000e+00 : f32
    %908 = vector.shape_cast %18 : vector<1x16xi1> to vector<1x16xi1>
    %909 = vector.broadcast %908 : vector<1x16xi1> to vector<8x16xi1>
    %910 = vector.broadcast %cst_129 : f32 to vector<8x16xf32>
    %911 = arith.select %909, %907, %910 : vector<8x16xi1>, vector<8x16xf32>
    %912 = vector.extract_strided_slice %835 {offsets = [0, 3], sizes = [1, 1], strides = [1, 1]} : vector<4x4xf32> to vector<1x1xf32>
    %913 = vector.broadcast %912 : vector<1x1xf32> to vector<8x16xf32>
    %914 = arith.mulf %913, %911 : vector<8x16xf32>
    %915 = arith.addf %892, %914 : vector<8x16xf32>
    %916 = vector.extract_strided_slice %835 {offsets = [1, 3], sizes = [1, 1], strides = [1, 1]} : vector<4x4xf32> to vector<1x1xf32>
    %917 = vector.broadcast %916 : vector<1x1xf32> to vector<8x16xf32>
    %918 = arith.mulf %917, %911 : vector<8x16xf32>
    %919 = arith.addf %896, %918 : vector<8x16xf32>
    %920 = vector.extract_strided_slice %835 {offsets = [2, 3], sizes = [1, 1], strides = [1, 1]} : vector<4x4xf32> to vector<1x1xf32>
    %921 = vector.broadcast %920 : vector<1x1xf32> to vector<8x16xf32>
    %922 = arith.mulf %921, %911 : vector<8x16xf32>
    %923 = arith.addf %900, %922 : vector<8x16xf32>
    %924 = vector.extract_strided_slice %835 {offsets = [3, 3], sizes = [1, 1], strides = [1, 1]} : vector<4x4xf32> to vector<1x1xf32>
    %925 = vector.broadcast %924 : vector<1x1xf32> to vector<8x16xf32>
    %926 = arith.mulf %925, %911 : vector<8x16xf32>
    %927 = arith.addf %904, %926 : vector<8x16xf32>
    %c0_130 = arith.constant 0 : index
    %c0_131 = arith.constant 0 : index
    %928 = vector.load %arg9[%c0_130, %c0_131] : memref<1x4xf32, #tpu.memory_space<vmem>>, vector<1x1xf32>
    %929 = vector.broadcast %928 : vector<1x1xf32> to vector<8x16xf32>
    %930 = arith.addf %915, %929 : vector<8x16xf32>
    %931 = arith.addf %930, %651 : vector<8x16xf32>
    %cst_132 = arith.constant 0.000000e+00 : f32
    %932 = vector.broadcast %cst_132 : f32 to vector<8x16xf32>
    %933 = arith.maximumf %931, %932 : vector<8x16xf32>
    %c0_133 = arith.constant 0 : index
    %c1_134 = arith.constant 1 : index
    %934 = vector.load %arg9[%c0_133, %c1_134] : memref<1x4xf32, #tpu.memory_space<vmem>>, vector<1x1xf32>
    %935 = vector.broadcast %934 : vector<1x1xf32> to vector<8x16xf32>
    %936 = arith.addf %919, %935 : vector<8x16xf32>
    %937 = arith.addf %936, %657 : vector<8x16xf32>
    %cst_135 = arith.constant 0.000000e+00 : f32
    %938 = vector.broadcast %cst_135 : f32 to vector<8x16xf32>
    %939 = arith.maximumf %937, %938 : vector<8x16xf32>
    %c0_136 = arith.constant 0 : index
    %c2_137 = arith.constant 2 : index
    %940 = vector.load %arg9[%c0_136, %c2_137] : memref<1x4xf32, #tpu.memory_space<vmem>>, vector<1x1xf32>
    %941 = vector.broadcast %940 : vector<1x1xf32> to vector<8x16xf32>
    %942 = arith.addf %923, %941 : vector<8x16xf32>
    %943 = arith.addf %942, %663 : vector<8x16xf32>
    %cst_138 = arith.constant 0.000000e+00 : f32
    %944 = vector.broadcast %cst_138 : f32 to vector<8x16xf32>
    %945 = arith.maximumf %943, %944 : vector<8x16xf32>
    %c0_139 = arith.constant 0 : index
    %c3_140 = arith.constant 3 : index
    %946 = vector.load %arg9[%c0_139, %c3_140] : memref<1x4xf32, #tpu.memory_space<vmem>>, vector<1x1xf32>
    %947 = vector.broadcast %946 : vector<1x1xf32> to vector<8x16xf32>
    %948 = arith.addf %927, %947 : vector<8x16xf32>
    %949 = arith.addf %948, %669 : vector<8x16xf32>
    %cst_141 = arith.constant 0.000000e+00 : f32
    %950 = vector.broadcast %cst_141 : f32 to vector<8x16xf32>
    %951 = arith.maximumf %949, %950 : vector<8x16xf32>
    %c0_142 = arith.constant 0 : index
    %c0_143 = arith.constant 0 : index
    %c0_144 = arith.constant 0 : index
    %952 = vector.load %arg10[%c0_142, %c0_143, %c0_144] : memref<4x16x32xf32, #tpu.memory_space<vmem>>, vector<1x16x32xf32>
    %953 = vector.shape_cast %952 : vector<1x16x32xf32> to vector<16x32xf32>
    %cst_145 = arith.constant dense<0.000000e+00> : vector<8x32xf32>
    %954 = tpu.matmul %933, %953, %cst_145 {dimension_numbers = #tpu.dot_dimension_numbers<[1], [0], [0], [1], [0, 0, 1, 1], [], []>} : vector<8x16xf32>, vector<16x32xf32>, vector<8x32xf32> -> vector<8x32xf32>
    %c1_146 = arith.constant 1 : index
    %c0_147 = arith.constant 0 : index
    %c0_148 = arith.constant 0 : index
    %955 = vector.load %arg10[%c1_146, %c0_147, %c0_148] : memref<4x16x32xf32, #tpu.memory_space<vmem>>, vector<1x16x32xf32>
    %956 = vector.shape_cast %955 : vector<1x16x32xf32> to vector<16x32xf32>
    %cst_149 = arith.constant dense<0.000000e+00> : vector<8x32xf32>
    %957 = tpu.matmul %939, %956, %cst_149 {dimension_numbers = #tpu.dot_dimension_numbers<[1], [0], [0], [1], [0, 0, 1, 1], [], []>} : vector<8x16xf32>, vector<16x32xf32>, vector<8x32xf32> -> vector<8x32xf32>
    %958 = arith.addf %954, %957 : vector<8x32xf32>
    %c2_150 = arith.constant 2 : index
    %c0_151 = arith.constant 0 : index
    %c0_152 = arith.constant 0 : index
    %959 = vector.load %arg10[%c2_150, %c0_151, %c0_152] : memref<4x16x32xf32, #tpu.memory_space<vmem>>, vector<1x16x32xf32>
    %960 = vector.shape_cast %959 : vector<1x16x32xf32> to vector<16x32xf32>
    %cst_153 = arith.constant dense<0.000000e+00> : vector<8x32xf32>
    %961 = tpu.matmul %945, %960, %cst_153 {dimension_numbers = #tpu.dot_dimension_numbers<[1], [0], [0], [1], [0, 0, 1, 1], [], []>} : vector<8x16xf32>, vector<16x32xf32>, vector<8x32xf32> -> vector<8x32xf32>
    %962 = arith.addf %958, %961 : vector<8x32xf32>
    %c3_154 = arith.constant 3 : index
    %c0_155 = arith.constant 0 : index
    %c0_156 = arith.constant 0 : index
    %963 = vector.load %arg10[%c3_154, %c0_155, %c0_156] : memref<4x16x32xf32, #tpu.memory_space<vmem>>, vector<1x16x32xf32>
    %964 = vector.shape_cast %963 : vector<1x16x32xf32> to vector<16x32xf32>
    %cst_157 = arith.constant dense<0.000000e+00> : vector<8x32xf32>
    %965 = tpu.matmul %951, %964, %cst_157 {dimension_numbers = #tpu.dot_dimension_numbers<[1], [0], [0], [1], [0, 0, 1, 1], [], []>} : vector<8x16xf32>, vector<16x32xf32>, vector<8x32xf32> -> vector<8x32xf32>
    %966 = arith.addf %962, %965 : vector<8x32xf32>
    %c0_158 = arith.constant 0 : index
    %c0_159 = arith.constant 0 : index
    %967 = vector.load %arg11[%c0_158, %c0_159] : memref<1x32xf32, #tpu.memory_space<vmem>>, vector<1x32xf32>
    %968 = vector.broadcast %967 : vector<1x32xf32> to vector<8x32xf32>
    %969 = arith.addf %966, %968 : vector<8x32xf32>
    %c0_160 = arith.constant 0 : index
    %c0_161 = arith.constant 0 : index
    %970 = vector.load %arg12[%c0_160, %c0_161] : memref<8x32xf32, #tpu.memory_space<vmem>>, vector<8x32xf32>
    tpu.vector_store %arg12[%c0_160, %c0_161], %969 {strides = array<i32>} : memref<8x32xf32, #tpu.memory_space<vmem>>, vector<8x32xf32>,
    return
  }
  func.func @transform_0(%arg0: i32) -> (i32, i32) {
    %c0_i32 = arith.constant 0 : i32
    %c0_i32_0 = arith.constant 0 : i32
    return %arg0, %c0_i32 : i32, i32
  }
  func.func @transform_1(%arg0: i32) -> (i32, i32) {
    %c0_i32 = arith.constant 0 : i32
    %c0_i32_0 = arith.constant 0 : i32
    %c0_i32_1 = arith.constant 0 : i32
    return %c0_i32, %c0_i32_0 : i32, i32
  }
  func.func @transform_2(%arg0: i32) -> (i32, i32) {
    %c0_i32 = arith.constant 0 : i32
    %c0_i32_0 = arith.constant 0 : i32
    %c0_i32_1 = arith.constant 0 : i32
    return %c0_i32, %c0_i32_0 : i32, i32
  }
  func.func @transform_3(%arg0: i32) -> (i32, i32, i32) {
    %c0_i32 = arith.constant 0 : i32
    %c0_i32_0 = arith.constant 0 : i32
    %c0_i32_1 = arith.constant 0 : i32
    %c0_i32_2 = arith.constant 0 : i32
    return %c0_i32, %c0_i32_0, %c0_i32_1 : i32, i32, i32
  }
  func.func @transform_4(%arg0: i32) -> (i32, i32) {
    %c0_i32 = arith.constant 0 : i32
    %c0_i32_0 = arith.constant 0 : i32
    %c0_i32_1 = arith.constant 0 : i32
    return %c0_i32, %c0_i32_0 : i32, i32
  }
  func.func @transform_5(%arg0: i32) -> (i32, i32, i32) {
    %c0_i32 = arith.constant 0 : i32
    %c0_i32_0 = arith.constant 0 : i32
    %c0_i32_1 = arith.constant 0 : i32
    %c0_i32_2 = arith.constant 0 : i32
    return %c0_i32, %c0_i32_0, %c0_i32_1 : i32, i32, i32
  }
  func.func @transform_6(%arg0: i32) -> (i32, i32) {
    %c0_i32 = arith.constant 0 : i32
    %c0_i32_0 = arith.constant 0 : i32
    %c0_i32_1 = arith.constant 0 : i32
    return %c0_i32, %c0_i32_0 : i32, i32
  }
  func.func @transform_7(%arg0: i32) -> (i32, i32, i32) {
    %c0_i32 = arith.constant 0 : i32
    %c0_i32_0 = arith.constant 0 : i32
    %c0_i32_1 = arith.constant 0 : i32
    %c0_i32_2 = arith.constant 0 : i32
    return %c0_i32, %c0_i32_0, %c0_i32_1 : i32, i32, i32
  }
  func.func @transform_8(%arg0: i32) -> (i32, i32) {
    %c0_i32 = arith.constant 0 : i32
    %c0_i32_0 = arith.constant 0 : i32
    %c0_i32_1 = arith.constant 0 : i32
    return %c0_i32, %c0_i32_0 : i32, i32
  }
  func.func @transform_9(%arg0: i32) -> (i32, i32, i32) {
    %c0_i32 = arith.constant 0 : i32
    %c0_i32_0 = arith.constant 0 : i32
    %c0_i32_1 = arith.constant 0 : i32
    %c0_i32_2 = arith.constant 0 : i32
    return %c0_i32, %c0_i32_0, %c0_i32_1 : i32, i32, i32
  }
  func.func @transform_10(%arg0: i32) -> (i32, i32) {
    %c0_i32 = arith.constant 0 : i32
    %c0_i32_0 = arith.constant 0 : i32
    %c0_i32_1 = arith.constant 0 : i32
    return %c0_i32, %c0_i32_0 : i32, i32
  }
  func.func @transform_11(%arg0: i32) -> (i32, i32) {
    %c0_i32 = arith.constant 0 : i32
    %c0_i32_0 = arith.constant 0 : i32
    return %arg0, %c0_i32 : i32, i32
  }
}

</mosaic_0001>

<bundles_post_ra>
// kernel: tpu_custom_call.1
= control target key start
LH: loop header
LB: loop body
LE: loop exit
PB: predicated region body
PF: predicated region fallthrough
CT: control target
= control target key end

     0   :  { %s5121_s0 = inlined_call_operand.hbm [shape: f32[16,16], index: 0, kind: input, shape index: {}]   ;;  %s5122_s1 = inlined_call_operand.hbm [shape: f32[3,4], index: 1, kind: input, shape index: {}]   ;;  %s5123_s2 = inlined_call_operand.hbm [shape: f32[1,4], index: 2, kind: input, shape index: {}]   ;;  %s5124_s3 = inlined_call_operand.hbm [shape: f32[3,4,4], index: 3, kind: input, shape index: {}]   ;;  %s5125_s4 = inlined_call_operand.hbm [shape: f32[1,4], index: 4, kind: input, shape index: {}]   ;;  %s5126_s5 = inlined_call_operand.hbm [shape: f32[3,4,4], index: 5, kind: input, shape index: {}]   ;;  %s5127_s6 = inlined_call_operand.hbm [shape: f32[1,4], index: 6, kind: input, shape index: {}]   ;;  %s5128_s7 = inlined_call_operand.hbm [shape: f32[3,4,4], index: 7, kind: input, shape index: {}]   ;;  %s5129_s8 = inlined_call_operand.hbm [shape: f32[1,4], index: 8, kind: input, shape index: {}]   ;;  %s5130_s9 = inlined_call_operand.hbm [shape: f32[4,16,32], index: 9, kind: input, shape index: {}]   ;;  %s5131_s10 = inlined_call_operand.hbm [shape: f32[1,32], index: 10, kind: input, shape index: {}]   ;;  %s5132_s11 = inlined_call_operand.hbm [shape: f32[16,32], index: 11, kind: output, shape index: {}]  }
   0x1   :  { %5165 = sst [smem:[#allocation39_spill]] %s5121_s0 }
   0x2   :  { %5166 = sst [smem:[#allocation40_spill]] %s5122_s1 }
   0x3   :  { %5167 = sst [smem:[#allocation41_spill]] %s5123_s2 }
   0x4   :  { %5168 = sst [smem:[#allocation42_spill]] %s5124_s3 }
   0x5   :  { %5169 = sst [smem:[#allocation43_spill]] %s5125_s4 }
   0x6   :  { %5170 = sst [smem:[#allocation44_spill]] %s5126_s5 }
   0x7   :  { %5171 = sst [smem:[#allocation45_spill]] %s5127_s6 }
   0x8   :  { %5172 = sst [smem:[#allocation46_spill]] %s5128_s7 }
   0x9   :  { %5173 = sst [smem:[#allocation47_spill]] %s5129_s8 }
   0xa   :  { %5174 = sst [smem:[#allocation48_spill]] %s5130_s9 }
   0xb   :  { %5175 = sst [smem:[#allocation49_spill]] %s5131_s10 }
   0xc   :  { %5176 = sst [smem:[#allocation50_spill]] %s5132_s11 }
   0xd   :  { %16 = vsyncpa [#allocation3], 0 }
   0xe   :  { %18 = vsyncpa [#allocation3 + $0x1], 0 }
   0xf   :  { %19 = vsyncpa [#allocation6], 0 }
  0x10   :  { %20 = vsyncpa [#allocation9], 0 }
  0x11   :  { %21 = vsyncpa [#allocation12], 0 }
  0x12   :  { %22 = vsyncpa [#allocation15], 0 }
  0x13   :  { %23 = vsyncpa [#allocation18], 0 }
  0x14   :  { %24 = vsyncpa [#allocation4], 0 }
  0x15   :  { %26 = vsyncpa [#allocation4 + $0x1], 0  ;;  %s3542_s17 = smov 0   ;;  %s3544_s18 = smov 0  }
  0x16   :  { %s3546_s19 = smov 0   ;;  %s3548_s20 = smov 0  }
  0x17 LB: > { %5177 = sst [smem:[#allocation28_spill]] %s3439_s17  ;;  %s3453_s21 = smov [#allocation5]   ;;  %s3451_s20 = sphi %s3548_s20, %s5241_s20   ;;  %s3447_s19 = sphi %s3546_s19, %s5244_s19   ;;  %s3443_s18 = sphi %s3544_s18, %s5243_s18   ;;  %s3439_s17 = sphi %s3542_s17, %s5242_s17  }
  0x18   : > { %5178 = sst [smem:[#allocation29_spill]] %s3443_s18  ;;  %s312_s22 = sshll.u32 %s3453_s21, 4  ;;  %s313_s22 = int_to_ptr.vmem [resolvable:$true] %s312_s22 }
  0x19   : > { %5179 = sst [smem:[#allocation30_spill]] %s3447_s19  ;;  %s3563_s23 = sadd.s32 4294967295, %s3451_s20  }
  0x1a   : > { %5180 = sst [smem:[#allocation31_spill]] %s3451_s20  ;;  %p2472_p0 = scmp.ge.s32.totalorder %s3451_s20, 1 }
  0x1b   : > { %5181 = sst [smem:[#allocation32_spill]] %s3563_s23  ;;  %p5133_p1 = scmp.eq.s32.totalorder %s3563_s23, 0 }
  0x1c   : > { %p299_p2 = scmp.lt.s32.totalorder %s3451_s20, 3  ;;  %s3454_s25 = smov [#allocation8]  }
  0x1d   : > { %s333_s26 = sshll.u32 %s3454_s25, 4  ;;  %s3455_s28 = smov [#allocation11]   ;;  %s3575_s26 = int_to_ptr.vmem [resolvable:$true] %s333_s26 }
  0x1e   : > { %p3568_p3 = pnand %p2472_p0, %p299_p2  ;;  %s357_s29 = sshll.u32 %s3455_s28, 4  ;;  %s3583_s29 = int_to_ptr.vmem [resolvable:$true] %s357_s29 }
  0x1f   : > { %s5185_s1 = sld [smem:[#allocation40_spill]] }
  0x20   : > { %s5182_s24 = scalar_select %p3568_p3, 1, 0 }
  0x21   : > { %p2920_p5 = pneg %p3568_p3 }
  0x22   : > { %5183 = sst [smem:[#allocation33_spill]] %s5182_s24 }
  0x23   : > { %p3579_p6 = pnand %p2920_p5, %p5133_p1 }
  0x25   : > { %s3055_s13 = scalar_lea.hbm %s5185_s1, 64  ;;  %p3593_p8 = pneg %p3579_p6 }
  0x26   : > { %p3056_p7 = scmp.ne.s32.totalorder %s5185_s1, %s3055_s13  ;;  %p3062_p11 = scmp.lt.u32.totalorder %s3055_s13, %s5185_s1 }
  0x28   : > { %p3058_p9 = pnand %p3593_p8, %p3056_p7 }
  0x2a   : > { %p3059_p10 = pneg %p3058_p9 }
  0x2c   : > { %p3064_p12 = pnand %p3062_p11, %p3059_p10 }
  0x2e   : > { %3067 = shalt.err (!%p3064_p12)
}
  0x2f   : > { %s3068_s28 = scalar_lea.vmem %s313_s22, 64  ;;  %p3076_p5 = scmp.lt.s32.totalorder %s313_s22, %s313_s22 }
  0x30   : > { %p3069_p13 = scmp.ne.s32.totalorder %s313_s22, %s3068_s28  ;;  %p3077_p4 = scmp.lt.s32.totalorder %s3068_s28, %s3068_s28 }
  0x32   : > { %p3071_p0 = pnand %p3069_p13, %p3593_p8  ;;  %p3078_p1 = por %p3077_p4, %p3076_p5 }
  0x34   : > { %p3072_p2 = pneg %p3071_p0 }
  0x36   : > { %p3079_p3 = pnand %p3078_p1, %p3072_p2 }
  0x38   : > { %3082 = shalt.err (!%p3079_p3)
}
  0x39   : > { %2923 = dma.hbm_to_vmem [thread:$0]  (!%p3579_p6), %s5185_s1, 64, %s313_s22, [#allocation6]  }
  0x3a   : > { %s5187_s3 = sld [smem:[#allocation42_spill]] }
  0x40   : > { %s3083_s15 = scalar_lea.hbm %s5187_s3, 192 }
  0x41   : > { %p3084_p7 = scmp.ne.s32.totalorder %s5187_s3, %s3083_s15  ;;  %p3090_p1 = scmp.lt.u32.totalorder %s3083_s15, %s5187_s3 }
  0x43   : > { %p3086_p9 = pnand %p3084_p7, %p3593_p8 }
  0x45   : > { %p3087_p4 = pneg %p3086_p9 }
  0x47   : > { %p3092_p3 = pnand %p3090_p1, %p3087_p4 }
  0x49   : > { %3095 = shalt.err (!%p3092_p3)
}
  0x4a   : > { %s3096_s22 = scalar_lea.vmem %s3575_s26, 192  ;;  %p3104_p13 = scmp.lt.s32.totalorder %s3575_s26, %s3575_s26 }
  0x4b   : > { %p3097_p10 = scmp.ne.s32.totalorder %s3575_s26, %s3096_s22  ;;  %p3105_p0 = scmp.lt.s32.totalorder %s3096_s22, %s3096_s22 }
  0x4d   : > { %p3099_p11 = pnand %p3097_p10, %p3593_p8  ;;  %p3106_p2 = por %p3105_p0, %p3104_p13 }
  0x4f   : > { %p3100_p12 = pneg %p3099_p11 }
  0x51   : > { %p3107_p5 = pnand %p3106_p2, %p3100_p12 }
  0x53   : > { %3110 = shalt.err (!%p3107_p5)
}
  0x54   : > { %s3456_s30 = smov 64   ;;  %s3457_s11 = smov 4  }
  0x55   : > { %2929 = dma.hbm_to_vmem [thread:$0]  (!%p3579_p6), %s5187_s3, 192, %s3575_s26, [#allocation9], %s3456_s30, %s3456_s30, %s3457_s11  }
  0x56   : > { %s5188_s5 = sld [smem:[#allocation44_spill]] }
  0x5c   : > { %s3111_s21 = scalar_lea.hbm %s5188_s5, 192 }
  0x5d   : > { %p3112_p7 = scmp.ne.s32.totalorder %s5188_s5, %s3111_s21  ;;  %p3118_p1 = scmp.lt.u32.totalorder %s3111_s21, %s5188_s5 }
  0x5f   : > { %p3114_p9 = pnand %p3112_p7, %p3593_p8 }
  0x61   : > { %p3115_p4 = pneg %p3114_p9 }
  0x63   : > { %p3120_p3 = pnand %p3118_p1, %p3115_p4 }
  0x65   : > { %3123 = shalt.err (!%p3120_p3)
}
  0x66   : > { %s3124_s26 = scalar_lea.vmem %s3583_s29, 192  ;;  %p3132_p13 = scmp.lt.s32.totalorder %s3583_s29, %s3583_s29 }
  0x67   : > { %p3125_p10 = scmp.ne.s32.totalorder %s3583_s29, %s3124_s26  ;;  %p3133_p0 = scmp.lt.s32.totalorder %s3124_s26, %s3124_s26 }
  0x69   : > { %p3127_p11 = pnand %p3125_p10, %p3593_p8  ;;  %p3134_p2 = por %p3133_p0, %p3132_p13 }
  0x6b   : > { %p3128_p12 = pneg %p3127_p11 }
  0x6d   : > { %p3135_p5 = pnand %p3134_p2, %p3128_p12 }
  0x6f   : > { %3138 = shalt.err (!%p3135_p5)
}
  0x70   : > { %2935 = dma.hbm_to_vmem [thread:$0]  (!%p3579_p6), %s5188_s5, 192, %s3583_s29, [#allocation12], %s3456_s30, %s3456_s30, %s3457_s11  }
  0x71   : > { %s3458_s13 = smov [#allocation14]   ;;  %s3459_s15 = smov [#allocation17]  }
  0x72   : > { %s381_s14 = sshll.u32 %s3458_s13, 4  ;;  %s405_s21 = sshll.u32 %s3459_s15, 4  ;;  %s382_s14 = int_to_ptr.vmem [resolvable:$true] %s381_s14  ;;  %s406_s21 = int_to_ptr.vmem [resolvable:$true] %s405_s21 }
  0x73   : > { %s5189_s7 = sld [smem:[#allocation46_spill]] }
  0x79   : > { %s3139_s22 = scalar_lea.hbm %s5189_s7, 192 }
  0x7a   : > { %p3140_p7 = scmp.ne.s32.totalorder %s5189_s7, %s3139_s22  ;;  %p3146_p1 = scmp.lt.u32.totalorder %s3139_s22, %s5189_s7 }
  0x7c   : > { %p3142_p9 = pnand %p3140_p7, %p3593_p8 }
  0x7e   : > { %p3143_p4 = pneg %p3142_p9 }
  0x80   : > { %p3148_p3 = pnand %p3146_p1, %p3143_p4 }
  0x82   : > { %3151 = shalt.err (!%p3148_p3)
}
  0x83   : > { %s3152_s29 = scalar_lea.vmem %s382_s14, 192  ;;  %p3160_p13 = scmp.lt.s32.totalorder %s382_s14, %s382_s14 }
  0x84   : > { %p3153_p10 = scmp.ne.s32.totalorder %s382_s14, %s3152_s29  ;;  %p3161_p0 = scmp.lt.s32.totalorder %s3152_s29, %s3152_s29 }
  0x86   : > { %p3155_p11 = pnand %p3153_p10, %p3593_p8  ;;  %p3162_p2 = por %p3161_p0, %p3160_p13 }
  0x88   : > { %p3156_p12 = pneg %p3155_p11 }
  0x8a   : > { %p3163_p5 = pnand %p3162_p2, %p3156_p12 }
  0x8c   : > { %3166 = shalt.err (!%p3163_p5)
}
  0x8d   : > { %2941 = dma.hbm_to_vmem [thread:$0]  (!%p3579_p6), %s5189_s7, 192, %s382_s14, [#allocation15], %s3456_s30, %s3456_s30, %s3457_s11  }
  0x8e   : > { %s5190_s9 = sld [smem:[#allocation48_spill]] }
  0x94   : > { %s3167_s15 = scalar_lea.hbm %s5190_s9, 1024 }
  0x95   : > { %p3168_p7 = scmp.ne.s32.totalorder %s5190_s9, %s3167_s15  ;;  %p3174_p1 = scmp.lt.u32.totalorder %s3167_s15, %s5190_s9 }
  0x97   : > { %p3170_p9 = pnand %p3168_p7, %p3593_p8 }
  0x99   : > { %p3171_p4 = pneg %p3170_p9 }
  0x9b   : > { %p3176_p3 = pnand %p3174_p1, %p3171_p4 }
  0x9d   : > { %3179 = shalt.err (!%p3176_p3)
}
  0x9e   : > { %s3180_s1 = scalar_lea.vmem %s406_s21, 1024  ;;  %p3188_p13 = scmp.lt.s32.totalorder %s406_s21, %s406_s21 }
  0x9f   : > { %p3181_p10 = scmp.ne.s32.totalorder %s406_s21, %s3180_s1  ;;  %p3189_p0 = scmp.lt.s32.totalorder %s3180_s1, %s3180_s1 }
  0xa1   : > { %p3183_p11 = pnand %p3181_p10, %p3593_p8  ;;  %p3190_p2 = por %p3189_p0, %p3188_p13 }
  0xa3   : > { %p3184_p12 = pneg %p3183_p11 }
  0xa5   : > { %p3191_p5 = pnand %p3190_p2, %p3184_p12 }
  0xa7   : > { %3194 = shalt.err (!%p3191_p5)
}
  0xa8   : > { %s3460_s30 = smov 128   ;;  %s3461_s11 = smov 8  }
  0xa9   : > { %2947 = dma.hbm_to_vmem [thread:$0]  (!%p3579_p6), %s5190_s9, 1024, %s406_s21, [#allocation18], %s3460_s30, %s3460_s30, %s3461_s11  }
  0xaa   : > { %s3462_s3 = smov [#allocation7]   ;;  %s3463_s12 = smov [#allocation10]  }
  0xab   : > { %s323_s24 = sshll.u32 %s3462_s3, 4  ;;  %s347_s13 = sshll.u32 %s3463_s12, 4  ;;  %s324_s24 = int_to_ptr.vmem [resolvable:$true] %s323_s24  ;;  %s348_s13 = int_to_ptr.vmem [resolvable:$true] %s347_s13 }
  0xac   : > { %s5191_s2 = sld [smem:[#allocation41_spill]] }
  0xb2   : > { %s3195_s28 = scalar_lea.hbm %s5191_s2, 16 }
  0xb3   : > { %p3196_p7 = scmp.ne.s32.totalorder %s5191_s2, %s3195_s28  ;;  %p3202_p1 = scmp.lt.u32.totalorder %s3195_s28, %s5191_s2 }
  0xb5   : > { %p3198_p9 = pnand %p3196_p7, %p3593_p8 }
  0xb7   : > { %p3199_p4 = pneg %p3198_p9 }
  0xb9   : > { %p3204_p3 = pnand %p3202_p1, %p3199_p4 }
  0xbb   : > { %3207 = shalt.err (!%p3204_p3)
}
  0xbc   : > { %s3208_s21 = scalar_lea.vmem %s324_s24, 16  ;;  %s3215_s30 = scalar_lea.vmem %s324_s24, 32 }
  0xbd   : > { %p3209_p10 = scmp.ne.s32.totalorder %s324_s24, %s3208_s21  ;;  %p3216_p13 = scmp.lt.s32.totalorder %s324_s24, %s324_s24 }
  0xbe   : > { %p3217_p0 = scmp.lt.s32.totalorder %s3215_s30, %s3208_s21 }
  0xbf   : > { %p3211_p11 = pnand %p3209_p10, %p3593_p8 }
  0xc0   : > { %p3218_p2 = por %p3217_p0, %p3216_p13 }
  0xc1   : > { %p3212_p12 = pneg %p3211_p11 }
  0xc3   : > { %p3219_p5 = pnand %p3218_p2, %p3212_p12 }
  0xc5   : > { %3222 = shalt.err (!%p3219_p5)
}
  0xc6   : > { %2926 = dma.hbm_to_vmem [thread:$0]  (!%p3579_p6), %s5191_s2, 16, %s324_s24, [#allocation6]  }
  0xc7   : > { %s5192_s4 = sld [smem:[#allocation43_spill]] }
  0xcd   : > { %s3223_s3 = scalar_lea.hbm %s5192_s4, 16 }
  0xce   : > { %p3224_p7 = scmp.ne.s32.totalorder %s5192_s4, %s3223_s3  ;;  %p3230_p1 = scmp.lt.u32.totalorder %s3223_s3, %s5192_s4 }
  0xd0   : > { %p3226_p9 = pnand %p3224_p7, %p3593_p8 }
  0xd2   : > { %p3227_p4 = pneg %p3226_p9 }
  0xd4   : > { %p3232_p3 = pnand %p3230_p1, %p3227_p4 }
  0xd6   : > { %3235 = shalt.err (!%p3232_p3)
}
  0xd7   : > { %s3236_s22 = scalar_lea.vmem %s348_s13, 16  ;;  %s3243_s24 = scalar_lea.vmem %s348_s13, 32 }
  0xd8   : > { %p3237_p10 = scmp.ne.s32.totalorder %s348_s13, %s3236_s22  ;;  %p3244_p13 = scmp.lt.s32.totalorder %s348_s13, %s348_s13 }
  0xd9   : > { %p3245_p0 = scmp.lt.s32.totalorder %s3243_s24, %s3236_s22 }
  0xda   : > { %p3239_p11 = pnand %p3237_p10, %p3593_p8 }
  0xdb   : > { %p3246_p2 = por %p3245_p0, %p3244_p13 }
  0xdc   : > { %p3240_p12 = pneg %p3239_p11 }
  0xde   : > { %p3247_p5 = pnand %p3246_p2, %p3240_p12 }
  0xe0   : > { %3250 = shalt.err (!%p3247_p5)
}
  0xe1   : > { %2932 = dma.hbm_to_vmem [thread:$0]  (!%p3579_p6), %s5192_s4, 16, %s348_s13, [#allocation9]  }
  0xe2   : > { %s3464_s21 = smov [#allocation13]   ;;  %s3465_s11 = smov [#allocation16]  }
  0xe3   : > { %s371_s30 = sshll.u32 %s3464_s21, 4  ;;  %s395_s14 = sshll.u32 %s3465_s11, 4  ;;  %s372_s30 = int_to_ptr.vmem [resolvable:$true] %s371_s30  ;;  %s396_s14 = int_to_ptr.vmem [resolvable:$true] %s395_s14 }
  0xe4   : > { %s5193_s6 = sld [smem:[#allocation45_spill]] }
  0xea   : > { %s3251_s3 = scalar_lea.hbm %s5193_s6, 16 }
  0xeb   : > { %p3252_p7 = scmp.ne.s32.totalorder %s5193_s6, %s3251_s3  ;;  %p3258_p1 = scmp.lt.u32.totalorder %s3251_s3, %s5193_s6 }
  0xed   : > { %p3254_p9 = pnand %p3252_p7, %p3593_p8 }
  0xef   : > { %p3255_p4 = pneg %p3254_p9 }
  0xf1   : > { %p3260_p3 = pnand %p3258_p1, %p3255_p4 }
  0xf3   : > { %3263 = shalt.err (!%p3260_p3)
}
  0xf4   : > { %s3264_s13 = scalar_lea.vmem %s372_s30, 16  ;;  %s3271_s22 = scalar_lea.vmem %s372_s30, 32 }
  0xf5   : > { %p3265_p10 = scmp.ne.s32.totalorder %s372_s30, %s3264_s13  ;;  %p3272_p13 = scmp.lt.s32.totalorder %s372_s30, %s372_s30 }
  0xf6   : > { %p3273_p0 = scmp.lt.s32.totalorder %s3271_s22, %s3264_s13 }
  0xf7   : > { %p3267_p11 = pnand %p3265_p10, %p3593_p8 }
  0xf8   : > { %p3274_p2 = por %p3273_p0, %p3272_p13 }
  0xf9   : > { %p3268_p12 = pneg %p3267_p11 }
  0xfb   : > { %p3275_p5 = pnand %p3274_p2, %p3268_p12 }
  0xfd   : > { %3278 = shalt.err (!%p3275_p5)
}
  0xfe   : > { %2938 = dma.hbm_to_vmem [thread:$0]  (!%p3579_p6), %s5193_s6, 16, %s372_s30, [#allocation12]  }
  0xff   : > { %s5194_s8 = sld [smem:[#allocation47_spill]] }
 0x105   : > { %s3279_s11 = scalar_lea.hbm %s5194_s8, 16 }
 0x106   : > { %p3280_p7 = scmp.ne.s32.totalorder %s5194_s8, %s3279_s11  ;;  %p3286_p1 = scmp.lt.u32.totalorder %s3279_s11, %s5194_s8 }
 0x108   : > { %p3282_p9 = pnand %p3280_p7, %p3593_p8 }
 0x10a   : > { %p3283_p4 = pneg %p3282_p9 }
 0x10c   : > { %p3288_p3 = pnand %p3286_p1, %p3283_p4 }
 0x10e   : > { %3291 = shalt.err (!%p3288_p3)
}
 0x10f   : > { %s3292_s15 = scalar_lea.vmem %s396_s14, 16  ;;  %s3299_s30 = scalar_lea.vmem %s396_s14, 32 }
 0x110   : > { %p3293_p10 = scmp.ne.s32.totalorder %s396_s14, %s3292_s15  ;;  %p3300_p13 = scmp.lt.s32.totalorder %s396_s14, %s396_s14 }
 0x111   : > { %p3301_p0 = scmp.lt.s32.totalorder %s3299_s30, %s3292_s15 }
 0x112   : > { %p3295_p11 = pnand %p3293_p10, %p3593_p8 }
 0x113   : > { %p3302_p2 = por %p3301_p0, %p3300_p13 }
 0x114   : > { %p3296_p12 = pneg %p3295_p11 }
 0x116   : > { %p3303_p5 = pnand %p3302_p2, %p3296_p12 }
 0x118   : > { %3306 = shalt.err (!%p3303_p5)
}
 0x119   : > { %2944 = dma.hbm_to_vmem [thread:$0]  (!%p3579_p6), %s5194_s8, 16, %s396_s14, [#allocation15]  }
 0x11a   : > { %s3466_s13 = smov [#allocation19]   ;;  %s5195_s10 = sld [smem:[#allocation49_spill]] }
 0x11b   : > { %s419_s22 = sshll.u32 %s3466_s13, 4  ;;  %s420_s22 = int_to_ptr.vmem [resolvable:$true] %s419_s22 }
 0x120   : > { %s3307_s1 = scalar_lea.hbm %s5195_s10, 16 }
 0x121   : > { %p3308_p7 = scmp.ne.s32.totalorder %s5195_s10, %s3307_s1  ;;  %p3314_p1 = scmp.lt.u32.totalorder %s3307_s1, %s5195_s10 }
 0x123   : > { %p3310_p9 = pnand %p3308_p7, %p3593_p8 }
 0x125   : > { %p3311_p4 = pneg %p3310_p9 }
 0x127   : > { %p3316_p3 = pnand %p3314_p1, %p3311_p4 }
 0x129   : > { %3319 = shalt.err (!%p3316_p3)
}
 0x12a   : > { %s3320_s14 = scalar_lea.vmem %s420_s22, 16  ;;  %s3327_s3 = scalar_lea.vmem %s420_s22, 32 }
 0x12b   : > { %p3321_p10 = scmp.ne.s32.totalorder %s420_s22, %s3320_s14  ;;  %p3328_p13 = scmp.lt.s32.totalorder %s420_s22, %s420_s22 }
 0x12c   : > { %p3329_p0 = scmp.lt.s32.totalorder %s3327_s3, %s3320_s14 }
 0x12d   : > { %p3323_p11 = pnand %p3321_p10, %p3593_p8 }
 0x12e   : > { %p3330_p2 = por %p3329_p0, %p3328_p13 }
 0x12f   : > { %p3324_p12 = pneg %p3323_p11 }
 0x131   : > { %p3331_p5 = pnand %p3330_p2, %p3324_p12 }
 0x133   : > { %3334 = shalt.err (!%p3331_p5)
}
 0x134   : > { %2950 = dma.hbm_to_vmem [thread:$0]  (!%p3579_p6), %s5195_s10, 16, %s420_s22, [#allocation18]  }
 0x135   : > { %s2471_s16 = sadd.s32 4294967294, %s3451_s20   ;;  %s3792_s27 = sadd.s32 1, %s3451_s20  }
 0x136   : > { %5196 = sst [smem:[#allocation34_spill]] %s3792_s27  ;;  %s36_s30 = ssub.s32 %s3451_s20, %s3792_s27 }
 0x137   : > { %s39_s25 = sadd.s32 1, %s3447_s19  ;;  %p37_p8 = scmp.eq.s32.totalorder %s36_s30, 0 }
 0x138   : > { %p46_p7 = scmp.ne.s32.totalorder %s3447_s19, %s3443_s18  ;;  %p47_p9 = scmp.eq.s32.totalorder %s3451_s20, 0 }
 0x139   : > { %p52_p4 = scmp.ne.s32.totalorder %s3443_s18, %s3439_s17  ;;  %p5199_p3 = scmp.eq.s32.totalorder %s3563_s23, 0 }
 0x13a   : > { %s3803_s28 = scalar_select %p37_p8, %s3447_s19, %s39_s25  }
 0x13b   : > { %p3805_p1 = por %p47_p9, %p46_p7  ;;  %p3811_p6 = por %p5199_p3, %p52_p4 }
 0x13c   : > { %5197 = sst [smem:[#allocation35_spill]] %s3803_s28  ;;  %p286_p10 = scmp.eq.s32.totalorder %s3563_s23, 1 }
 0x13d   : > { %p292_p11 = scmp.eq.s32.totalorder %s2471_s16, 1  ;;  %p2969_p12 = scmp.lt.s32.totalorder %s3451_s20, 2 }
 0x13e   : > { %s430_s24 = sand.u32 1, %s3447_s19   ;;  %p3818_p13 = por %p286_p10, %p46_p7 }
 0x13f   : > { %p3822_p0 = por %p292_p11, %p52_p4  ;;  %s2484_s21 = sshll.u32 %s430_s24, 3 }
 0x140   : > { %s5201_s26 = scalar_select %p3818_p13, 1, 0 }
 0x141   : > { %s5203_s1 = scalar_select %p3822_p0, 1, 0 }
 0x142   : > { %5202 = sst [smem:[#allocation36_spill]] %s5201_s26  ;;  %s2485_s11 = sshll.u32 %s3451_s20, 7 }
 0x143   : > { %5204 = sst [smem:[#allocation37_spill]] %s5203_s1  ;;  %s5205_s0 = sld [smem:[#allocation39_spill]] }
 0x144   : > { %s434_s3 = scalar_lea.vmem [#allocation2], %s2484_s21  ;;  %p3836_p2 = pnand %p2969_p12, %p3805_p1 }
 0x145   : > { %s441_s12 = sshll.u32 %s434_s3, 4  ;;  %s431_s16 = scalar_lea.sflag [#allocation3], %s430_s24  ;;  %s3832_s12 = int_to_ptr.vmem [resolvable:$true] %s441_s12 }
 0x146   : > { %p3337_p8 = pneg %p3836_p2 }
 0x149   : > { %s3830_s14 = scalar_lea.hbm %s5205_s0, %s2485_s11  ;;  %s3340_s11 = scalar_lea.hbm %s5205_s0, 256 }
 0x14a   : > { %s3335_s30 = scalar_lea.hbm %s3830_s14, 128  ;;  %p3341_p4 = scmp.lt.u32.totalorder %s3830_s14, %s5205_s0 }
 0x14b   : > { %p3336_p5 = scmp.ne.s32.totalorder %s3830_s14, %s3335_s30  ;;  %p3342_p1 = scmp.lt.u32.totalorder %s3340_s11, %s3335_s30 }
 0x14c   : > { %p3344_p10 = scmp.lt.u32.totalorder %s3335_s30, %s3830_s14 }
 0x14d   : > { %p3338_p7 = pnand %p3337_p8, %p3336_p5  ;;  %p3343_p3 = por %p3342_p1, %p3341_p4 }
 0x14f   : > { %p3339_p9 = pneg %p3338_p7  ;;  %p3345_p11 = por %p3344_p10, %p3343_p3 }
 0x151   : > { %p3346_p12 = pnand %p3345_p11, %p3339_p9 }
 0x153   : > { %3349 = shalt.err (!%p3346_p12)
}
 0x154   : > { %s3350_s24 = scalar_lea.vmem %s3832_s12, 128  ;;  %s3467_s29 = smov [#allocation2]  }
 0x155   : > { %p3351_p5 = scmp.ne.s32.totalorder %s3832_s12, %s3350_s24  ;;  %s3355_s3 = sshll.u32 %s3467_s29, 4  ;;  %s3356_s3 = int_to_ptr.vmem [resolvable:$false] %s3355_s3 }
 0x156   : > { %s3357_s25 = scalar_lea.vmem %s3356_s3, 256  ;;  %p3358_p13 = scmp.lt.s32.totalorder %s3832_s12, %s3356_s3 }
 0x157   : > { %p3353_p7 = pnand %p3351_p5, %p3337_p8  ;;  %p3359_p4 = scmp.lt.s32.totalorder %s3357_s25, %s3350_s24 }
 0x159   : > { %p3354_p0 = pneg %p3353_p7  ;;  %p3360_p1 = por %p3359_p4, %p3358_p13 }
 0x15b   : > { %p3361_p3 = pnand %p3360_p1, %p3354_p0 }
 0x15d   : > { %3364 = shalt.err (!%p3361_p3)
}
 0x15e   : > { %2954 = dma.hbm_to_vmem [thread:$0]  (!%p3836_p2), %s3830_s14, 128, %s3832_s12, %s431_s16  }
 0x15f   : > { %s5207_s30 = sld [smem:[#allocation33_spill]] }
 0x165   : > { %p5208_p9 = scmp.ne.s32.totalorder %s5207_s30, 0 }
 0x167   : > { %450 = sbr.rel (%p5208_p9) target bundleno = 1291 (0x50b), region = 64 }
 0x16e   : > { %s3868_s21 = sand.u32 1, %s3443_s18  }
 0x16f   : > { %5209 = sst [smem:[#allocation38_spill]] %s3868_s21  ;;  %s5138_s11 = sshll.u32 %s3868_s21, 3 }
 0x170   : > { %s453_s13 = scalar_lea.sflag [#allocation3], %s3868_s21  ;;  %s3874_s5 = scalar_lea.vmem [#allocation2], %s5138_s11 }
 0x171   : > { %3410 = dma.done.wait (%p3811_p6), %s453_s13, 128  }
 0x172   : > { %3412 = vsyncadd (%p3811_p6), %s453_s13, 4294967168  ;;  %p5210_p13 = scmp.eq.s32.totalorder %s3563_s23, 0 }
 0x174   : > { %3414 = dma.done.wait (%p5210_p13), [#allocation6], 80   ;;  %p5211_p0 = pmov %p5210_p13 }
 0x176   : > { %3416 = vsyncadd (%p5211_p0), [#allocation6], 4294967216  ;;  %p5212_p2 = pmov %p5211_p0 }
 0x177   : > { %p5213_p8 = pmov %p5211_p0 }
 0x178   : > { %3418 = dma.done.wait (%p5212_p2), [#allocation9], 208  }
 0x179   : > { %3420 = vsyncadd (%p5213_p8), [#allocation9], 4294967088  ;;  %p5214_p10 = pmov %p5211_p0 }
 0x17a   : > { %p5215_p11 = pmov %p5211_p0 }
 0x17b   : > { %3422 = dma.done.wait (%p5214_p10), [#allocation12], 208  }
 0x17c   : > { %3424 = vsyncadd (%p5215_p11), [#allocation12], 4294967088  ;;  %p5216_p6 = pmov %p5211_p0 }
 0x17d   : > { %p5217_p12 = pmov %p5211_p0 }
 0x17e   : > { %3426 = dma.done.wait (%p5216_p6), [#allocation15], 208  }
 0x17f   : > { %3428 = vsyncadd (%p5217_p12), [#allocation15], 4294967088  ;;  %p5218_p5 = pmov %p5211_p0 }
 0x180   : > { %p5219_p7 = pmov %p5211_p0 }
 0x181   : > { %3430 = dma.done.wait (%p5218_p5), [#allocation18], 1040  }
 0x182   : > { %3432 = vsyncadd (%p5219_p7), [#allocation18], 4294966256  ;;  %v3468_v0 = vmov 0   ;;  %v3469_v1 = vmov 1   ;;  %v569_v2 = vld [vmem:[#allocation5] sm:$0x1]  ;;  %v535_v44 = vlaneseq }
 0x183   : > { %3040 = vset.pattern.permute.xlu1 %v3468_v0  ;;  %3041 = vset.pattern.permute.xlu0 %v3469_v1  ;;  %s5139_s22 = smov 125   ;;  %s5147_s14 = smov 127   ;;  %2564 = vpush %v569_v2  ;;  %v3904_v3 = vld [vmem:[#allocation5 + $0x1] sm:$0x1]  ;;  %v3913_v4 = vld [vmem:[#allocation5 + $0x2] sm:$0x1] }
 0x184   : > { %590 = vrot.lane.b32.xlu1 %v569_v2, %s5139_s22  ;;  %576 = vrot.lane.b32.xlu0 %v569_v2, %s5147_s14  ;;  %s5149_s12 = smov 126   ;;  %v3920_v5 = vld [vmem:[%s3874_s5] sm:$0xff]  ;;  %s5143_s15 = smov 113   ;;  %v2499_v6 = vld [vmem:[#allocation7] ss:$0 sm:$0xff]  ;;  %v3475_v7 = vmov 3  }
 0x185   : > { %s5145_s16 = smov 1   ;;  %v3931_v8 = vld [vmem:[#allocation8] sm:$0xf]  ;;  %v3476_v9 = vmov 2   ;;  %s5141_s24 = smov 15   ;;  %v536_v47 = vand.u32 127, %v535_v44 }
 0x186   : > { %v3937_v10 = vrot.slane %v3931_v8, 1  ;;  %v3942_v11 = vrot.slane %v3931_v8, 3  ;;  %v3947_v12 = vrot.slane %v3931_v8, 2  ;;  %v3964_v13 = vld [vmem:[#allocation8 + $0x4] sm:$0xf]  ;;  %vm553_vm2 = vcmask 7168  }
 0x187   : > { %v3971_v14 = vrot.slane %v3964_v13, 1  ;;  %v3978_v15 = vrot.slane %v3964_v13, 3  ;;  %v3983_v16 = vrot.slane %v3964_v13, 2  ;;  %v3999_v17 = vld [vmem:[#allocation8 + $0x8] sm:$0xf]  ;;  %v537_v50 = vadd.s32 4294967295, %v536_v47 }
 0x188   : > { %604 = vrot.lane.b32.xlu1 %v3904_v3, %s5147_s14  ;;  %583 = vrot.lane.b32.xlu0 %v569_v2, %s5149_s12  ;;  %v4006_v18 = vrot.slane %v3999_v17, 1  ;;  %v4013_v19 = vrot.slane %v3999_v17, 3  ;;  %v4018_v20 = vrot.slane %v3999_v17, 2  ;;  %v2500_v21 = vld [vmem:[#allocation10] ss:$0 sm:$0xff]  ;;  %v4120_v56 = vadd.s32 1, %v536_v47 }
 0x189   : > { %v4041_v22 = vld [vmem:[#allocation11] sm:$0xf]  ;;  %v4078_v35 = vld [vmem:[#allocation11 + $0x4] sm:$0xf]  ;;  %vm538_vm0 = vcmp.ge.s32.totalorder %v537_v50, 0  ;;  %vm539_vm1 = vcmp.lt.s32.totalorder %v537_v50, 16 }
 0x18a   : > { %v4044_v23 = vrot.slane %v4041_v22, 1  ;;  %v4050_v26 = vrot.slane %v4041_v22, 3  ;;  %v4055_v27 = vrot.slane %v4041_v22, 2  ;;  %v4084_v36 = vrot.slane %v4078_v35, 1  ;;  %vm4115_vm3 = vmand %vm538_vm0, %vm539_vm1 }
 0x18b   : > { %v4092_v37 = vrot.slane %v4078_v35, 3  ;;  %v4097_v39 = vrot.slane %v4078_v35, 2  ;;  %vm564_vm4 = vcmask 121856   ;;  %vm543_vm5 = vcmp.lt.s32.totalorder %v4120_v56, 16 }
 0x18c   : > { %618 = vrot.lane.b32.xlu1 %v3904_v3, %s5139_s22  ;;  %611 = vrot.lane.b32.xlu0 %v3904_v3, %s5149_s12  ;;  %vm3479_vm6 = vmmov 0   ;;  %vm1981_vm7 = vcmask 130048   ;;  %vm2290_vm8 = vcmask 261120  }
 0x190   : > { %639 = vrot.lane.b32.xlu1 %v3913_v4, %s5149_s12  ;;  %632 = vrot.lane.b32.xlu0 %v3913_v4, %s5147_s14 }
 0x194   : > { %646 = vrot.lane.b32.xlu0 %v3913_v4, %s5139_s22  ;;  %547 = vrot.lane.b32.xlu1 %v3920_v5, %s5143_s15 }
 0x198   : > { %550 = vrot.lane.b32.xlu0 %v3920_v5, %s5145_s16  ;;  %660 = vperm.xlu1 %3040, %v2499_v6  }
 0x19c   : > { %666 = vperm.xlu0 %3041, %v2499_v6   ;;  %558 = vrot.lane.b32.xlu1 %v3920_v5, %s5147_s14 }
 0x19d   : > { %3043 = vset.pattern.permute.xlu1 %v3475_v7 }
 0x1a0   : > { %3042 = vset.pattern.permute.xlu0 %v3476_v9  ;;  %561 = vrot.lane.b32.xlu1 %v3920_v5, %s5141_s24 }
 0x1a1   : > { %672 = vperm.xlu0 %3042, %v2499_v6  }
 0x1a4   : > { %678 = vperm.xlu1 %3043, %v2499_v6  }
 0x1a5   : > { %733 = vrot.lane.b32.xlu0 %v3937_v10, %s5147_s14 }
 0x1a8   : > { %726 = vrot.lane.b32.xlu1 %v3931_v8, %s5147_s14 }
 0x1a9   : > { %747 = vrot.lane.b32.xlu0 %v3942_v11, %s5147_s14  ;;  %3044 = vset.pattern.permute.xlu1 %v3468_v0 }
 0x1ac   : > { %740 = vrot.lane.b32.xlu1 %v3947_v12, %s5147_s14 }
 0x1ad   : > { %770 = vrot.lane.b32.xlu0 %v3937_v10, %s5149_s12 }
 0x1b0   : > { %763 = vrot.lane.b32.xlu1 %v3931_v8, %s5149_s12 }
 0x1b1   : > { %784 = vrot.lane.b32.xlu0 %v3942_v11, %s5149_s12 }
 0x1b4   : > { %777 = vrot.lane.b32.xlu1 %v3947_v12, %s5149_s12  ;;  %s2565_s29 = spop %2564 }
 0x1b5   : > { %807 = vrot.lane.b32.xlu0 %v3937_v10, %s5139_s22  ;;  %v572_v59 = vstv %s2565_s29 }
 0x1b8   : > { %800 = vrot.lane.b32.xlu1 %v3931_v8, %s5139_s22 }
 0x1b9   : > { %821 = vrot.lane.b32.xlu0 %v3942_v11, %s5139_s22 }
 0x1bc   : > { %814 = vrot.lane.b32.xlu1 %v3947_v12, %s5139_s22 }
 0x1bd   : > { %861 = vrot.lane.b32.xlu0 %v3971_v14, %s5147_s14 }
 0x1c0   : > { %854 = vrot.lane.b32.xlu1 %v3964_v13, %s5147_s14 }
 0x1c1   : > { %875 = vrot.lane.b32.xlu0 %v3978_v15, %s5147_s14 }
 0x1c4   : > { %868 = vrot.lane.b32.xlu1 %v3983_v16, %s5147_s14 }
 0x1c5   : > { %889 = vrot.lane.b32.xlu0 %v3971_v14, %s5149_s12 }
 0x1c8   : > { %882 = vrot.lane.b32.xlu1 %v3964_v13, %s5149_s12 }
 0x1c9   : > { %903 = vrot.lane.b32.xlu0 %v3978_v15, %s5149_s12 }
 0x1cc   : > { %896 = vrot.lane.b32.xlu1 %v3983_v16, %s5149_s12 }
 0x1cd   : > { %917 = vrot.lane.b32.xlu0 %v3971_v14, %s5139_s22 }
 0x1d0   : > { %910 = vrot.lane.b32.xlu1 %v3964_v13, %s5139_s22 }
 0x1d1   : > { %931 = vrot.lane.b32.xlu0 %v3978_v15, %s5139_s22 }
 0x1d4   : > { %924 = vrot.lane.b32.xlu1 %v3983_v16, %s5139_s22 }
 0x1d5   : > { %987 = vrot.lane.b32.xlu0 %v4006_v18, %s5147_s14 }
 0x1d8   : > { %980 = vrot.lane.b32.xlu1 %v3999_v17, %s5147_s14 }
 0x1d9   : > { %1001 = vrot.lane.b32.xlu0 %v4013_v19, %s5147_s14 }
 0x1dc   : > { %994 = vrot.lane.b32.xlu1 %v4018_v20, %s5147_s14 }
 0x1dd   : > { %1023 = vrot.lane.b32.xlu0 %v4006_v18, %s5149_s12 }
 0x1e0   : > { %1016 = vrot.lane.b32.xlu1 %v3999_v17, %s5149_s12 }
 0x1e1   : > { %1037 = vrot.lane.b32.xlu0 %v4013_v19, %s5149_s12 }
 0x1e4   : > { %1030 = vrot.lane.b32.xlu1 %v4018_v20, %s5149_s12 }
 0x1e5   : > { %1059 = vrot.lane.b32.xlu0 %v4006_v18, %s5139_s22 }
 0x1e8   : > { %1052 = vrot.lane.b32.xlu1 %v3999_v17, %s5139_s22 }
 0x1e9   : > { %1073 = vrot.lane.b32.xlu0 %v4013_v19, %s5139_s22 }
 0x1ec   : > { %1066 = vrot.lane.b32.xlu1 %v4018_v20, %s5139_s22 }
 0x1ed   : > { %1101 = vperm.xlu0 %3042, %v2500_v21  }
 0x1f0   : > { %1087 = vperm.xlu1 %3044, %v2500_v21  }
 0x1f1   : > { %3045 = vset.pattern.permute.xlu0 %v3469_v1 }
 0x1f2   : > { %1094 = vperm.xlu0 %3045, %v2500_v21  }
 0x1f4   : > { %3046 = vset.pattern.permute.xlu1 %v3475_v7 }
 0x1f5   : > { %1108 = vperm.xlu1 %3046, %v2500_v21  }
 0x1f6   : > { %v591_v24 = vpop.permute.xlu1 %590  ;;  %v577_v25 = vpop.permute.xlu0 %576  ;;  %1164 = vrot.lane.b32.xlu0 %v4044_v23, %s5147_s14 }
 0x1f7   : > { %2566 = vpush %v577_v25 }
 0x1f9   : > { %1157 = vrot.lane.b32.xlu1 %v4041_v22, %s5147_s14 }
 0x1fa   : > { %v605_v28 = vpop.permute.xlu1 %604  ;;  %v584_v29 = vpop.permute.xlu0 %583  ;;  %1178 = vrot.lane.b32.xlu0 %v4050_v26, %s5147_s14  ;;  %3047 = vset.pattern.permute.xlu1 %v3468_v0 }
 0x1fb   : > { %2568 = vpush %v584_v29 }
 0x1fc   : > { %2570 = vpush %v591_v24 }
 0x1fd   : > { %2572 = vpush %v3904_v3  ;;  %1171 = vrot.lane.b32.xlu1 %v4055_v27, %s5147_s14 }
 0x1fe   : > { %2574 = vpush %v605_v28  ;;  %v619_v30 = vpop.permute.xlu1 %618  ;;  %v612_v31 = vpop.permute.xlu0 %611  ;;  %1201 = vrot.lane.b32.xlu0 %v4044_v23, %s5149_s12 }
 0x1ff   : > { %2576 = vpush %v612_v31 }
 0x200   : > { %2578 = vpush %v619_v30 }
 0x201   : > { %2580 = vpush %v3913_v4  ;;  %1194 = vrot.lane.b32.xlu1 %v4041_v22, %s5149_s12 }
 0x202   : > { %v640_v32 = vpop.permute.xlu1 %639  ;;  %v633_v33 = vpop.permute.xlu0 %632  ;;  %1215 = vrot.lane.b32.xlu0 %v4050_v26, %s5149_s12 }
 0x203   : > { %2582 = vpush %v633_v33 }
 0x204   : > { %2584 = vpush %v640_v32 }
 0x205   : > { %1208 = vrot.lane.b32.xlu1 %v4055_v27, %s5149_s12 }
 0x206   : > { %v647_v34 = vpop.permute.xlu0 %646  ;;  %1238 = vrot.lane.b32.xlu0 %v4044_v23, %s5139_s22  ;;  %v548_v38 = vpop.permute.xlu1 %547 }
 0x207   : > { %2586 = vpush %v647_v34 }
 0x208   : > { %2588 = vpush %v3931_v8 }
 0x209   : > { %1231 = vrot.lane.b32.xlu1 %v4041_v22, %s5139_s22  ;;  %2590 = vpush %v3937_v10 }
 0x20a   : > { %2592 = vpush %v3947_v12  ;;  %1252 = vrot.lane.b32.xlu0 %v4050_v26, %s5139_s22  ;;  %v551_v40 = vpop.permute.xlu0 %550 }
 0x20b   : > { %2594 = vpush %v3942_v11  ;;  %v554_v55 = vsel %vm553_vm2, %v548_v38, %v551_v40 }
 0x20c   : > { %v557_v58 = vsel %vm4115_vm3, %v554_v55, 0.0 }
 0x20d   : > { %1245 = vrot.lane.b32.xlu1 %v4055_v27, %s5139_s22  ;;  %v574_v8 = vmul.f32 %v572_v59, %v557_v58 }
 0x20e   : > { %1292 = vrot.lane.b32.xlu0 %v4084_v36, %s5147_s14 }
 0x211   : > { %1285 = vrot.lane.b32.xlu1 %v4078_v35, %s5147_s14 }
 0x212   : > { %1306 = vrot.lane.b32.xlu0 %v4092_v37, %s5147_s14 }
 0x215   : > { %1299 = vrot.lane.b32.xlu1 %v4097_v39, %s5147_s14 }
 0x217   : > { %v4103_v41 = vpop.permute.xlu1 %660 }
 0x219   : > { %1313 = vrot.lane.b32.xlu1 %v4078_v35, %s5149_s12 }
 0x21b   : > { %v559_v42 = vpop.permute.xlu1 %558  ;;  %v4107_v43 = vpop.permute.xlu0 %666 }
 0x21f   : > { %v562_v45 = vpop.permute.xlu1 %561 }
 0x220   : > { %v4109_v46 = vpop.permute.xlu0 %672  ;;  %v565_v62 = vsel %vm564_vm4, %v559_v42, %v562_v45 }
 0x221   : > { %v568_v12 = vsel %vm543_vm5, %v565_v62, 0.0 }
 0x223   : > { %v4111_v48 = vpop.permute.xlu1 %678 }
 0x224   : > { %v734_v49 = vpop.permute.xlu0 %733 }
 0x227   : > { %v727_v51 = vpop.permute.xlu1 %726 }
 0x228   : > { %v748_v52 = vpop.permute.xlu0 %747  ;;  %2596 = vpush %v727_v51  ;;  %s4113_s3 = spop %2566 }
 0x229   : > { %2598 = vpush %v734_v49  ;;  %v579_v4 = vstv %s4113_s3 }
 0x22a   : > { %v581_v25 = vmul.f32 %v579_v4, %v557_v58 }
 0x22b   : > { %v741_v53 = vpop.permute.xlu1 %740 }
 0x22c   : > { %s4122_s25 = spop %2568  ;;  %v771_v57 = vpop.permute.xlu0 %770  ;;  %2600 = vpush %v741_v53 }
 0x22d   : > { %s4124_s30 = spop %2570  ;;  %2602 = vpush %v748_v52  ;;  %v586_v10 = vstv %s4122_s25 }
 0x22e   : > { %s2573_s13 = spop %2572  ;;  %v588_v32 = vmul.f32 %v586_v10, %v557_v58  ;;  %v593_v33 = vstv %s4124_s30 }
 0x22f   : > { %v600_v60 = vstv %s2573_s13  ;;  %s2575_s5 = spop %2574  ;;  %v764_v61 = vpop.permute.xlu1 %763 }
 0x230   : > { %v602_v63 = vmul.f32 %v600_v60, %v3920_v5  ;;  %v607_v2 = vstv %s2575_s5  ;;  %s2577_s11 = spop %2576  ;;  %v785_v3 = vpop.permute.xlu0 %784  ;;  %2604 = vpush %v764_v61 }
 0x231   : > { %v614_v6 = vstv %s2577_s11  ;;  %s2579_s22 = spop %2578  ;;  %2606 = vpush %v771_v57  ;;  %v609_v11 = vmul.f32 %v607_v2, %v3920_v5  ;;  %v595_v57 = vmul.f32 %v593_v33, %v557_v58 }
 0x232   : > { %s2581_s29 = spop %2580  ;;  %v603_v28 = vadd.f32 %v602_v63, %v574_v8  ;;  %v616_v29 = vmul.f32 %v614_v6, %v3920_v5  ;;  %v621_v34 = vstv %s2579_s22  ;;  %s5222_s22 = smov 125  }
 0x233   : > { %v628_v21 = vstv %s2581_s29  ;;  %v778_v24 = vpop.permute.xlu1 %777  ;;  %v610_v40 = vadd.f32 %v609_v11, %v581_v25  ;;  %v623_v51 = vmul.f32 %v621_v34, %v3920_v5 }
 0x234   : > { %v630_v30 = vmul.f32 %v628_v21, %v568_v12  ;;  %s2583_s3 = spop %2582  ;;  %v808_v31 = vpop.permute.xlu0 %807  ;;  %2608 = vpush %v778_v24  ;;  %v617_v50 = vadd.f32 %v616_v29, %v588_v32 }
 0x235   : > { %v635_v38 = vstv %s2583_s3  ;;  %s2585_s11 = spop %2584  ;;  %2610 = vpush %v785_v3  ;;  %v624_v3 = vadd.f32 %v623_v51, %v595_v57  ;;  %v2501_v51 = vld [vmem:[#allocation13] ss:$0 sm:$0xff] }
 0x236   : > { %v631_v42 = vadd.f32 %v630_v30, %v603_v28  ;;  %v637_v44 = vmul.f32 %v635_v38, %v568_v12  ;;  %v642_v45 = vstv %s2585_s11 }
 0x237   : > { %v644_v47 = vmul.f32 %v642_v45, %v568_v12  ;;  %v801_v49 = vpop.permute.xlu1 %800 }
 0x238   : > { %v663_v52 = vadd.f32 %v4103_v41, %v631_v42  ;;  %v638_v53 = vadd.f32 %v637_v44, %v610_v40  ;;  %s2587_s25 = spop %2586  ;;  %v822_v55 = vpop.permute.xlu0 %821  ;;  %2612 = vpush %v801_v49 }
 0x239   : > { %v649_v59 = vstv %s2587_s25  ;;  %2614 = vpush %v808_v31  ;;  %v645_v62 = vadd.f32 %v644_v47, %v617_v50  ;;  %s4252_s30 = spop %2588 }
 0x23a   : > { %v4140_v60 = vmax.f32 %v663_v52, 0.0  ;;  %v669_v61 = vadd.f32 %v4107_v43, %v638_v53  ;;  %v651_v63 = vmul.f32 %v649_v59, %v568_v12  ;;  %s4254_s13 = spop %2590  ;;  %v4257_v59 = vld [vmem:[#allocation14] sm:$0xf] }
 0x23b   : > { %v815_v2 = vpop.permute.xlu1 %814  ;;  %v675_v41 = vadd.f32 %v4109_v46, %v645_v62  ;;  %v4260_v62 = vrot.slane %v4257_v59, 1  ;;  %s4262_s5 = spop %2592 }
 0x23c   : > { %v4143_v4 = vmax.f32 %v669_v61, 0.0  ;;  %688 = vrot.lane.b32.xlu0 %v4140_v60, %s5145_s16  ;;  %685 = vrot.lane.b32.xlu1 %v4140_v60, %s5143_s15  ;;  %v862_v5 = vpop.permute.xlu0 %861  ;;  %2616 = vpush %v815_v2  ;;  %v652_v58 = vadd.f32 %v651_v63, %v624_v3  ;;  %s4264_s29 = spop %2594  ;;  %v4270_v3 = vrot.slane %v4257_v59, 3 }
 0x23d   : > { %2618 = vpush %v822_v55  ;;  %v4158_v8 = vmax.f32 %v675_v41, 0.0 }
 0x23e   : > { %2620 = vpush %v3964_v13  ;;  %v681_v46 = vadd.f32 %v4111_v48, %v652_v58  ;;  %v4282_v58 = vrot.slane %v4257_v59, 2 }
 0x23f   : > { %2622 = vpush %v3971_v14  ;;  %v855_v43 = vpop.permute.xlu1 %854 }
 0x240   : > { %2624 = vpush %v3983_v16  ;;  %721 = vrot.lane.b32.xlu0 %v4143_v4, %s5145_s16  ;;  %718 = vrot.lane.b32.xlu1 %v4143_v4, %s5143_s15  ;;  %v876_v6 = vpop.permute.xlu0 %875  ;;  %v4165_v16 = vmax.f32 %v681_v46, 0.0  ;;  %v707_v46 = vstv %s4262_s5  ;;  %s5226_s5 = smov 15  }
 0x241   : > { %2626 = vpush %v3978_v15 }
 0x242   : > { %2628 = vpush %v855_v43  ;;  %v695_v43 = vstv %s4252_s30 }
 0x243   : > { %2630 = vpush %v862_v5  ;;  %v869_v13 = vpop.permute.xlu1 %868 }
 0x244   : > { %758 = vrot.lane.b32.xlu0 %v4158_v8, %s5145_s16  ;;  %755 = vrot.lane.b32.xlu1 %v4158_v8, %s5143_s15  ;;  %v890_v14 = vpop.permute.xlu0 %889  ;;  %2632 = vpush %v869_v13  ;;  %v713_v13 = vstv %s4264_s29  ;;  %s5227_s29 = smov 126  }
 0x245   : > { %2634 = vpush %v876_v6  ;;  %v701_v6 = vstv %s4254_s13  ;;  %s5225_s13 = smov 127  }
 0x247   : > { %v883_v10 = vpop.permute.xlu1 %882 }
 0x248   : > { %795 = vrot.lane.b32.xlu0 %v4165_v16, %s5145_s16  ;;  %792 = vrot.lane.b32.xlu1 %v4165_v16, %s5143_s15  ;;  %v904_v15 = vpop.permute.xlu0 %903  ;;  %2636 = vpush %v883_v10 }
 0x249   : > { %2638 = vpush %v890_v14 }
 0x24b   : > { %v897_v48 = vpop.permute.xlu1 %896 }
 0x24c   : > { %943 = vrot.lane.b32.xlu0 %v4140_v60, %s5141_s24  ;;  %940 = vrot.lane.b32.xlu1 %v4140_v60, %s5147_s14  ;;  %v918_v11 = vpop.permute.xlu0 %917  ;;  %2640 = vpush %v897_v48 }
 0x24d   : > { %2642 = vpush %v904_v15 }
 0x24f   : > { %v911_v12 = vpop.permute.xlu1 %910 }
 0x250   : > { %975 = vrot.lane.b32.xlu0 %v4143_v4, %s5141_s24  ;;  %972 = vrot.lane.b32.xlu1 %v4143_v4, %s5147_s14  ;;  %v932_v21 = vpop.permute.xlu0 %931  ;;  %2644 = vpush %v911_v12 }
 0x251   : > { %2646 = vpush %v918_v11 }
 0x253   : > { %v925_v24 = vpop.permute.xlu1 %924 }
 0x254   : > { %1011 = vrot.lane.b32.xlu0 %v4158_v8, %s5141_s24  ;;  %1008 = vrot.lane.b32.xlu1 %v4158_v8, %s5147_s14  ;;  %v988_v25 = vpop.permute.xlu0 %987  ;;  %2648 = vpush %v925_v24 }
 0x255   : > { %2650 = vpush %v932_v21 }
 0x256   : > { %2652 = vpush %v3999_v17 }
 0x257   : > { %v981_v28 = vpop.permute.xlu1 %980  ;;  %2654 = vpush %v4006_v18 }
 0x258   : > { %1320 = vrot.lane.b32.xlu0 %v4084_v36, %s5149_s12  ;;  %1044 = vrot.lane.b32.xlu1 %v4165_v16, %s5147_s14  ;;  %v1002_v29 = vpop.permute.xlu0 %1001  ;;  %2656 = vpush %v4018_v20  ;;  %v4199_v20 = vld [vmem:[#allocation11 + $0x8] sm:$0xf] }
 0x259   : > { %2658 = vpush %v4013_v19  ;;  %v4206_v33 = vrot.slane %v4199_v20, 1  ;;  %v4213_v40 = vrot.slane %v4199_v20, 3  ;;  %v4220_v44 = vrot.slane %v4199_v20, 2  ;;  %s4272_s3 = spop %2596 }
 0x25a   : > { %2660 = vpush %v981_v28  ;;  %s4275_s11 = spop %2598  ;;  %v729_v14 = vstv %s4272_s3 }
 0x25b   : > { %v995_v30 = vpop.permute.xlu1 %994  ;;  %2662 = vpush %v988_v25  ;;  %v736_v10 = vstv %s4275_s11 }
 0x25c   : > { %1334 = vrot.lane.b32.xlu0 %v4092_v37, %s5149_s12  ;;  %1047 = vrot.lane.b32.xlu1 %v4165_v16, %s5141_s24  ;;  %v1024_v17 = vpop.permute.xlu0 %1023  ;;  %2664 = vpush %v995_v30 }
 0x25d   : > { %2666 = vpush %v1002_v29  ;;  %s4277_s25 = spop %2600 }
 0x25e   : > { %s4286_s24 = spop %2602  ;;  %v743_v15 = vstv %s4277_s25 }
 0x25f   : > { %v1017_v18 = vpop.permute.xlu1 %1016  ;;  %v750_v48 = vstv %s4286_s24  ;;  %s5224_s24 = smov 113  }
 0x260   : > { %1348 = vrot.lane.b32.xlu0 %v4084_v36, %s5222_s22  ;;  %1327 = vrot.lane.b32.xlu1 %v4097_v39, %s5149_s12  ;;  %v1038_v19 = vpop.permute.xlu0 %1037  ;;  %2668 = vpush %v1017_v18 }
 0x261   : > { %2670 = vpush %v1024_v17  ;;  %s4290_s15 = spop %2604 }
 0x262   : > { %s4293_s16 = spop %2606  ;;  %v766_v11 = vstv %s4290_s15 }
 0x263   : > { %v1031_v31 = vpop.permute.xlu1 %1030  ;;  %v773_v12 = vstv %s4293_s16  ;;  %s5223_s16 = smov 1  }
 0x264   : > { %1362 = vrot.lane.b32.xlu0 %v4092_v37, %s5222_s22  ;;  %1341 = vrot.lane.b32.xlu1 %v4078_v35, %s5222_s22  ;;  %v1060_v32 = vpop.permute.xlu0 %1059  ;;  %2672 = vpush %v1031_v31 }
 0x265   : > { %2674 = vpush %v1038_v19  ;;  %s4301_s0 = spop %2608 }
 0x266   : > { %s4303_s2 = spop %2610  ;;  %v780_v21 = vstv %s4301_s0 }
 0x267   : > { %v1053_v34 = vpop.permute.xlu1 %1052  ;;  %v787_v25 = vstv %s4303_s2 }
 0x268   : > { %1418 = vrot.lane.b32.xlu0 %v4206_v33, %s5147_s14  ;;  %1355 = vrot.lane.b32.xlu1 %v4097_v39, %s5222_s22  ;;  %v1074_v38 = vpop.permute.xlu0 %1073  ;;  %2676 = vpush %v1053_v34 }
 0x269   : > { %2678 = vpush %v1060_v32 }
 0x26b   : > { %v1067_v42 = vpop.permute.xlu1 %1066 }
 0x26c   : > { %1432 = vrot.lane.b32.xlu0 %v4213_v40, %s5147_s14  ;;  %2680 = vpush %v1067_v42  ;;  %1411 = vrot.lane.b32.xlu1 %v4199_v20, %s5147_s14  ;;  %v4222_v45 = vpop.permute.xlu0 %1101 }
 0x26d   : > { %2682 = vpush %v1074_v38 }
 0x26e   : > { %2684 = vpush %v4041_v22 }
 0x26f   : > { %v4225_v47 = vpop.permute.xlu1 %1087  ;;  %2686 = vpush %v4044_v23 }
 0x270   : > { %1454 = vrot.lane.b32.xlu0 %v4206_v33, %s5149_s12  ;;  %2688 = vpush %v4055_v27  ;;  %1425 = vrot.lane.b32.xlu1 %v4220_v44, %s5147_s14 }
 0x271   : > { %v4233_v49 = vpop.permute.xlu0 %1094  ;;  %2690 = vpush %v4050_v26 }
 0x274   : > { %1468 = vrot.lane.b32.xlu0 %v4213_v40, %s5149_s12  ;;  %v4238_v22 = vpop.permute.xlu1 %1108  ;;  %1447 = vrot.lane.b32.xlu1 %v4199_v20, %s5149_s12 }
 0x275   : > { %v1165_v23 = vpop.permute.xlu0 %1164 }
 0x278   : > { %1490 = vrot.lane.b32.xlu0 %v4206_v33, %s5222_s22  ;;  %v1158_v27 = vpop.permute.xlu1 %1157  ;;  %1461 = vrot.lane.b32.xlu1 %v4220_v44, %s5149_s12 }
 0x279   : > { %2692 = vpush %v1158_v27  ;;  %v1179_v50 = vpop.permute.xlu0 %1178 }
 0x27a   : > { %2694 = vpush %v1165_v23 }
 0x27c   : > { %1504 = vrot.lane.b32.xlu0 %v4213_v40, %s5222_s22  ;;  %v1172_v26 = vpop.permute.xlu1 %1171  ;;  %1483 = vrot.lane.b32.xlu1 %v4199_v20, %s5222_s22 }
 0x27d   : > { %2696 = vpush %v1172_v26  ;;  %v1202_v52 = vpop.permute.xlu0 %1201 }
 0x27e   : > { %2698 = vpush %v1179_v50 }
 0x280   : > { %1525 = vperm.xlu0 %3045, %v2501_v51   ;;  %v1195_v53 = vpop.permute.xlu1 %1194  ;;  %1497 = vrot.lane.b32.xlu1 %v4220_v44, %s5222_s22 }
 0x281   : > { %2700 = vpush %v1195_v53  ;;  %v1216_v55 = vpop.permute.xlu0 %1215 }
 0x282   : > { %2702 = vpush %v1202_v52 }
 0x284   : > { %v1209_v57 = vpop.permute.xlu1 %1208  ;;  %1518 = vperm.xlu1 %3047, %v2501_v51   ;;  %3048 = vset.pattern.permute.xlu0 %v3476_v9 }
 0x285   : > { %2704 = vpush %v1209_v57  ;;  %v1239_v61 = vpop.permute.xlu0 %1238  ;;  %1532 = vperm.xlu0 %3048, %v2501_v51  }
 0x286   : > { %2706 = vpush %v1216_v55 }
 0x288   : > { %v1232_v63 = vpop.permute.xlu1 %1231  ;;  %3049 = vset.pattern.permute.xlu1 %v3475_v7 }
 0x289   : > { %2708 = vpush %v1232_v63  ;;  %v1253_v2 = vpop.permute.xlu0 %1252  ;;  %1539 = vperm.xlu1 %3049, %v2501_v51   ;;  %1595 = vrot.lane.b32.xlu0 %v4260_v62, %s5147_s14 }
 0x28a   : > { %2710 = vpush %v1239_v61  ;;  %3051 = vset.pattern.permute.xlu0 %v3468_v0 }
 0x28c   : > { %v1246_v5 = vpop.permute.xlu1 %1245 }
 0x28d   : > { %2712 = vpush %v1246_v5  ;;  %v1293_v41 = vpop.permute.xlu0 %1292  ;;  %1588 = vrot.lane.b32.xlu1 %v4257_v59, %s5147_s14  ;;  %1609 = vrot.lane.b32.xlu0 %v4270_v3, %s5147_s14 }
 0x28e   : > { %2714 = vpush %v1253_v2  ;;  %3050 = vset.pattern.permute.xlu1 %v3469_v1 }
 0x28f   : > { %2716 = vpush %v4078_v35 }
 0x290   : > { %v1286_v0 = vpop.permute.xlu1 %1285  ;;  %2718 = vpush %v4084_v36 }
 0x291   : > { %2720 = vpush %v4097_v39  ;;  %1602 = vrot.lane.b32.xlu1 %v4282_v58, %s5147_s14  ;;  %1632 = vrot.lane.b32.xlu0 %v4260_v62, %s5149_s12  ;;  %v1307_v1 = vpop.permute.xlu0 %1306  ;;  %s4309_s14 = spop %2612 }
 0x292   : > { %2722 = vpush %v4092_v37  ;;  %s4311_s4 = spop %2614  ;;  %v803_v28 = vstv %s4309_s14 }
 0x293   : > { %2724 = vpush %v1286_v0  ;;  %s4317_s6 = spop %2616  ;;  %v810_v38 = vstv %s4311_s4 }
 0x294   : > { %v1300_v35 = vpop.permute.xlu1 %1299  ;;  %2726 = vpush %v1293_v41  ;;  %s4319_s7 = spop %2618  ;;  %v817_v42 = vstv %s4317_s6 }
 0x295   : > { %2728 = vpush %v1300_v35  ;;  %1625 = vrot.lane.b32.xlu1 %v4257_v59, %s5149_s12  ;;  %1646 = vrot.lane.b32.xlu0 %v4270_v3, %s5149_s12  ;;  %s4323_s8 = spop %2620  ;;  %v824_v50 = vstv %s4319_s7 }
 0x296   : > { %2730 = vpush %v1307_v1  ;;  %s4325_s9 = spop %2622  ;;  %v832_v29 = vstv %s4323_s8 }
 0x297   : > { %v838_v30 = vstv %s4325_s9  ;;  %v4383_v26 = vmul.f32 %v832_v29, %v4140_v60 }
 0x298   : > { %v1314_v36 = vpop.permute.xlu1 %1313  ;;  %v4387_v53 = vmul.f32 %v838_v30, %v4140_v60 }
 0x299   : > { %2732 = vpush %v1314_v36  ;;  %1639 = vrot.lane.b32.xlu1 %v4282_v58, %s5149_s12  ;;  %1669 = vrot.lane.b32.xlu0 %v4260_v62, %s5222_s22  ;;  %s4329_s12 = spop %2624 }
 0x29a   : > { %s4331_s10 = spop %2626  ;;  %v844_v19 = vstv %s4329_s12 }
 0x29b   : > { %s4333_s28 = spop %2628  ;;  %v850_v31 = vstv %s4331_s10  ;;  %v4390_v55 = vmul.f32 %v844_v19, %v4140_v60 }
 0x29c   : > { %s4335_s19 = spop %2630  ;;  %v857_v32 = vstv %s4333_s28  ;;  %v4393_v57 = vmul.f32 %v850_v31, %v4140_v60 }
 0x29d   : > { %1662 = vrot.lane.b32.xlu1 %v4257_v59, %s5222_s22  ;;  %s4337_s18 = spop %2632  ;;  %v864_v51 = vstv %s4335_s19  ;;  %v4396_v61 = vmul.f32 %v857_v32, %v4143_v4 }
 0x29e   : > { %s4339_s27 = spop %2634  ;;  %v4403_v35 = vmul.f32 %v864_v51, %v4143_v4  ;;  %v871_v36 = vstv %s4337_s18 }
 0x29f   : > { %s4341_s20 = spop %2636  ;;  %v878_v32 = vstv %s4339_s27 }
 0x2a0   : > { %s4343_s1 = spop %2638 }
 0x2a1   : > { %1676 = vrot.lane.b32.xlu1 %v4282_v58, %s5222_s22  ;;  %s4345_s17 = spop %2640 }
 0x2a2   : > { %s4355_s26 = spop %2642 }
 0x2a3   : > { %s4360_s30 = spop %2644 }
 0x2a4   : > { %s4370_s15 = spop %2646 }
 0x2a5   : > { %s4375_s0 = spop %2648 }
 0x2a6   : > { %s4398_s2 = spop %2650 }
 0x2a7   : > { %s4400_s4 = spop %2652 }
 0x2a8   : > { %s4407_s6 = spop %2654 }
 0x2a9   : > { %s4411_s7 = spop %2656 }
 0x2aa   : > { %s4417_s8 = spop %2658 }
 0x2ab   : > { %s4425_s9 = spop %2660 }
 0x2ac   : > { %s4427_s10 = spop %2662 }
 0x2ae   : > { %v689_v37 = vpop.permute.xlu0 %688  ;;  %v686_v39 = vpop.permute.xlu1 %685 }
 0x2af   : > { %v691_v24 = vsel %vm553_vm2, %v686_v39, %v689_v37 }
 0x2b0   : > { %v692_v23 = vsel %vm4115_vm3, %v691_v24, 0.0 }
 0x2b1   : > { %v697_v5 = vmul.f32 %v695_v43, %v692_v23  ;;  %v703_v37 = vmul.f32 %v701_v6, %v692_v23  ;;  %v715_v24 = vmul.f32 %v713_v13, %v692_v23  ;;  %v885_v13 = vstv %s4341_s20 }
 0x2b2   : > { %v722_v17 = vpop.permute.xlu0 %721  ;;  %v719_v18 = vpop.permute.xlu1 %718 }
 0x2b3   : > { %v724_v34 = vsel %vm553_vm2, %v719_v18, %v722_v17 }
 0x2b4   : > { %v725_v27 = vsel %vm4115_vm3, %v724_v34, 0.0  ;;  %v892_v34 = vstv %s4343_s1 }
 0x2b5   : > { %v731_v52 = vmul.f32 %v729_v14, %v725_v27  ;;  %v738_v41 = vmul.f32 %v736_v10, %v725_v27  ;;  %v745_v0 = vmul.f32 %v743_v15, %v725_v27  ;;  %v752_v1 = vmul.f32 %v750_v48, %v725_v27 }
 0x2b6   : > { %v759_v63 = vpop.permute.xlu0 %758  ;;  %v756_v2 = vpop.permute.xlu1 %755  ;;  %v709_v14 = vmul.f32 %v707_v46, %v692_v23 }
 0x2b7   : > { %v761_v39 = vsel %vm553_vm2, %v756_v2, %v759_v63  ;;  %v732_v29 = vadd.f32 %v731_v52, %v697_v5  ;;  %v739_v6 = vadd.f32 %v738_v41, %v703_v37  ;;  %v753_v31 = vadd.f32 %v752_v1, %v715_v24 }
 0x2b8   : > { %v762_v43 = vsel %vm4115_vm3, %v761_v39, 0.0  ;;  %v746_v19 = vadd.f32 %v745_v0, %v709_v14  ;;  %v873_v41 = vmul.f32 %v871_v36, %v4143_v4  ;;  %v899_v0 = vstv %s4345_s17  ;;  %s4433_s17 = spop %2664 }
 0x2b9   : > { %v768_v10 = vmul.f32 %v766_v11, %v762_v43  ;;  %v775_v15 = vmul.f32 %v773_v12, %v762_v43  ;;  %v782_v48 = vmul.f32 %v780_v21, %v762_v43  ;;  %v789_v30 = vmul.f32 %v787_v25, %v762_v43  ;;  %s4443_s18 = spop %2666 }
 0x2ba   : > { %v796_v17 = vpop.permute.xlu0 %795  ;;  %v793_v18 = vpop.permute.xlu1 %792  ;;  %v913_v1 = vstv %s4360_s30  ;;  %v920_v37 = vstv %s4370_s15  ;;  %s4450_s19 = spop %2668 }
 0x2bb   : > { %v798_v46 = vsel %vm553_vm2, %v793_v18, %v796_v17  ;;  %v769_v23 = vadd.f32 %v768_v10, %v732_v29  ;;  %v776_v11 = vadd.f32 %v775_v15, %v739_v6  ;;  %v783_v12 = vadd.f32 %v782_v48, %v746_v19  ;;  %s4454_s20 = spop %2670 }
 0x2bc   : > { %v790_v21 = vadd.f32 %v789_v30, %v753_v31  ;;  %v799_v25 = vsel %vm4115_vm3, %v798_v46, 0.0  ;;  %v901_v17 = vmul.f32 %v899_v0, %v4158_v8  ;;  %v906_v18 = vstv %s4355_s26  ;;  %s4461_s27 = spop %2672 }
 0x2bd   : > { %v805_v27 = vmul.f32 %v803_v28, %v799_v25  ;;  %v812_v51 = vmul.f32 %v810_v38, %v799_v25  ;;  %v819_v52 = vmul.f32 %v817_v42, %v799_v25  ;;  %v826_v63 = vmul.f32 %v824_v50, %v799_v25  ;;  %s4463_s28 = spop %2674 }
 0x2be   : > { %v944_v2 = vpop.permute.xlu0 %943  ;;  %v941_v5 = vpop.permute.xlu1 %940  ;;  %v880_v28 = vmul.f32 %v878_v32, %v4143_v4  ;;  %v887_v38 = vmul.f32 %v885_v13, %v4158_v8  ;;  %v894_v42 = vmul.f32 %v892_v34, %v4158_v8  ;;  %v915_v6 = vmul.f32 %v913_v1, %v4165_v16  ;;  %s4471_s26 = spop %2676 }
 0x2bf   : > { %v806_v39 = vadd.f32 %v805_v27, %v769_v23  ;;  %v813_v14 = vadd.f32 %v812_v51, %v776_v11  ;;  %v820_v24 = vadd.f32 %v819_v52, %v783_v12  ;;  %v827_v29 = vadd.f32 %v826_v63, %v790_v21  ;;  %s2679_s1 = spop %2678 }
 0x2c0   : > { %v946_v50 = vsel %vm564_vm4, %v941_v5, %v944_v2  ;;  %v922_v19 = vmul.f32 %v920_v37, %v4165_v16  ;;  %v927_v31 = vstv %s4375_s0  ;;  %v956_v46 = vstv %s4407_s6  ;;  %s2681_s14 = spop %2680 }
 0x2c1   : > { %v835_v36 = vadd.f32 %v4383_v26, %v806_v39  ;;  %v841_v43 = vadd.f32 %v4387_v53, %v813_v14  ;;  %v847_v10 = vadd.f32 %v4390_v55, %v820_v24  ;;  %v853_v15 = vadd.f32 %v4393_v57, %v827_v29  ;;  %s2683_s12 = spop %2682 }
 0x2c2   : > { %v976_v48 = vpop.permute.xlu0 %975  ;;  %v973_v30 = vpop.permute.xlu1 %972  ;;  %v950_v57 = vstv %s4400_s4  ;;  %v947_v13 = vsel %vm543_vm5, %v946_v50, 0.0  ;;  %v908_v21 = vmul.f32 %v906_v18, %v4158_v8  ;;  %v929_v25 = vmul.f32 %v927_v31, %v4165_v16  ;;  %s4612_s3 = spop %2684 }
 0x2c3   : > { %v860_v26 = vadd.f32 %v4396_v61, %v835_v36  ;;  %v867_v53 = vadd.f32 %v4403_v35, %v841_v43  ;;  %v874_v55 = vadd.f32 %v873_v41, %v847_v10  ;;  %v881_v32 = vadd.f32 %v880_v28, %v853_v15  ;;  %s4618_s11 = spop %2686 }
 0x2c4   : > { %v978_v61 = vsel %vm564_vm4, %v973_v30, %v976_v48  ;;  %v934_v27 = vstv %s4398_s2  ;;  %v962_v51 = vstv %s4411_s7  ;;  %v952_v2 = vmul.f32 %v950_v57, %v947_v13  ;;  %s4620_s25 = spop %2688 }
 0x2c5   : > { %v888_v34 = vadd.f32 %v887_v38, %v860_v26  ;;  %v895_v23 = vadd.f32 %v894_v42, %v867_v53  ;;  %v902_v11 = vadd.f32 %v901_v17, %v874_v55  ;;  %v958_v5 = vmul.f32 %v956_v46, %v947_v13  ;;  %s4626_s30 = spop %2690 }
 0x2c6   : > { %v1012_v12 = vpop.permute.xlu0 %1011  ;;  %v1009_v35 = vpop.permute.xlu1 %1008  ;;  %v909_v41 = vadd.f32 %v908_v21, %v881_v32  ;;  %v979_v1 = vsel %vm543_vm5, %v978_v61, 0.0  ;;  %v936_v28 = vmul.f32 %v934_v27, %v4165_v16  ;;  %v983_v38 = vstv %s4425_s9  ;;  %s4628_s15 = spop %2692 }
 0x2c7   : > { %v916_v52 = vadd.f32 %v915_v6, %v888_v34  ;;  %v923_v63 = vadd.f32 %v922_v19, %v895_v23  ;;  %v930_v0 = vadd.f32 %v929_v25, %v902_v11  ;;  %v1014_v14 = vsel %vm564_vm4, %v1009_v35, %v1012_v12  ;;  %s4630_s0 = spop %2694 }
 0x2c8   : > { %v990_v42 = vstv %s4427_s10  ;;  %v964_v50 = vmul.f32 %v962_v51, %v947_v13  ;;  %v968_v36 = vstv %s4417_s8  ;;  %v997_v43 = vstv %s4433_s17  ;;  %s4636_s2 = spop %2696 }
 0x2c9   : > { %v953_v37 = vadd.f32 %v952_v2, %v916_v52  ;;  %v959_v39 = vadd.f32 %v958_v5, %v923_v63  ;;  %v985_v10 = vmul.f32 %v983_v38, %v979_v1  ;;  %v992_v15 = vmul.f32 %v990_v42, %v979_v1  ;;  %s4638_s4 = spop %2698 }
 0x2ca   : > { %v1321_v24 = vpop.permute.xlu0 %1320  ;;  %v1045_v29 = vpop.permute.xlu1 %1044  ;;  %v1004_v48 = vstv %s4443_s18  ;;  %v937_v30 = vadd.f32 %v936_v28, %v909_v41  ;;  %v965_v17 = vadd.f32 %v964_v50, %v930_v0  ;;  %v1015_v18 = vsel %vm543_vm5, %v1014_v14, 0.0  ;;  %s4641_s6 = spop %2700 }
 0x2cb   : > { %2734 = vpush %v1321_v24  ;;  %v1019_v6 = vstv %s4450_s19  ;;  %v1026_v19 = vstv %s4454_s20  ;;  %v986_v31 = vadd.f32 %v985_v10, %v953_v37  ;;  %v993_v26 = vadd.f32 %v992_v15, %v959_v39  ;;  %s4643_s7 = spop %2702 }
 0x2cc   : > { %v1033_v57 = vstv %s4461_s27  ;;  %v1055_v46 = vstv %s4471_s26  ;;  %v970_v32 = vmul.f32 %v968_v36, %v947_v13  ;;  %v999_v34 = vmul.f32 %v997_v43, %v979_v1  ;;  %s4645_s8 = spop %2704 }
 0x2cd   : > { %v1062_v23 = vstv %s2679_s1  ;;  %v1021_v11 = vmul.f32 %v1019_v6, %v1015_v18  ;;  %v1028_v61 = vmul.f32 %v1026_v19, %v1015_v18  ;;  %v1069_v35 = vstv %s2681_s14  ;;  %s4648_s9 = spop %2706 }
 0x2ce   : > { %v1048_v53 = vpop.permute.xlu1 %1047  ;;  %v1335_v55 = vpop.permute.xlu0 %1334  ;;  %v971_v21 = vadd.f32 %v970_v32, %v937_v30  ;;  %v1000_v25 = vadd.f32 %v999_v34, %v965_v17  ;;  %v1006_v13 = vmul.f32 %v1004_v48, %v979_v1  ;;  %v1035_v0 = vmul.f32 %v1033_v57, %v1015_v18  ;;  %v4535_v34 = vld [vmem:[#allocation14 + $0x4] sm:$0xf]  ;;  %s4650_s10 = spop %2708 }
 0x2cf   : > { %v1050_v12 = vsel %vm564_vm4, %v1045_v29, %v1048_v53  ;;  %v1022_v51 = vadd.f32 %v1021_v11, %v986_v31  ;;  %v1029_v52 = vadd.f32 %v1028_v61, %v993_v26  ;;  %v1040_v28 = vstv %s4463_s28 }
 0x2d0   : > { %v1051_v27 = vsel %vm543_vm5, %v1050_v12, 0.0  ;;  %v1007_v24 = vadd.f32 %v1006_v13, %v971_v21  ;;  %v1036_v29 = vadd.f32 %v1035_v0, %v1000_v25  ;;  %v1076_v38 = vstv %s2683_s12  ;;  %v4581_v25 = vld [vmem:[#allocation14 + $0x8] sm:$0xf] }
 0x2d1   : > { %v1057_v63 = vmul.f32 %v1055_v46, %v1051_v27  ;;  %v1064_v2 = vmul.f32 %v1062_v23, %v1051_v27  ;;  %v1071_v37 = vmul.f32 %v1069_v35, %v1051_v27  ;;  %v1042_v43 = vmul.f32 %v1040_v28, %v1015_v18 }
 0x2d2   : > { %v1328_v5 = vpop.permute.xlu1 %1327  ;;  %v1349_v41 = vpop.permute.xlu0 %1348  ;;  %v1078_v15 = vmul.f32 %v1076_v38, %v1051_v27  ;;  %v4543_v23 = vrot.slane %v4535_v34, 1  ;;  %v4602_v13 = vrot.slane %v4581_v25, 2  ;;  %v1132_v28 = vstv %s4618_s11 }
 0x2d3   : > { %2736 = vpush %v1328_v5  ;;  %v1058_v39 = vadd.f32 %v1057_v63, %v1022_v51  ;;  %v1065_v14 = vadd.f32 %v1064_v2, %v1029_v52  ;;  %v1072_v10 = vadd.f32 %v1071_v37, %v1036_v29  ;;  %v1043_v48 = vadd.f32 %v1042_v43, %v1007_v24 }
 0x2d4   : > { %2738 = vpush %v1335_v55  ;;  %v4586_v52 = vrot.slane %v4581_v25, 1  ;;  %v4593_v5 = vrot.slane %v4581_v25, 3  ;;  %v1126_v29 = vstv %s4612_s3  ;;  %v1138_v38 = vstv %s4620_s25 }
 0x2d5   : > { %v1090_v42 = vadd.f32 %v4225_v47, %v1058_v39  ;;  %v1097_v30 = vadd.f32 %v4233_v49, %v1065_v14  ;;  %v1079_v31 = vadd.f32 %v1078_v15, %v1043_v48  ;;  %v1104_v47 = vadd.f32 %v4222_v45, %v1072_v10  ;;  %v4634_v14 = vld [vmem:[#allocation16] ss:$0 sm:$0xff] }
 0x2d6   : > { %v1342_v50 = vpop.permute.xlu1 %1341  ;;  %v1363_v36 = vpop.permute.xlu0 %1362  ;;  %v1174_v43 = vstv %s4636_s2  ;;  %v1181_v10 = vstv %s4638_s4  ;;  %v1197_v15 = vstv %s4641_s6  ;;  %v1204_v48 = vstv %s4643_s7 }
 0x2d7   : > { %2740 = vpush %v1342_v50  ;;  %v1091_v1 = vadd.f32 %v1090_v42, %v4140_v60  ;;  %v1098_v26 = vadd.f32 %v1097_v30, %v4143_v4  ;;  %v1105_v53 = vadd.f32 %v1104_v47, %v4158_v8  ;;  %v1111_v4 = vadd.f32 %v4238_v22, %v1079_v31 }
 0x2d8   : > { %2742 = vpush %v1349_v41  ;;  %v1144_v42 = vstv %s4626_s30  ;;  %v1160_v50 = vstv %s4628_s15  ;;  %v1234_v31 = vstv %s4650_s10 }
 0x2d9   : > { %v4489_v17 = vmax.f32 %v1091_v1, 0.0  ;;  %v4498_v18 = vmax.f32 %v1098_v26, 0.0  ;;  %v4509_v55 = vmax.f32 %v1105_v53, 0.0  ;;  %v1112_v8 = vadd.f32 %v1111_v4, %v4165_v16 }
 0x2da   : > { %v1356_v6 = vpop.permute.xlu1 %1355  ;;  %v1419_v19 = vpop.permute.xlu0 %1418 }
 0x2db   : > { %2744 = vpush %v1356_v6  ;;  %1119 = vrot.lane.b32.xlu0 %v4489_v17, %s5223_s16  ;;  %1116 = vrot.lane.b32.xlu1 %v4489_v17, %s5224_s24  ;;  %v1211_v6 = vstv %s4645_s8 }
 0x2dc   : > { %2746 = vpush %v1363_v36  ;;  %v1167_v36 = vstv %s4630_s0 }
 0x2dd   : > { %2748 = vpush %v4199_v20 }
 0x2de   : > { %v1433_v60 = vpop.permute.xlu0 %1432  ;;  %v1412_v49 = vpop.permute.xlu1 %1411  ;;  %2750 = vpush %v4206_v33 }
 0x2df   : > { %2752 = vpush %v4220_v44  ;;  %1152 = vrot.lane.b32.xlu0 %v4498_v18, %s5223_s16  ;;  %1149 = vrot.lane.b32.xlu1 %v4498_v18, %s5224_s24 }
 0x2e0   : > { %2754 = vpush %v4213_v40  ;;  %v4516_v40 = vmax.f32 %v1112_v8, 0.0 }
 0x2e1   : > { %2756 = vpush %v1412_v49 }
 0x2e2   : > { %v1455_v45 = vpop.permute.xlu0 %1454  ;;  %v1426_v20 = vpop.permute.xlu1 %1425  ;;  %2758 = vpush %v1419_v19  ;;  %v1218_v19 = vstv %s4648_s9 }
 0x2e3   : > { %2760 = vpush %v1426_v20  ;;  %1189 = vrot.lane.b32.xlu0 %v4509_v55, %s5223_s16  ;;  %1186 = vrot.lane.b32.xlu1 %v4509_v55, %s5224_s24 }
 0x2e4   : > { %2762 = vpush %v1433_v60 }
 0x2e6   : > { %v1448_v33 = vpop.permute.xlu1 %1447  ;;  %v1469_v44 = vpop.permute.xlu0 %1468 }
 0x2e7   : > { %2764 = vpush %v1448_v33  ;;  %1226 = vrot.lane.b32.xlu0 %v4516_v40, %s5223_s16  ;;  %1223 = vrot.lane.b32.xlu1 %v4516_v40, %s5224_s24 }
 0x2e8   : > { %2766 = vpush %v1455_v45 }
 0x2ea   : > { %v1462_v16 = vpop.permute.xlu1 %1461  ;;  %v1491_v22 = vpop.permute.xlu0 %1490 }
 0x2eb   : > { %2768 = vpush %v1462_v16  ;;  %1683 = vrot.lane.b32.xlu0 %v4270_v3, %s5222_s22  ;;  %1371 = vrot.lane.b32.xlu1 %v4489_v17, %s5225_s13 }
 0x2ec   : > { %2770 = vpush %v1469_v44 }
 0x2ee   : > { %v1484_v57 = vpop.permute.xlu1 %1483  ;;  %v1505_v32 = vpop.permute.xlu0 %1504 }
 0x2ef   : > { %2772 = vpush %v1484_v57  ;;  %1374 = vrot.lane.b32.xlu0 %v4489_v17, %s5226_s5  ;;  %1403 = vrot.lane.b32.xlu1 %v4498_v18, %s5225_s13 }
 0x2f0   : > { %2774 = vpush %v1491_v22 }
 0x2f2   : > { %v1498_v46 = vpop.permute.xlu1 %1497 }
 0x2f3   : > { %2776 = vpush %v1498_v46  ;;  %1406 = vrot.lane.b32.xlu0 %v4498_v18, %s5226_s5  ;;  %1439 = vrot.lane.b32.xlu1 %v4509_v55, %s5225_s13 }
 0x2f4   : > { %2778 = vpush %v1505_v32 }
 0x2f5   : > { %2780 = vpush %v4257_v59  ;;  %v4550_v59 = vrot.slane %v4535_v34, 3 }
 0x2f6   : > { %2782 = vpush %v4260_v62 }
 0x2f7   : > { %2784 = vpush %v4282_v58  ;;  %1442 = vrot.lane.b32.xlu0 %v4509_v55, %s5226_s5  ;;  %1475 = vrot.lane.b32.xlu1 %v4516_v40, %s5225_s13 }
 0x2f8   : > { %2786 = vpush %v4270_v3  ;;  %v4561_v3 = vrot.slane %v4535_v34, 2 }
 0x2fb   : > { %1723 = vrot.lane.b32.xlu0 %v4543_v23, %s5225_s13  ;;  %1478 = vrot.lane.b32.xlu1 %v4516_v40, %s5226_s5 }
 0x2ff   : > { %v4554_v62 = vpop.permute.xlu0 %1525  ;;  %1737 = vrot.lane.b32.xlu0 %v4550_v59, %s5225_s13  ;;  %1716 = vrot.lane.b32.xlu1 %v4535_v34, %s5225_s13 }
 0x303   : > { %v4563_v58 = vpop.permute.xlu1 %1518  ;;  %1751 = vrot.lane.b32.xlu0 %v4543_v23, %s5227_s29  ;;  %1730 = vrot.lane.b32.xlu1 %v4561_v3, %s5225_s13 }
 0x304   : > { %v4565_v11 = vpop.permute.xlu0 %1532 }
 0x307   : > { %1765 = vrot.lane.b32.xlu0 %v4550_v59, %s5227_s29  ;;  %1744 = vrot.lane.b32.xlu1 %v4535_v34, %s5227_s29 }
 0x308   : > { %v4571_v61 = vpop.permute.xlu1 %1539  ;;  %v1596_v12 = vpop.permute.xlu0 %1595 }
 0x30b   : > { %1779 = vrot.lane.b32.xlu0 %v4543_v23, %s5222_s22  ;;  %1758 = vrot.lane.b32.xlu1 %v4561_v3, %s5227_s29 }
 0x30c   : > { %v1589_v35 = vpop.permute.xlu1 %1588  ;;  %v1610_v21 = vpop.permute.xlu0 %1609 }
 0x30d   : > { %2788 = vpush %v1589_v35 }
 0x30e   : > { %2790 = vpush %v1596_v12 }
 0x30f   : > { %1793 = vrot.lane.b32.xlu0 %v4550_v59, %s5222_s22  ;;  %1772 = vrot.lane.b32.xlu1 %v4535_v34, %s5222_s22 }
 0x310   : > { %v1603_v27 = vpop.permute.xlu1 %1602  ;;  %v1633_v51 = vpop.permute.xlu0 %1632 }
 0x311   : > { %2792 = vpush %v1603_v27 }
 0x312   : > { %2794 = vpush %v1610_v21 }
 0x313   : > { %1849 = vrot.lane.b32.xlu0 %v4586_v52, %s5225_s13  ;;  %1786 = vrot.lane.b32.xlu1 %v4561_v3, %s5222_s22 }
 0x314   : > { %v1626_v63 = vpop.permute.xlu1 %1625  ;;  %v1647_v2 = vpop.permute.xlu0 %1646 }
 0x315   : > { %2796 = vpush %v1626_v63 }
 0x316   : > { %2798 = vpush %v1633_v51 }
 0x317   : > { %1863 = vrot.lane.b32.xlu0 %v4593_v5, %s5225_s13  ;;  %1842 = vrot.lane.b32.xlu1 %v4581_v25, %s5225_s13 }
 0x318   : > { %v1640_v41 = vpop.permute.xlu1 %1639  ;;  %v1670_v0 = vpop.permute.xlu0 %1669 }
 0x319   : > { %2800 = vpush %v1640_v41 }
 0x31a   : > { %2802 = vpush %v1647_v2 }
 0x31b   : > { %1885 = vrot.lane.b32.xlu0 %v4586_v52, %s5227_s29  ;;  %1856 = vrot.lane.b32.xlu1 %v4602_v13, %s5225_s13 }
 0x31c   : > { %v1663_v37 = vpop.permute.xlu1 %1662 }
 0x31d   : > { %2804 = vpush %v1663_v37 }
 0x31e   : > { %2806 = vpush %v1670_v0 }
 0x31f   : > { %1899 = vrot.lane.b32.xlu0 %v4593_v5, %s5227_s29  ;;  %1878 = vrot.lane.b32.xlu1 %v4581_v25, %s5227_s29 }
 0x320   : > { %v1677_v39 = vpop.permute.xlu1 %1676 }
 0x321   : > { %2808 = vpush %v1677_v39 }
 0x323   : > { %1921 = vrot.lane.b32.xlu0 %v4586_v52, %s5222_s22  ;;  %1892 = vrot.lane.b32.xlu1 %v4602_v13, %s5227_s29 }
 0x327   : > { %1935 = vrot.lane.b32.xlu0 %v4593_v5, %s5222_s22  ;;  %1914 = vrot.lane.b32.xlu1 %v4581_v25, %s5222_s22 }
 0x32b   : > { %1928 = vrot.lane.b32.xlu1 %v4602_v13, %s5222_s22  ;;  %s4652_s22 = spop %2710 }
 0x32c   : > { %s4654_s17 = spop %2712  ;;  %v1241_v47 = vstv %s4652_s22 }
 0x32d   : > { %s4656_s18 = spop %2714  ;;  %v1248_v60 = vstv %s4654_s17 }
 0x32e   : > { %s4658_s19 = spop %2716  ;;  %v1255_v49 = vstv %s4656_s18  ;;  %s5228_s18 = smov 15  }
 0x32f   : > { %1956 = vperm.xlu1 %3050, %v4634_v14   ;;  %s4660_s20 = spop %2718  ;;  %v1263_v4 = vstv %s4658_s19  ;;  %s5229_s19 = smov 127  }
 0x330   : > { %s4662_s27 = spop %2720  ;;  %v1269_v45 = vstv %s4660_s20  ;;  %v1265_v41 = vmul.f32 %v1263_v4, %v4489_v17 }
 0x331   : > { %s4664_s28 = spop %2722  ;;  %v1275_v33 = vstv %s4662_s27  ;;  %v1271_v0 = vmul.f32 %v1269_v45, %v4489_v17 }
 0x332   : > { %s4666_s26 = spop %2724  ;;  %v1281_v44 = vstv %s4664_s28 }
 0x333   : > { %3052 = vset.pattern.permute.xlu1 %v3476_v9  ;;  %s4668_s1 = spop %2726  ;;  %v1288_v16 = vstv %s4666_s26 }
 0x334   : > { %s4670_s14 = spop %2728  ;;  %v1295_v46 = vstv %s4668_s1 }
 0x335   : > { %s4672_s12 = spop %2730  ;;  %v1302_v32 = vstv %s4670_s14 }
 0x336   : > { %s4674_s29 = spop %2732  ;;  %v1309_v12 = vstv %s4672_s12 }
 0x337   : > { %s4676_s21 = spop %2734  ;;  %v1316_v35 = vstv %s4674_s29 }
 0x338   : > { %s4678_s23 = spop %2736 }
 0x339   : > { %s4686_s13 = spop %2738 }
 0x33a   : > { %s4691_s5 = spop %2740 }
 0x33b   : > { %s4701_s3 = spop %2742 }
 0x33c   : > { %s4706_s11 = spop %2744 }
 0x33d   : > { %s4719_s25 = spop %2746 }
 0x33e   : > { %s4721_s30 = spop %2748 }
 0x33f   : > { %s4726_s15 = spop %2750 }
 0x340   : > { %s4730_s0 = spop %2752 }
 0x341   : > { %s4736_s2 = spop %2754 }
 0x34d   : > { %v1120_v9 = vpop.permute.xlu0 %1119  ;;  %v1117_v24 = vpop.permute.xlu1 %1116 }
 0x34e   : > { %v1122_v30 = vsel %vm553_vm2, %v1117_v24, %v1120_v9 }
 0x34f   : > { %v1123_v20 = vsel %vm4115_vm3, %v1122_v30, 0.0 }
 0x350   : > { %v1128_v27 = vmul.f32 %v1126_v29, %v1123_v20  ;;  %v1134_v37 = vmul.f32 %v1132_v28, %v1123_v20  ;;  %v1140_v9 = vmul.f32 %v1138_v38, %v1123_v20  ;;  %v1146_v24 = vmul.f32 %v1144_v42, %v1123_v20 }
 0x351   : > { %v1153_v1 = vpop.permute.xlu0 %1152  ;;  %v1150_v26 = vpop.permute.xlu1 %1149  ;;  %v1277_v38 = vmul.f32 %v1275_v33, %v4489_v17  ;;  %v1283_v42 = vmul.f32 %v1281_v44, %v4489_v17  ;;  %v1323_v20 = vstv %s4676_s21  ;;  %v1290_v33 = vmul.f32 %v1288_v16, %v4498_v18  ;;  %s4744_s21 = spop %2756 }
 0x352   : > { %v1155_v53 = vsel %vm553_vm2, %v1150_v26, %v1153_v1  ;;  %v1297_v44 = vmul.f32 %v1295_v46, %v4498_v18  ;;  %s4747_s4 = spop %2758  ;;  %v1311_v16 = vmul.f32 %v1309_v12, %v4498_v18  ;;  %v1318_v46 = vmul.f32 %v1316_v35, %v4509_v55 }
 0x353   : > { %v1156_v8 = vsel %vm4115_vm3, %v1155_v53, 0.0  ;;  %v1351_v35 = vstv %s4701_s3 }
 0x354   : > { %v1162_v22 = vmul.f32 %v1160_v50, %v1156_v8  ;;  %v1169_v51 = vmul.f32 %v1167_v36, %v1156_v8  ;;  %v1176_v63 = vmul.f32 %v1174_v43, %v1156_v8  ;;  %v1183_v2 = vmul.f32 %v1181_v10, %v1156_v8 }
 0x355   : > { %v1190_v57 = vpop.permute.xlu0 %1189  ;;  %v1187_v21 = vpop.permute.xlu1 %1186 }
 0x356   : > { %v1192_v39 = vsel %vm553_vm2, %v1187_v21, %v1190_v57  ;;  %v1163_v50 = vadd.f32 %v1162_v22, %v1128_v27  ;;  %v1170_v28 = vadd.f32 %v1169_v51, %v1134_v37  ;;  %v1177_v53 = vadd.f32 %v1176_v63, %v1140_v9 }
 0x357   : > { %v1193_v30 = vsel %vm4115_vm3, %v1192_v39, 0.0  ;;  %v1184_v4 = vadd.f32 %v1183_v2, %v1146_v24  ;;  %v1304_v2 = vmul.f32 %v1302_v32, %v4498_v18  ;;  %v1330_v37 = vstv %s4678_s23  ;;  %s4755_s23 = spop %2760 }
 0x358   : > { %v1199_v36 = vmul.f32 %v1197_v15, %v1193_v30  ;;  %v1206_v43 = vmul.f32 %v1204_v48, %v1193_v30  ;;  %v1213_v10 = vmul.f32 %v1211_v6, %v1193_v30  ;;  %v1220_v1 = vmul.f32 %v1218_v19, %v1193_v30  ;;  %s4762_s6 = spop %2762 }
 0x359   : > { %v1227_v29 = vpop.permute.xlu0 %1226  ;;  %v1224_v26 = vpop.permute.xlu1 %1223  ;;  %v1325_v32 = vmul.f32 %v1323_v20, %v4509_v55  ;;  %v1337_v39 = vstv %s4686_s13  ;;  %v1332_v12 = vmul.f32 %v1330_v37, %v4509_v55  ;;  %s4767_s13 = spop %2764 }
 0x35a   : > { %v1229_v45 = vsel %vm553_vm2, %v1224_v26, %v1227_v29  ;;  %v1200_v8 = vadd.f32 %v1199_v36, %v1163_v50  ;;  %v1207_v15 = vadd.f32 %v1206_v43, %v1170_v28  ;;  %v1214_v48 = vadd.f32 %v1213_v10, %v1177_v53 }
 0x35b   : > { %v1221_v6 = vadd.f32 %v1220_v1, %v1184_v4  ;;  %v1230_v19 = vsel %vm4115_vm3, %v1229_v45, 0.0  ;;  %v1344_v29 = vstv %s4691_s5  ;;  %v1358_v36 = vstv %s4706_s11  ;;  %s4770_s5 = spop %2766 }
 0x35c   : > { %v1236_v57 = vmul.f32 %v1234_v31, %v1230_v19  ;;  %v1243_v21 = vmul.f32 %v1241_v47, %v1230_v19  ;;  %v1250_v27 = vmul.f32 %v1248_v60, %v1230_v19  ;;  %v1257_v51 = vmul.f32 %v1255_v49, %v1230_v19  ;;  %s4780_s7 = spop %2768 }
 0x35d   : > { %v1684_v22 = vpop.permute.xlu0 %1683  ;;  %v1372_v63 = vpop.permute.xlu1 %1371  ;;  %v1365_v1 = vstv %s4719_s25  ;;  %v1346_v28 = vmul.f32 %v1344_v29, %v4516_v40  ;;  %v1360_v20 = vmul.f32 %v1358_v36, %v4516_v40  ;;  %v1393_v19 = vstv %s4730_s0  ;;  %s4783_s8 = spop %2770 }
 0x35e   : > { %2810 = vpush %v1684_v22  ;;  %v1237_v31 = vadd.f32 %v1236_v57, %v1200_v8  ;;  %v1244_v47 = vadd.f32 %v1243_v21, %v1207_v15  ;;  %v1251_v60 = vadd.f32 %v1250_v27, %v1214_v48  ;;  %v1258_v49 = vadd.f32 %v1257_v51, %v1221_v6  ;;  %s4789_s9 = spop %2772 }
 0x35f   : > { %2812 = vpush %v4535_v34  ;;  %v1381_v8 = vstv %s4721_s30  ;;  %v1367_v48 = vmul.f32 %v1365_v1, %v4516_v40  ;;  %v1387_v6 = vstv %s4726_s15  ;;  %v1399_v57 = vstv %s4736_s2  ;;  %s4795_s10 = spop %2774 }
 0x360   : > { %2814 = vpush %v4543_v23  ;;  %v1266_v9 = vadd.f32 %v1265_v41, %v1237_v31  ;;  %v1272_v24 = vadd.f32 %v1271_v0, %v1244_v47  ;;  %v1278_v50 = vadd.f32 %v1277_v38, %v1251_v60  ;;  %v1284_v30 = vadd.f32 %v1283_v42, %v1258_v49  ;;  %s2777_s22 = spop %2776 }
 0x361   : > { %2816 = vpush %v4561_v3  ;;  %v1375_v34 = vpop.permute.xlu0 %1374  ;;  %v1404_v23 = vpop.permute.xlu1 %1403  ;;  %v1339_v0 = vmul.f32 %v1337_v39, %v4509_v55  ;;  %v1353_v42 = vmul.f32 %v1351_v35, %v4516_v40  ;;  %v1428_v47 = vstv %s4755_s23  ;;  %v1457_v29 = vstv %s4770_s5  ;;  %s2779_s17 = spop %2778 }
 0x362   : > { %2818 = vpush %v4550_v59  ;;  %v1291_v43 = vadd.f32 %v1290_v33, %v1266_v9  ;;  %v1298_v3 = vadd.f32 %v1297_v44, %v1272_v24  ;;  %v1305_v10 = vadd.f32 %v1304_v2, %v1278_v50  ;;  %v1377_v41 = vsel %vm564_vm4, %v1372_v63, %v1375_v34 }
 0x363   : > { %v1312_v59 = vadd.f32 %v1311_v16, %v1284_v30  ;;  %v1378_v15 = vsel %vm543_vm5, %v1377_v41, 0.0  ;;  %v1414_v33 = vstv %s4744_s21  ;;  %v1421_v44 = vstv %s4747_s4 }
 0x364   : > { %v1319_v53 = vadd.f32 %v1318_v46, %v1291_v43  ;;  %v1326_v4 = vadd.f32 %v1325_v32, %v1298_v3  ;;  %v1333_v45 = vadd.f32 %v1332_v12, %v1305_v10  ;;  %v1383_v37 = vmul.f32 %v1381_v8, %v1378_v15 }
 0x365   : > { %v1407_v26 = vpop.permute.xlu0 %1406  ;;  %v1440_v38 = vpop.permute.xlu1 %1439  ;;  %v1340_v21 = vadd.f32 %v1339_v0, %v1312_v59  ;;  %v1389_v60 = vmul.f32 %v1387_v6, %v1378_v15  ;;  %v1435_v46 = vstv %s4762_s6  ;;  %v1395_v39 = vmul.f32 %v1393_v19, %v1378_v15 }
 0x366   : > { %v1347_v22 = vadd.f32 %v1346_v28, %v1319_v53  ;;  %v1354_v27 = vadd.f32 %v1353_v42, %v1326_v4  ;;  %v1409_v51 = vsel %vm564_vm4, %v1404_v23, %v1407_v26  ;;  %v1361_v2 = vadd.f32 %v1360_v20, %v1333_v45 }
 0x367   : > { %v1410_v49 = vsel %vm543_vm5, %v1409_v51, 0.0  ;;  %v1368_v9 = vadd.f32 %v1367_v48, %v1340_v21  ;;  %v1450_v12 = vstv %s4767_s13  ;;  %v1464_v3 = vstv %s4780_s7 }
 0x368   : > { %v1384_v32 = vadd.f32 %v1383_v37, %v1347_v22  ;;  %v1416_v34 = vmul.f32 %v1414_v33, %v1410_v49  ;;  %v1390_v24 = vadd.f32 %v1389_v60, %v1354_v27  ;;  %v1423_v50 = vmul.f32 %v1421_v44, %v1410_v49 }
 0x369   : > { %v1443_v63 = vpop.permute.xlu0 %1442  ;;  %v1476_v31 = vpop.permute.xlu1 %1475  ;;  %v1396_v35 = vadd.f32 %v1395_v39, %v1361_v2  ;;  %v1430_v36 = vmul.f32 %v1428_v47, %v1410_v49  ;;  %v1401_v10 = vmul.f32 %v1399_v57, %v1378_v15  ;;  %v1486_v1 = vstv %s4789_s9 }
 0x36a   : > { %v1445_v16 = vsel %vm564_vm4, %v1440_v38, %v1443_v63  ;;  %v1493_v59 = vstv %s4795_s10  ;;  %v1417_v26 = vadd.f32 %v1416_v34, %v1384_v32  ;;  %v1500_v53 = vstv %s2777_s22 }
 0x36b   : > { %v1446_v30 = vsel %vm543_vm5, %v1445_v16, 0.0  ;;  %v1402_v4 = vadd.f32 %v1401_v10, %v1368_v9  ;;  %v1424_v45 = vadd.f32 %v1423_v50, %v1390_v24  ;;  %v1431_v20 = vadd.f32 %v1430_v36, %v1396_v35 }
 0x36c   : > { %v1452_v41 = vmul.f32 %v1450_v12, %v1446_v30  ;;  %v1459_v0 = vmul.f32 %v1457_v29, %v1446_v30  ;;  %v1466_v38 = vmul.f32 %v1464_v3, %v1446_v30  ;;  %v1437_v8 = vmul.f32 %v1435_v46, %v1410_v49 }
 0x36d   : > { %v1724_v23 = vpop.permute.xlu0 %1723  ;;  %v1479_v43 = vpop.permute.xlu1 %1478  ;;  %v1471_v27 = vstv %s4783_s8  ;;  %v1507_v37 = vstv %s2779_s17 }
 0x36e   : > { %v1481_v28 = vsel %vm564_vm4, %v1476_v31, %v1479_v43  ;;  %v1453_v48 = vadd.f32 %v1452_v41, %v1417_v26  ;;  %v1460_v19 = vadd.f32 %v1459_v0, %v1424_v45  ;;  %v1467_v51 = vadd.f32 %v1466_v38, %v1431_v20  ;;  %v1980_v0 = vld [vmem:[#allocation17 + $0x18] sm:$0xff]  ;;  %v1976_v38 = vld [vmem:[#allocation17] sm:$0xff] }
 0x36f   : > { %v1482_v6 = vsel %vm543_vm5, %v1481_v28, 0.0  ;;  %v1473_v63 = vmul.f32 %v1471_v27, %v1446_v30  ;;  %v1438_v31 = vadd.f32 %v1437_v8, %v1402_v4  ;;  %v3478_v26 = vmov 0.0|0.0  }
 0x370   : > { %v1488_v22 = vmul.f32 %v1486_v1, %v1482_v6  ;;  %v1495_v57 = vmul.f32 %v1493_v59, %v1482_v6  ;;  %v1502_v21 = vmul.f32 %v1500_v53, %v1482_v6  ;;  %v1509_v49 = vmul.f32 %v1507_v37, %v1482_v6  ;;  %2552 = vmatprep.subr.bf16.mxu0 %v3478_v26 }
 0x371   : > { %v1738_v42 = vpop.permute.xlu0 %1737  ;;  %v1717_v15 = vpop.permute.xlu1 %1716  ;;  %v1474_v32 = vadd.f32 %v1473_v63, %v1438_v31  ;;  %v3480_v28 = vmov 0.0   ;;  %2555 = vmatprep.subr.bf16.mxu1 %v3478_v26 }
 0x372   : > { %2820 = vpush %v1717_v15  ;;  %v1489_v33 = vadd.f32 %v1488_v22, %v1453_v48  ;;  %v1496_v44 = vadd.f32 %v1495_v57, %v1460_v19  ;;  %v1503_v60 = vadd.f32 %v1502_v21, %v1467_v51  ;;  %2528 = vmatprep.mubr.msk.f32.mxu0 %vm3479_vm6, %v3480_v28 }
 0x373   : > { %2822 = vpush %v1724_v23  ;;  %v1510_v24 = vadd.f32 %v1509_v49, %v1474_v32  ;;  %2535 = vmatprep.mubr.msk.f32.mxu1 %vm3479_vm6, %v3480_v28 }
 0x374   : > { %v1521_v16 = vadd.f32 %v4563_v58, %v1489_v33  ;;  %v1528_v46 = vadd.f32 %v4554_v62, %v1496_v44  ;;  %v1535_v23 = vadd.f32 %v4565_v11, %v1503_v60 }
 0x375   : > { %v1752_v2 = vpop.permute.xlu0 %1751  ;;  %v1731_v47 = vpop.permute.xlu1 %1730  ;;  %v1542_v29 = vadd.f32 %v4571_v61, %v1510_v24 }
 0x376   : > { %2824 = vpush %v1731_v47  ;;  %v1522_v39 = vadd.f32 %v1521_v16, %v4489_v17  ;;  %v1529_v30 = vadd.f32 %v1528_v46, %v4498_v18  ;;  %v1536_v12 = vadd.f32 %v1535_v23, %v4509_v55 }
 0x377   : > { %2826 = vpush %v1738_v42  ;;  %v1543_v36 = vadd.f32 %v1542_v29, %v4516_v40  ;;  %v1977_v42 = vld [vmem:[#allocation17 + $0x8] sm:$0xff] }
 0x378   : > { %v4811_v50 = vmax.f32 %v1522_v39, 0.0  ;;  %v4819_v17 = vmax.f32 %v1529_v30, 0.0  ;;  %v4827_v35 = vmax.f32 %v1536_v12, 0.0  ;;  %v2556_v20 = vpack.c.bf16 %v1977_v42, %v1976_v38 }
 0x379   : > { %v1766_v34 = vpop.permute.xlu0 %1765  ;;  %v1745_v9 = vpop.permute.xlu1 %1744  ;;  %v4834_v43 = vmax.f32 %v1543_v36, 0.0 }
 0x37a   : > { %2828 = vpush %v1745_v9  ;;  %1550 = vrot.lane.b32.xlu0 %v4811_v50, %s5223_s16  ;;  %1547 = vrot.lane.b32.xlu1 %v4811_v50, %s5224_s24 }
 0x37b   : > { %2830 = vpush %v1752_v2  ;;  %2557 = vmatpush3.bf16.msra.mxu1 %v2556_v20 }
 0x37c   : > { %2561 = vmatprep.subr.bf16.mxu1 %v3478_v26 }
 0x37d   : > { %v1780_v62 = vpop.permute.xlu0 %1779  ;;  %v1759_v58 = vpop.permute.xlu1 %1758 }
 0x37e   : > { %2832 = vpush %v1759_v58  ;;  %1583 = vrot.lane.b32.xlu0 %v4819_v17, %s5223_s16  ;;  %1580 = vrot.lane.b32.xlu1 %v4819_v17, %s5224_s24 }
 0x37f   : > { %2834 = vpush %v1766_v34 }
 0x381   : > { %v1794_v18 = vpop.permute.xlu0 %1793  ;;  %v1773_v11 = vpop.permute.xlu1 %1772 }
 0x382   : > { %2836 = vpush %v1773_v11  ;;  %1620 = vrot.lane.b32.xlu0 %v4827_v35, %s5223_s16  ;;  %1617 = vrot.lane.b32.xlu1 %v4827_v35, %s5224_s24 }
 0x383   : > { %2838 = vpush %v1780_v62 }
 0x385   : > { %v1850_v55 = vpop.permute.xlu0 %1849  ;;  %v1787_v61 = vpop.permute.xlu1 %1786 }
 0x386   : > { %2840 = vpush %v1787_v61  ;;  %1657 = vrot.lane.b32.xlu0 %v4834_v43, %s5223_s16  ;;  %1654 = vrot.lane.b32.xlu1 %v4834_v43, %s5224_s24  ;;  %s4869_s16 = spop %2780 }
 0x387   : > { %2842 = vpush %v1794_v18  ;;  %s4871_s24 = spop %2782  ;;  %v1557_v48 = vstv %s4869_s16 }
 0x388   : > { %2844 = vpush %v4581_v25  ;;  %s4873_s20 = spop %2784  ;;  %v1563_v6 = vstv %s4871_s24 }
 0x389   : > { %v1864_v40 = vpop.permute.xlu0 %1863  ;;  %v1843_v3 = vpop.permute.xlu1 %1842  ;;  %2846 = vpush %v4586_v52  ;;  %s4875_s27 = spop %2786  ;;  %v1569_v15 = vstv %s4873_s20 }
 0x38a   : > { %2848 = vpush %v4602_v13  ;;  %1805 = vrot.lane.b32.xlu0 %v4811_v50, %s5228_s18  ;;  %1802 = vrot.lane.b32.xlu1 %v4811_v50, %s5229_s19  ;;  %v1979_v13 = vld [vmem:[#allocation17 + $0x10] sm:$0xff]  ;;  %s4877_s28 = spop %2788  ;;  %v1575_v19 = vstv %s4875_s27 }
 0x38b   : > { %2850 = vpush %v4593_v5  ;;  %v2553_v59 = vpack.c.bf16 %v1980_v0, %v1979_v13  ;;  %s4879_s26 = spop %2790  ;;  %v1591_v22 = vstv %s4877_s28 }
 0x38c   : > { %2852 = vpush %v1843_v3  ;;  %s4881_s1 = spop %2792  ;;  %v1598_v57 = vstv %s4879_s26 }
 0x38d   : > { %v1886_v10 = vpop.permute.xlu0 %1885  ;;  %v1857_v41 = vpop.permute.xlu1 %1856  ;;  %2854 = vpush %v1850_v55  ;;  %2554 = vmatpush3.bf16.msra.mxu0 %v2553_v59  ;;  %s4883_s14 = spop %2794  ;;  %v1605_v21 = vstv %s4881_s1 }
 0x38e   : > { %2856 = vpush %v1857_v41  ;;  %1837 = vrot.lane.b32.xlu0 %v4819_v17, %s5228_s18  ;;  %1834 = vrot.lane.b32.xlu1 %v4819_v17, %s5229_s19  ;;  %s4885_s12 = spop %2796  ;;  %v1612_v27 = vstv %s4883_s14 }
 0x38f   : > { %2858 = vpush %v1864_v40  ;;  %2558 = vmatprep.subr.bf16.mxu0 %v3478_v26  ;;  %s4887_s29 = spop %2798  ;;  %v1628_v51 = vstv %s4885_s12 }
 0x390   : > { %s4889_s3 = spop %2800  ;;  %v1635_v33 = vstv %s4887_s29 }
 0x391   : > { %v1900_v25 = vpop.permute.xlu0 %1899  ;;  %v1879_v52 = vpop.permute.xlu1 %1878  ;;  %s4891_s11 = spop %2802  ;;  %v1642_v44 = vstv %s4889_s3 }
 0x392   : > { %2860 = vpush %v1879_v52  ;;  %1873 = vrot.lane.b32.xlu0 %v4827_v35, %s5228_s18  ;;  %1870 = vrot.lane.b32.xlu1 %v4827_v35, %s5229_s19  ;;  %s4893_s25 = spop %2804  ;;  %v1649_v2 = vstv %s4891_s11 }
 0x393   : > { %2862 = vpush %v1886_v10  ;;  %s4895_s30 = spop %2806  ;;  %v1665_v32 = vstv %s4893_s25 }
 0x394   : > { %s4897_s15 = spop %2808  ;;  %v1672_v39 = vstv %s4895_s30 }
 0x395   : > { %v1893_v5 = vpop.permute.xlu1 %1892  ;;  %v1922_v1 = vpop.permute.xlu0 %1921  ;;  %s4899_s0 = spop %2810  ;;  %v1679_v24 = vstv %s4897_s15 }
 0x396   : > { %2864 = vpush %v1893_v5  ;;  %1906 = vrot.lane.b32.xlu0 %v4834_v43, %s5229_s19  ;;  %1909 = vrot.lane.b32.xlu1 %v4834_v43, %s5228_s18  ;;  %s4901_s2 = spop %2812  ;;  %v1686_v30 = vstv %s4899_s0 }
 0x397   : > { %2866 = vpush %v1900_v25  ;;  %s4903_s21 = spop %2814  ;;  %v1694_v37 = vstv %s4901_s2 }
 0x398   : > { %s4905_s4 = spop %2816  ;;  %v1700_v60 = vstv %s4903_s21  ;;  %v4964_v23 = vmul.f32 %v1694_v37, %v4811_v50  ;;  %s5230_s21 = sld [smem:[#allocation32_spill]] }
 0x399   : > { %v1915_v53 = vpop.permute.xlu1 %1914  ;;  %v1936_v4 = vpop.permute.xlu0 %1935  ;;  %s4907_s23 = spop %2818  ;;  %v1706_v49 = vstv %s4905_s4  ;;  %v4967_v58 = vmul.f32 %v1700_v60, %v4811_v50  ;;  %s5231_s4 = sld [smem:[#allocation38_spill]] }
 0x39a   : > { %2868 = vpush %v1915_v53  ;;  %1949 = vperm.xlu0 %3051, %v4634_v14   ;;  %1963 = vperm.xlu1 %3052, %v4634_v14   ;;  %v1712_v16 = vstv %s4907_s23  ;;  %v4970_v12 = vmul.f32 %v1706_v49, %v4811_v50  ;;  %s5232_s23 = sld [smem:[#allocation36_spill]] }
 0x39b   : > { %2870 = vpush %v1922_v1  ;;  %v4973_v29 = vmul.f32 %v1712_v16, %v4811_v50 }
 0x39d   : > { %v1929_v45 = vpop.permute.xlu1 %1928 }
 0x39e   : > { %2872 = vpush %v1929_v45  ;;  %3053 = vset.pattern.permute.xlu1 %v3475_v7  ;;  %3054 = vset.pattern.permute.xlu0 %v3475_v7 }
 0x39f   : > { %2874 = vpush %v1936_v4  ;;  %1970 = vperm.xlu1 %3053, %v4634_v14  }
 0x3a0   : > { %p5235_p1 = scmp.ne.s32.totalorder %s5232_s23, 0 }
 0x3a3   : > { %s4909_s6 = spop %2820 }
 0x3a4   : > { %s4911_s13 = spop %2822  ;;  %v1719_v18 = vstv %s4909_s6  ;;  %s2509_s6 = sshll.u32 %s5230_s21, 7 }
 0x3a5   : > { %v1726_v10 = vstv %s4911_s13  ;;  %s5233_s13 = sshll.u32 %s5231_s4, 3 }
 0x3a7   : > { %s4913_s5 = spop %2824 }
 0x3a8   : > { %s4915_s7 = spop %2826  ;;  %v1733_v41 = vstv %s4913_s5  ;;  %s534_s5 = scalar_lea.vmem [#allocation20], %s5233_s13 }
 0x3a9   : > { %v1735_v60 = vmul.f32 %v1733_v41, %v4819_v17 }
 0x3ab   : > { %s4917_s8 = spop %2828 }
 0x3ac   : > { %s4921_s9 = spop %2830 }
 0x3ae   : > { %v4919_v7 = vpop.permute.xlu1 %1956 }
 0x3af   : > { %s4923_s10 = spop %2832 }
 0x3b0   : > { %s4925_s22 = spop %2834  ;;  %v1761_v49 = vstv %s4923_s10  ;;  %s5234_s10 = sld [smem:[#allocation50_spill]] }
 0x3b3   : > { %s4927_s17 = spop %2836 }
 0x3b4   : > { %s4935_s18 = spop %2838 }
 0x3b7   : > { %s4940_s19 = spop %2840 }
 0x3b8   : > { %s4950_s16 = spop %2842  ;;  %v1789_v41 = vstv %s4940_s19  ;;  %s3481_s19 = smov [#allocation20]  }
 0x3b9   : > { %s4959_s24 = spop %2844 }
 0x3ba   : > { %s4976_s20 = spop %2846 }
 0x3bb   : > { %s4981_s27 = spop %2848 }
 0x3bc   : > { %s4985_s28 = spop %2850 }
 0x3bd   : > { %s4988_s26 = spop %2852 }
 0x3be   : > { %s4993_s1 = spop %2854 }
 0x3bf   : > { %s4997_s14 = spop %2856 }
 0x3c0   : > { %s5003_s12 = spop %2858 }
 0x3c3   : > { %s5009_s29 = spop %2860 }
 0x3c4   : > { %s5019_s3 = spop %2862 }
 0x3c7   : > { %s5027_s11 = spop %2864 }
 0x3c8   : > { %s5034_s25 = spop %2866 }
 0x3cb   : > { %s5038_s30 = spop %2868 }
 0x3cc   : > { %s2871_s15 = spop %2870 }
 0x3cf   : > { %s2873_s0 = spop %2872 }
 0x3d0   : > { %v1931_v56 = vstv %s2873_s0  ;;  %s2875_s2 = spop %2874 }
 0x3ec   : > { %v1551_v14 = vpop.permute.xlu0 %1550  ;;  %v1548_v8 = vpop.permute.xlu1 %1547 }
 0x3ed   : > { %v1553_v63 = vsel %vm553_vm2, %v1548_v8, %v1551_v14 }
 0x3ee   : > { %v1554_v34 = vsel %vm4115_vm3, %v1553_v63, 0.0 }
 0x3ef   : > { %v1559_v55 = vmul.f32 %v1557_v48, %v1554_v34  ;;  %v1565_v25 = vmul.f32 %v1563_v6, %v1554_v34  ;;  %v1571_v5 = vmul.f32 %v1569_v15, %v1554_v34  ;;  %v1577_v13 = vmul.f32 %v1575_v19, %v1554_v34 }
 0x3f0   : > { %v1584_v31 = vpop.permute.xlu0 %1583  ;;  %v1581_v47 = vpop.permute.xlu1 %1580  ;;  %v1740_v48 = vstv %s4915_s7  ;;  %v1747_v6 = vstv %s4917_s8  ;;  %v1754_v15 = vstv %s4921_s9  ;;  %s2306_s7 = sshll.u32 %s534_s5, 4  ;;  %s5079_s7 = int_to_ptr.vmem [resolvable:$true] %s2306_s7 }
 0x3f1   : > { %v1586_v46 = vsel %vm553_vm2, %v1581_v47, %v1584_v31  ;;  %v1721_v31 = vmul.f32 %v1719_v18, %v4819_v17  ;;  %v1728_v47 = vmul.f32 %v1726_v10, %v4819_v17  ;;  %v1749_v34 = vmul.f32 %v1747_v6, %v4827_v35 }
 0x3f2   : > { %v1587_v9 = vsel %vm4115_vm3, %v1586_v46, 0.0 }
 0x3f3   : > { %v1593_v62 = vmul.f32 %v1591_v22, %v1587_v9  ;;  %v1600_v61 = vmul.f32 %v1598_v57, %v1587_v9  ;;  %v1607_v40 = vmul.f32 %v1605_v21, %v1587_v9  ;;  %v1614_v3 = vmul.f32 %v1612_v27, %v1587_v9 }
 0x3f4   : > { %v1621_v11 = vpop.permute.xlu0 %1620  ;;  %v1618_v36 = vpop.permute.xlu1 %1617  ;;  %v1756_v9 = vmul.f32 %v1754_v15, %v4827_v35  ;;  %v1796_v15 = vstv %s4950_s16  ;;  %s3369_s16 = sshll.u32 %s3481_s19, 4  ;;  %s3370_s16 = int_to_ptr.vmem [resolvable:$false] %s3369_s16 }
 0x3f5   : > { %v1623_v52 = vsel %vm553_vm2, %v1618_v36, %v1621_v11  ;;  %v1594_v0 = vadd.f32 %v1593_v62, %v1559_v55  ;;  %v1601_v42 = vadd.f32 %v1600_v61, %v1565_v25  ;;  %v1608_v20 = vadd.f32 %v1607_v40, %v1571_v5  ;;  %p3372_p13 = scmp.lt.s32.totalorder %s5079_s7, %s3370_s16 }
 0x3f6   : > { %v1624_v1 = vsel %vm4115_vm3, %v1623_v52, 0.0  ;;  %v1615_v14 = vadd.f32 %v1614_v3, %v1577_v13  ;;  %v1763_v61 = vmul.f32 %v1761_v49, %v4827_v35  ;;  %v1768_v40 = vstv %s4925_s22  ;;  %s5077_s22 = scalar_lea.hbm %s5234_s10, %s2509_s6 }
 0x3f7   : > { %v1630_v59 = vmul.f32 %v1628_v51, %v1624_v1  ;;  %v1637_v26 = vmul.f32 %v1635_v33, %v1624_v1  ;;  %v1644_v53 = vmul.f32 %v1642_v44, %v1624_v1  ;;  %v1651_v4 = vmul.f32 %v1649_v2, %v1624_v1 }
 0x3f8   : > { %v1658_v45 = vpop.permute.xlu0 %1657  ;;  %v1655_v38 = vpop.permute.xlu1 %1654  ;;  %v1782_v3 = vstv %s4935_s18  ;;  %v1818_v5 = vstv %s4976_s20  ;;  %v1770_v6 = vmul.f32 %v1768_v40, %v4827_v35  ;;  %s3365_s18 = scalar_lea.vmem %s5079_s7, 128 }
 0x3f9   : > { %v1660_v8 = vsel %vm553_vm2, %v1655_v38, %v1658_v45  ;;  %v1631_v19 = vadd.f32 %v1630_v59, %v1594_v0  ;;  %v1638_v22 = vadd.f32 %v1637_v26, %v1601_v42  ;;  %v1645_v57 = vadd.f32 %v1644_v53, %v1608_v20  ;;  %p3366_p4 = scmp.ne.s32.totalorder %s5079_s7, %s3365_s18 }
 0x3fa   : > { %v1652_v21 = vadd.f32 %v1651_v4, %v1615_v14  ;;  %v1661_v27 = vsel %vm4115_vm3, %v1660_v8, 0.0  ;;  %v1791_v4 = vmul.f32 %v1789_v41, %v4834_v43  ;;  %v1852_v42 = vstv %s4993_s1 }
 0x3fb   : > { %v1667_v51 = vmul.f32 %v1665_v32, %v1661_v27  ;;  %v1674_v63 = vmul.f32 %v1672_v39, %v1661_v27  ;;  %v1681_v33 = vmul.f32 %v1679_v24, %v1661_v27  ;;  %v1688_v44 = vmul.f32 %v1686_v30, %v1661_v27  ;;  %p3367_p3 = pnand %p3366_p4, %p5235_p1 }
 0x3fc   : > { %v1806_v2 = vpop.permute.xlu0 %1805  ;;  %v1803_v37 = vpop.permute.xlu1 %1802  ;;  %v1742_v39 = vmul.f32 %v1740_v48, %v4819_v17  ;;  %v1775_v24 = vstv %s4927_s17  ;;  %v1812_v20 = vstv %s4959_s24  ;;  %v1866_v41 = vstv %s5003_s12  ;;  %s2293_s17 = scalar_lea.sflag [#allocation4], %s5231_s4  ;;  %s3371_s24 = scalar_lea.vmem %s3370_s16, 256 }
 0x3fd   : > { %v1668_v16 = vadd.f32 %v1667_v51, %v1631_v19  ;;  %v1675_v46 = vadd.f32 %v1674_v63, %v1638_v22  ;;  %v1682_v54 = vadd.f32 %v1681_v33, %v1645_v57  ;;  %v1689_v32 = vadd.f32 %v1688_v44, %v1652_v21  ;;  %p3368_p9 = pneg %p3367_p3  ;;  %p3373_p0 = scmp.lt.s32.totalorder %s3371_s24, %s3365_s18 }
 0x3fe   : > { %v1808_v11 = vsel %vm564_vm4, %v1803_v37, %v1806_v2  ;;  %v1777_v52 = vmul.f32 %v1775_v24, %v4834_v43  ;;  %v1824_v22 = vstv %s4981_s27  ;;  %v1888_v51 = vstv %s5019_s3 }
 0x3ff   : > { %v1697_v30 = vadd.f32 %v4964_v23, %v1668_v16  ;;  %v1703_v62 = vadd.f32 %v4967_v58, %v1675_v46  ;;  %v1709_v18 = vadd.f32 %v4970_v12, %v1682_v54  ;;  %v1715_v10 = vadd.f32 %v4973_v29, %v1689_v32  ;;  %p3374_p2 = por %p3373_p0, %p3372_p13 }
 0x400   : > { %v1838_v36 = vpop.permute.xlu0 %1837  ;;  %v1835_v55 = vpop.permute.xlu1 %1834  ;;  %v1809_v12 = vsel %vm543_vm5, %v1808_v11, 0.0  ;;  %v1784_v29 = vmul.f32 %v1782_v3, %v4834_v43  ;;  %v1859_v46 = vstv %s4997_s14  ;;  %v1924_v32 = vstv %s2871_s15 }
 0x401   : > { %v1722_v25 = vadd.f32 %v1721_v31, %v1697_v30  ;;  %v1729_v23 = vadd.f32 %v1728_v47, %v1703_v62  ;;  %v1736_v58 = vadd.f32 %v1735_v60, %v1709_v18  ;;  %v1840_v13 = vsel %vm564_vm4, %v1835_v55, %v1838_v36  ;;  %p3375_p8 = pnand %p3374_p2, %p3368_p9 }
 0x402   : > { %v1743_v45 = vadd.f32 %v1742_v39, %v1715_v10  ;;  %v1841_v38 = vsel %vm543_vm5, %v1840_v13, 0.0  ;;  %v1820_v8 = vmul.f32 %v1818_v5, %v1809_v12  ;;  %v1814_v44 = vmul.f32 %v1812_v20, %v1809_v12 }
 0x403   : > { %v1750_v0 = vadd.f32 %v1749_v34, %v1722_v25  ;;  %v1757_v1 = vadd.f32 %v1756_v9, %v1729_v23  ;;  %v1764_v59 = vadd.f32 %v1763_v61, %v1736_v58  ;;  %v1854_v27 = vmul.f32 %v1852_v42, %v1841_v38 }
 0x404   : > { %v1874_v26 = vpop.permute.xlu0 %1873  ;;  %v1871_v53 = vpop.permute.xlu1 %1870  ;;  %v1771_v2 = vadd.f32 %v1770_v6, %v1743_v45  ;;  %v1798_v47 = vmul.f32 %v1796_v15, %v4834_v43  ;;  %v1826_v60 = vmul.f32 %v1824_v22, %v1809_v12  ;;  %v1830_v34 = vstv %s4985_s28 }
 0x405   : > { %v1785_v14 = vadd.f32 %v1784_v29, %v1757_v1  ;;  %v1876_v48 = vsel %vm564_vm4, %v1871_v53, %v1874_v26  ;;  %v1778_v19 = vadd.f32 %v1777_v52, %v1750_v0  ;;  %v1792_v21 = vadd.f32 %v1791_v4, %v1764_v59  ;;  %v2129_v29 = vld [vmem:[#allocation17 + $0x20] sm:$0xff]  ;;  %v2130_v0 = vld [vmem:[#allocation17 + $0x28] sm:$0xff] }
 0x406   : > { %v1877_v37 = vsel %vm543_vm5, %v1876_v48, 0.0  ;;  %v1845_v9 = vstv %s4988_s26  ;;  %v1799_v30 = vadd.f32 %v1798_v47, %v1771_v2  ;;  %v1861_v11 = vmul.f32 %v1859_v46, %v1841_v38 }
 0x407   : > { %v1821_v57 = vadd.f32 %v1820_v8, %v1785_v14  ;;  %v1815_v16 = vadd.f32 %v1814_v44, %v1778_v19  ;;  %v1890_v54 = vmul.f32 %v1888_v51, %v1877_v37  ;;  %v1827_v39 = vadd.f32 %v1826_v60, %v1792_v21  ;;  %v2206_v21 = vld [vmem:[#allocation17 + $0x30] sm:$0xff] }
 0x408   : > { %v1907_v63 = vpop.permute.xlu0 %1906  ;;  %v1910_v33 = vpop.permute.xlu1 %1909  ;;  %v1847_v62 = vmul.f32 %v1845_v9, %v1841_v38  ;;  %v1881_v36 = vstv %s5009_s29  ;;  %v1832_v61 = vmul.f32 %v1830_v34, %v1809_v12  ;;  %v1895_v3 = vstv %s5027_s11 }
 0x409   : > { %v1912_v31 = vsel %vm564_vm4, %v1907_v63, %v1910_v33  ;;  %v1855_v49 = vadd.f32 %v1854_v27, %v1821_v57  ;;  %v1862_v10 = vadd.f32 %v1861_v11, %v1827_v39  ;;  %v1883_v58 = vmul.f32 %v1881_v36, %v1877_v37  ;;  %v2207_v27 = vld [vmem:[#allocation17 + $0x38] sm:$0xff] }
 0x40a   : > { %v1913_v24 = vsel %vm543_vm5, %v1912_v31, 0.0  ;;  %v1848_v40 = vadd.f32 %v1847_v62, %v1815_v16  ;;  %v1833_v23 = vadd.f32 %v1832_v61, %v1799_v30  ;;  %v1917_v52 = vstv %s5038_s30 }
 0x40b   : > { %v1891_v18 = vadd.f32 %v1890_v54, %v1855_v49  ;;  %v1926_v55 = vmul.f32 %v1924_v32, %v1913_v24  ;;  %v1897_v5 = vmul.f32 %v1895_v3, %v1877_v37  ;;  %v1868_v1 = vmul.f32 %v1866_v41, %v1841_v38 }
 0x40c   : > { %v1884_v59 = vadd.f32 %v1883_v58, %v1848_v40  ;;  %v1902_v26 = vstv %s5034_s25  ;;  %v1919_v53 = vmul.f32 %v1917_v52, %v1913_v24  ;;  %v1933_v45 = vmul.f32 %v1931_v56, %v1913_v24 }
 0x40d   : > { %v1927_v25 = vadd.f32 %v1926_v55, %v1891_v18  ;;  %v1898_v12 = vadd.f32 %v1897_v5, %v1862_v10  ;;  %v1869_v42 = vadd.f32 %v1868_v1, %v1833_v23  ;;  %v2559_v20 = vpack.c.bf16 %v2130_v0, %v2129_v29 }
 0x40e   : > { %v1938_v14 = vstv %s2875_s2  ;;  %v1904_v48 = vmul.f32 %v1902_v26, %v1877_v37  ;;  %v2562_v44 = vpack.c.bf16 %v2207_v27, %v2206_v21 }
 0x40f   : > { %v1959_v13 = vadd.f32 %v4919_v7, %v1927_v25  ;;  %v1920_v7 = vadd.f32 %v1919_v53, %v1884_v59  ;;  %v1934_v6 = vadd.f32 %v1933_v45, %v1898_v12  ;;  %v1940_v38 = vmul.f32 %v1938_v14, %v1913_v24 }
 0x410   : > { %v1905_v15 = vadd.f32 %v1904_v48, %v1869_v42 }
 0x411   : > { %v1960_v4 = vadd.f32 %v1959_v13, %v4819_v17 }
 0x412   : > { %v1941_v33 = vadd.f32 %v1940_v38, %v1905_v15 }
 0x413   : > { %v1961_v8 = vmax.f32 %v1960_v4, 0.0 }
 0x415   : > { %2529 = vmatmul.mubr.msk.f32.vlgmr.msra.gmra.mrb[0].mxu0 %vm1981_vm7, %v1961_v8 }
 0x416   : > { %2560 = vmatpush3.bf16.msra.mxu0 %v2559_v20  ;;  %2542 = vmatprep.mubr.msk.f32.mxu0 %vm3479_vm6, %v3480_v28 }
 0x419   : > { %v1950_v19 = vpop.permute.xlu0 %1949  ;;  %v1964_v22 = vpop.permute.xlu1 %1963 }
 0x41a   : > { %v1952_v17 = vadd.f32 %v1950_v19, %v1920_v7  ;;  %v1966_v57 = vadd.f32 %v1964_v22, %v1934_v6 }
 0x41c   : > { %v1953_v51 = vadd.f32 %v1952_v17, %v4811_v50  ;;  %v1967_v63 = vadd.f32 %v1966_v57, %v4827_v35 }
 0x41e   : > { %v1954_v2 = vmax.f32 %v1953_v51, 0.0  ;;  %v1968_v37 = vmax.f32 %v1967_v63, 0.0  ;;  %v1971_v31 = vpop.permute.xlu1 %1970 }
 0x41f   : > { %v1973_v47 = vadd.f32 %v1971_v31, %v1941_v33 }
 0x420   : > { %2536 = vmatmul.mubr.msk.f32.vlgmr.msra.gmra.mrb[0].mxu1 %vm1981_vm7, %v1954_v2  ;;  %2543 = vmatmul.mubr.msk.f32.vlgmr.msra.gmra.mrb[2].mxu0 %vm1981_vm7, %v1968_v37 }
 0x421   : > { %v1974_v60 = vadd.f32 %v1973_v47, %v4834_v43  ;;  %2563 = vmatpush3.bf16.msra.mxu1 %v2562_v44  ;;  %2549 = vmatprep.mubr.msk.f32.mxu1 %vm3479_vm6, %v3480_v28  ;;  %v2507_v43 = vld [vmem:[#allocation19] ss:$0 sm:$0xff] }
 0x423   : > { %v1975_v50 = vmax.f32 %v1974_v60, 0.0 }
 0x425   : > { %2550 = vmatmul.mubr.msk.f32.vlgmr.msra.gmra.mrb[2].mxu1 %vm1981_vm7, %v1975_v50 }
 0x4e8   : > { %v2051_v35 = vpop.f32.mrb[0].mxu0 }
 0x4e9   : > { %v2530_v49 = vpop.f32.mrb[1].mxu0 }
 0x4f3   : > { %v2124_v16 = vpop.f32.mrb[0].mxu1  ;;  %v2200_v46 = vpop.f32.mrb[2].mxu0 }
 0x4f4   : > { %v2125_v54 = vadd.f32 %v2124_v16, %v2051_v35  ;;  %v2537_v32 = vpop.f32.mrb[1].mxu1  ;;  %v2544_v39 = vpop.f32.mrb[3].mxu0 }
 0x4f6   : > { %v2204_v34 = vadd.f32 %v2200_v46, %v2125_v54 }
 0x4f8   : > { %v2277_v9 = vpop.f32.mrb[2].mxu1 }
 0x4f9   : > { %v2281_v28 = vadd.f32 %v2277_v9, %v2204_v34  ;;  %v2551_v24 = vpop.f32.mrb[3].mxu1 }
 0x4fb   : > { %v2289_v30 = vadd.f32 %v2507_v43, %v2281_v28 }
 0x4fd   : > { %2291 = vst.msk [vmem:[%s534_s5] sm:$0xff] %vm2290_vm8, %v2289_v30 }
 0x4fe   : > { %3378 = shalt.err (!%p3375_p8)
}
 0x4ff   : > { %s3379_s20 = scalar_lea.hbm %s5077_s22, 128  ;;  %s3383_s26 = scalar_lea.hbm %s5234_s10, 256 }
 0x500   : > { %p3380_p10 = scmp.ne.s32.totalorder %s5077_s22, %s3379_s20  ;;  %p3384_p12 = scmp.lt.u32.totalorder %s5077_s22, %s5234_s10 }
 0x501   : > { %p3385_p5 = scmp.lt.u32.totalorder %s3383_s26, %s3379_s20  ;;  %p3387_p4 = scmp.lt.u32.totalorder %s3379_s20, %s5077_s22 }
 0x502   : > { %p3381_p11 = pnand %p3380_p10, %p5235_p1 }
 0x503   : > { %p3386_p7 = por %p3385_p5, %p3384_p12 }
 0x504   : > { %p3382_p6 = pneg %p3381_p11 }
 0x505   : > { %p3388_p3 = por %p3387_p4, %p3386_p7 }
 0x507   : > { %p3389_p9 = pnand %p3388_p3, %p3382_p6 }
 0x509   : > { %3392 = shalt.err (!%p3389_p9)
}
 0x50a   : > { %2918 = dma.vmem_to_hbm [thread:$0]  (%p5235_p1), %s5079_s7, 128, %s5077_s22, %s2293_s17  }
 0x50b PF: > { %s5236_s12 = sld [smem:[#allocation28_spill]]  ;;  %s5237_s29 = sld [smem:[#allocation37_spill]] }
 0x50c   : > { %s5238_s3 = sld [smem:[#allocation31_spill]] }
 0x511   : > { %s2318_s11 = sand.u32 1, %s5236_s12   ;;  %p5239_p13 = scmp.ne.s32.totalorder %s5237_s29, 0 }
 0x512   : > { %p5240_p0 = scmp.ge.s32.totalorder %s5238_s3, 2  ;;  %s2319_s25 = scalar_lea.sflag [#allocation4], %s2318_s11 }
 0x514   : > { %p2956_p2 = pnand %p5240_p0, %p5239_p13 }
 0x516   : > { %3434 = dma.done.wait (!%p2956_p2), %s2319_s25, 128  }
 0x517   : > { %3436 = vsyncadd (!%p2956_p2), %s2319_s25, 4294967168  ;;  %s5241_s20 = sld [smem:[#allocation34_spill]]  ;;  %s5242_s17 = sld [smem:[#allocation29_spill]] }
 0x518   : > { %s5243_s18 = sld [smem:[#allocation30_spill]]  ;;  %s5244_s19 = sld [smem:[#allocation35_spill]] }
 0x51d   : > { %p29_p8 = scmp.ge.s32.totalorder %s5241_s20, 4  }
 0x51f   :  { %31 = sbr.rel (!%p29_p8) target bundleno = 23 (0x17), region = 158 }
 0x526   :  { %2324 = vsyncpa [#allocation3], 1 }
 0x527   :  { %2326 = vsyncpa [#allocation3 + $0x1], 1 }
 0x528   :  { %2327 = vsyncpa [#allocation6], 1 }
 0x529   :  { %2328 = vsyncpa [#allocation9], 1 }
 0x52a   :  { %2329 = vsyncpa [#allocation12], 1 }
 0x52b   :  { %2330 = vsyncpa [#allocation15], 1 }
 0x52c   :  { %2331 = vsyncpa [#allocation18], 1 }
 0x52d   :  { %2332 = vsyncpa [#allocation4], 1 }
 0x52e   :  { %2334 = vsyncpa [#allocation4 + $0x1], 1 }

</bundles_post_ra>
